<compile_context>
chip_gen: v7x
topology: tpu7x:2x2x1
jax: 0.10.0
libtpu: 0.0.40
codegen_flags: <defaults>
</compile_context>

<pallas_src>
import jax
import jax.numpy as jnp
from jax.experimental import pallas as pl
from jax.experimental.pallas import tpu as pltpu


def _layer_norm(x, gamma, beta, eps=1e-5):
    mu = jnp.mean(x, axis=-1, keepdims=True)
    var = jnp.mean((x - mu) ** 2, axis=-1, keepdims=True)
    return (x - mu) * jax.lax.rsqrt(var + eps) * gamma + beta


def _make_kernel(spatial_shapes, n_heads, n_points, d_model, mxu_dtype):
    L = len(spatial_shapes)
    M = n_heads
    P = n_points
    D = d_model // n_heads

    level_start = []
    s = 0
    for (H, W) in spatial_shapes:
        level_start.append(s)
        s += H * W
    S = s  # total flattened spatial length (= Len_q = Len_in)

    def kernel(*refs):
        (src_q_ref, pos_ref, ref_ref, src_full_ref) = refs[:4]
        coord_refs = refs[4:4 + 2 * L]
        (wv_ref, bv_ref,        # value_proj
         wo_ref, bo_ref,        # sampling_offsets
         wa_ref, ba_ref,        # attention_weights
         wp_ref, bp_ref,        # output_proj
         g1_ref, be1_ref,       # norm1
         w1_ref, b1_ref,        # linear1
         w2_ref, b2_ref,        # linear2
         g2_ref, be2_ref) = refs[4 + 2 * L:4 + 2 * L + 16]  # norm2
        out_ref = refs[-1]

        f32 = jnp.float32
        src_q = src_q_ref[0]          # [TQ, C]  query tile of src
        q = src_q + pos_ref[0]        # with_pos_embed
        refp = ref_ref[0]             # [TQ, 2L] (x,y per level)
        src_full = src_full_ref[0]    # [S, C]   value path sees every token
        TQ = q.shape[0]

        def mm(x, w_ref, b_ref):
            # MXU: bf16 operands, f32 accumulation.
            return (jnp.dot(x.astype(mxu_dtype), w_ref[...].astype(mxu_dtype),
                            preferred_element_type=f32) + b_ref[...])

        # ---- MSDeformAttn projections ----
        value = mm(src_full, wv_ref, bv_ref)      # [S, C]
        # TODO(synk): padding_mask is None in this setup; supporting it would
        # only zero masked rows of `value`.
        offs = mm(q, wo_ref, bo_ref)              # [TQ, M*L*P*2]
        logit = mm(q, wa_ref, ba_ref)             # [TQ, M*L*P]
        value_c = value.astype(mxu_dtype)

        # per-head softmax over the L*P sampling points (f32 math, EUP recip)
        attns = []
        for m in range(M):
            lg = logit[:, m * L * P:(m + 1) * L * P]
            lg = lg - jnp.max(lg, axis=-1, keepdims=True)
            e = jnp.exp(lg)
            attns.append(e * pl.reciprocal(jnp.sum(e, axis=-1, keepdims=True),
                                           approx=True))

        head_acc = [jnp.zeros((TQ, D), f32) for _ in range(M)]

        # ---- deformable sampling: per-level gather matrices ----
        # For each level, build G[m] of shape [TQ, H_l*W_l] (NOT [TQ, S]) and
        # matmul it against this level's value rows only.  Bilinear sampling
        # with zero padding is the "tent"
        #     w(pixel) = relu(1 - |px - x|) * relu(1 - |py - y|)
        # which is nonzero exactly on the (<=4) nearest in-bounds pixels and
        # equals grid_sample(align_corners=False, padding_mode='zeros').
        for l, (Hl, Wl) in enumerate(spatial_shapes):
            start = level_start[l]
            HW = Hl * Wl
            px = coord_refs[2 * l][...]        # [1, HW] pixel x coordinate
            py = coord_refs[2 * l + 1][...]    # [1, HW] pixel y coordinate
            rx = refp[:, 2 * l:2 * l + 1]      # [TQ, 1] normalized x (width)
            ry = refp[:, 2 * l + 1:2 * l + 2]  # [TQ, 1] normalized y (height)
            v_l = value_c[start:start + HW, :]           # [HW, C]
            for m in range(M):
                a_m = attns[m]
                G = None                                  # [TQ, HW]
                for p in range(P):
                    base = ((m * L + l) * P + p) * 2
                    ox = offs[:, base:base + 1]
                    oy = offs[:, base + 1:base + 2]
                    a = a_m[:, l * P + p:l * P + p + 1]   # [TQ, 1]
                    # sampling loc in [0,1] -> pixel coords (align_corners=False)
                    x = (rx + ox * (1.0 / float(Wl))) * float(Wl) - 0.5
                    y = (ry + oy * (1.0 / float(Hl))) * float(Hl) - 0.5
                    wx = jnp.maximum(1.0 - jnp.abs(px - x), 0.0)   # [TQ, HW]
                    wy = jnp.maximum(1.0 - jnp.abs(py - y), 0.0)   # [TQ, HW]
                    w = (a * wx) * wy
                    G = w if G is None else G + w
                # accumulate this level's contribution for head m (MXU)
                head_acc[m] = head_acc[m] + jnp.dot(
                    G.astype(mxu_dtype), v_l[:, m * D:(m + 1) * D],
                    preferred_element_type=f32)

        attn_out = jnp.concatenate(head_acc, axis=-1)     # [TQ, C]

        # output_proj + residual + LayerNorm1  (dropout = identity, inference)
        src2 = mm(attn_out, wp_ref, bp_ref)
        x = _layer_norm(src_q + src2, g1_ref[...], be1_ref[...])

        # FFN: linear1 -> relu -> linear2 -> residual -> LayerNorm2
        h = jnp.maximum(mm(x, w1_ref, b1_ref), 0.0)
        y = mm(h, w2_ref, b2_ref)
        x = _layer_norm(x + y, g2_ref[...], be2_ref[...])

        out_ref[0] = x.astype(out_ref.dtype)

    return kernel


def deformable_encoder_layer(src, pos, reference_points, params, spatial_shapes,
                             n_heads, n_points, query_tile=16,
                             mxu_dtype=jnp.bfloat16):
    B, S, C = src.shape
    L = len(spatial_shapes)
    assert S == sum(h * w for h, w in spatial_shapes)
    TQ = min(query_tile, S)
    assert S % TQ == 0 and TQ % 8 == 0, "query tile must divide S, multiple of 8"

    kernel = _make_kernel(spatial_shapes, n_heads, n_points, C, mxu_dtype)

    # reference points flattened to last dim L*2 for lane-friendly slicing
    ref_flat = reference_points.reshape(B, S, L * 2).astype(jnp.float32)

    # per-level pixel-coordinate rows (hoisted out of the kernel)
    coord_args = []
    for (H, W) in spatial_shapes:
        lane = jnp.arange(H * W, dtype=jnp.int32)
        coord_args.append((lane % W).astype(jnp.float32).reshape(1, H * W))
        coord_args.append((lane // W).astype(jnp.float32).reshape(1, H * W))

    weight_args = [
        params["w_value"], params["b_value"],
        params["w_off"],   params["b_off"],
        params["w_attn"],  params["b_attn"],
        params["w_out"],   params["b_out"],
        params["g_norm1"], params["b_norm1"],
        params["w_ffn1"],  params["b_ffn1"],
        params["w_ffn2"],  params["b_ffn2"],
        params["g_norm2"], params["b_norm2"],
    ]

    in_specs = [
        pl.BlockSpec((1, TQ, C), lambda b, t: (b, t, 0)),      # src (query tile)
        pl.BlockSpec((1, TQ, C), lambda b, t: (b, t, 0)),      # pos (query tile)
        pl.BlockSpec((1, TQ, L * 2), lambda b, t: (b, t, 0)),  # ref points tile
        pl.BlockSpec((1, S, C), lambda b, t: (b, 0, 0)),       # src (full, value)
    ]
    for c in coord_args:
        in_specs.append(pl.BlockSpec(c.shape, lambda b, t: (0, 0)))
    for w in weight_args:
        in_specs.append(pl.BlockSpec(w.shape, lambda b, t, _nd=w.ndim: (0,) * _nd))

    return pl.pallas_call(
        kernel,
        out_shape=jax.ShapeDtypeStruct((B, S, C), jnp.float32),
        grid=(B, S // TQ),
        in_specs=in_specs,
        out_specs=pl.BlockSpec((1, TQ, C), lambda b, t: (b, t, 0)),
        compiler_params=pltpu.CompilerParams(
            dimension_semantics=("parallel", "parallel")),
    )(src, pos, ref_flat, src, *coord_args, *weight_args)


if __name__ == "__main__":
    # small, module-consistent config
    d_model, d_ffn = 32, 64
    n_levels, n_heads, n_points = 2, 4, 2
    spatial_shapes = ((8, 8), (4, 4))          # (H, W) per level
    S = sum(h * w for h, w in spatial_shapes)  # 80 tokens
    B = 2

    key = jax.random.PRNGKey(0)
    ks = jax.random.split(key, 20)

    def nrm(k, shape, scale=0.05):
        return (scale * jax.random.normal(k, shape)).astype(jnp.float32)

    params = {
        "w_value": nrm(ks[0], (d_model, d_model)),
        "b_value": nrm(ks[1], (1, d_model)),
        "w_off":   nrm(ks[2], (d_model, n_heads * n_levels * n_points * 2), 0.02),
        "b_off":   nrm(ks[3], (1, n_heads * n_levels * n_points * 2), 0.02),
        "w_attn":  nrm(ks[4], (d_model, n_heads * n_levels * n_points)),
        "b_attn":  nrm(ks[5], (1, n_heads * n_levels * n_points)),
        "w_out":   nrm(ks[6], (d_model, d_model)),
        "b_out":   nrm(ks[7], (1, d_model)),
        "g_norm1": jnp.ones((1, d_model), jnp.float32),
        "b_norm1": jnp.zeros((1, d_model), jnp.float32),
        "w_ffn1":  nrm(ks[8], (d_model, d_ffn)),
        "b_ffn1":  nrm(ks[9], (1, d_ffn)),
        "w_ffn2":  nrm(ks[10], (d_ffn, d_model)),
        "b_ffn2":  nrm(ks[11], (1, d_model)),
        "g_norm2": jnp.ones((1, d_model), jnp.float32),
        "b_norm2": jnp.zeros((1, d_model), jnp.float32),
    }

    src = jax.random.normal(ks[12], (B, S, d_model), jnp.float32)
    pos = jax.random.normal(ks[13], (B, S, d_model), jnp.float32)
    reference_points = jax.random.uniform(ks[14], (B, S, n_levels, 2), jnp.float32)

    out = deformable_encoder_layer(src, pos, reference_points, params,
                                   spatial_shapes, n_heads, n_points,
                                   query_tile=16)
    out = jax.block_until_ready(out)
    assert out.shape == (B, S, d_model)
    assert bool(jnp.all(jnp.isfinite(out)))
    print("KERNEL_OK")
</pallas_src>

<mosaic_0001>
module attributes {stable_mosaic.version = 11 : i64} {
  func.func @kernel(%arg0: i32, %arg1: i32, %arg2: memref<1x16x32xf32, #tpu.memory_space<vmem>>, %arg3: memref<1x16x32xf32, #tpu.memory_space<vmem>>, %arg4: memref<1x16x4xf32, #tpu.memory_space<vmem>>, %arg5: memref<1x80x32xf32, #tpu.memory_space<vmem>>, %arg6: memref<1x64xf32, #tpu.memory_space<vmem>>, %arg7: memref<1x64xf32, #tpu.memory_space<vmem>>, %arg8: memref<1x16xf32, #tpu.memory_space<vmem>>, %arg9: memref<1x16xf32, #tpu.memory_space<vmem>>, %arg10: memref<32x32xf32, #tpu.memory_space<vmem>>, %arg11: memref<1x32xf32, #tpu.memory_space<vmem>>, %arg12: memref<32x32xf32, #tpu.memory_space<vmem>>, %arg13: memref<1x32xf32, #tpu.memory_space<vmem>>, %arg14: memref<32x16xf32, #tpu.memory_space<vmem>>, %arg15: memref<1x16xf32, #tpu.memory_space<vmem>>, %arg16: memref<32x32xf32, #tpu.memory_space<vmem>>, %arg17: memref<1x32xf32, #tpu.memory_space<vmem>>, %arg18: memref<1x32xf32, #tpu.memory_space<vmem>>, %arg19: memref<1x32xf32, #tpu.memory_space<vmem>>, %arg20: memref<32x64xf32, #tpu.memory_space<vmem>>, %arg21: memref<1x64xf32, #tpu.memory_space<vmem>>, %arg22: memref<64x32xf32, #tpu.memory_space<vmem>>, %arg23: memref<1x32xf32, #tpu.memory_space<vmem>>, %arg24: memref<1x32xf32, #tpu.memory_space<vmem>>, %arg25: memref<1x32xf32, #tpu.memory_space<vmem>>, %arg26: memref<1x16x32xf32, #tpu.memory_space<vmem>>) attributes {dimension_semantics = [#tpu.dimension_semantics<parallel>, #tpu.dimension_semantics<parallel>], iteration_bounds = array<i64: 2, 5>, scalar_prefetch = 0 : i64, scratch_operands = 0 : i64, tpu.core_type = #tpu.core_type<tc>, window_params = [{transform_indices = @transform_0, window_bounds = array<i64: 1, 16, 32>}, {transform_indices = @transform_1, window_bounds = array<i64: 1, 16, 32>}, {transform_indices = @transform_2, window_bounds = array<i64: 1, 16, 4>}, {transform_indices = @transform_3, window_bounds = array<i64: 1, 80, 32>}, {pipeline_mode = #tpu.pipeline_mode<synchronous>, transform_indices = @transform_4, window_bounds = array<i64: 1, 64>}, {pipeline_mode = #tpu.pipeline_mode<synchronous>, transform_indices = @transform_5, window_bounds = array<i64: 1, 64>}, {pipeline_mode = #tpu.pipeline_mode<synchronous>, transform_indices = @transform_6, window_bounds = array<i64: 1, 16>}, {pipeline_mode = #tpu.pipeline_mode<synchronous>, transform_indices = @transform_7, window_bounds = array<i64: 1, 16>}, {pipeline_mode = #tpu.pipeline_mode<synchronous>, transform_indices = @transform_8, window_bounds = array<i64: 32, 32>}, {pipeline_mode = #tpu.pipeline_mode<synchronous>, transform_indices = @transform_9, window_bounds = array<i64: 1, 32>}, {pipeline_mode = #tpu.pipeline_mode<synchronous>, transform_indices = @transform_10, window_bounds = array<i64: 32, 32>}, {pipeline_mode = #tpu.pipeline_mode<synchronous>, transform_indices = @transform_11, window_bounds = array<i64: 1, 32>}, {pipeline_mode = #tpu.pipeline_mode<synchronous>, transform_indices = @transform_12, window_bounds = array<i64: 32, 16>}, {pipeline_mode = #tpu.pipeline_mode<synchronous>, transform_indices = @transform_13, window_bounds = array<i64: 1, 16>}, {pipeline_mode = #tpu.pipeline_mode<synchronous>, transform_indices = @transform_14, window_bounds = array<i64: 32, 32>}, {pipeline_mode = #tpu.pipeline_mode<synchronous>, transform_indices = @transform_15, window_bounds = array<i64: 1, 32>}, {pipeline_mode = #tpu.pipeline_mode<synchronous>, transform_indices = @transform_16, window_bounds = array<i64: 1, 32>}, {pipeline_mode = #tpu.pipeline_mode<synchronous>, transform_indices = @transform_17, window_bounds = array<i64: 1, 32>}, {pipeline_mode = #tpu.pipeline_mode<synchronous>, transform_indices = @transform_18, window_bounds = array<i64: 32, 64>}, {pipeline_mode = #tpu.pipeline_mode<synchronous>, transform_indices = @transform_19, window_bounds = array<i64: 1, 64>}, {pipeline_mode = #tpu.pipeline_mode<synchronous>, transform_indices = @transform_20, window_bounds = array<i64: 64, 32>}, {pipeline_mode = #tpu.pipeline_mode<synchronous>, transform_indices = @transform_21, window_bounds = array<i64: 1, 32>}, {pipeline_mode = #tpu.pipeline_mode<synchronous>, transform_indices = @transform_22, window_bounds = array<i64: 1, 32>}, {pipeline_mode = #tpu.pipeline_mode<synchronous>, transform_indices = @transform_23, window_bounds = array<i64: 1, 32>}, {transform_indices = @transform_24, window_bounds = array<i64: 1, 16, 32>}]} {
    %c0 = arith.constant 0 : index
    %c0_0 = arith.constant 0 : index
    %c0_1 = arith.constant 0 : index
    %0 = vector.load %arg2[%c0, %c0_0, %c0_1] : memref<1x16x32xf32, #tpu.memory_space<vmem>>, vector<1x16x32xf32>
    %1 = vector.shape_cast %0 : vector<1x16x32xf32> to vector<16x32xf32>
    %c0_2 = arith.constant 0 : index
    %c0_3 = arith.constant 0 : index
    %c0_4 = arith.constant 0 : index
    %2 = vector.load %arg3[%c0_2, %c0_3, %c0_4] : memref<1x16x32xf32, #tpu.memory_space<vmem>>, vector<1x16x32xf32>
    %3 = vector.shape_cast %2 : vector<1x16x32xf32> to vector<16x32xf32>
    %4 = arith.addf %1, %3 : vector<16x32xf32>
    %c0_5 = arith.constant 0 : index
    %c0_6 = arith.constant 0 : index
    %c0_7 = arith.constant 0 : index
    %5 = vector.load %arg4[%c0_5, %c0_6, %c0_7] : memref<1x16x4xf32, #tpu.memory_space<vmem>>, vector<1x16x4xf32>
    %6 = vector.shape_cast %5 : vector<1x16x4xf32> to vector<16x4xf32>
    %c0_8 = arith.constant 0 : index
    %c0_9 = arith.constant 0 : index
    %c0_10 = arith.constant 0 : index
    %7 = vector.load %arg5[%c0_8, %c0_9, %c0_10] : memref<1x80x32xf32, #tpu.memory_space<vmem>>, vector<1x80x32xf32>
    %8 = vector.shape_cast %7 : vector<1x80x32xf32> to vector<80x32xf32>
    %9 = arith.truncf %8 : vector<80x32xf32> to vector<80x32xbf16>
    %c0_11 = arith.constant 0 : index
    %c0_12 = arith.constant 0 : index
    %10 = vector.load %arg10[%c0_11, %c0_12] : memref<32x32xf32, #tpu.memory_space<vmem>>, vector<32x32xf32>
    %11 = arith.truncf %10 : vector<32x32xf32> to vector<32x32xbf16>
    %cst = arith.constant dense<0.000000e+00> : vector<80x32xf32>
    %12 = tpu.matmul %9, %11, %cst {dimension_numbers = #tpu.dot_dimension_numbers<[1], [0], [0], [1], [0, 0, 1, 1], [], []>} : vector<80x32xbf16>, vector<32x32xbf16>, vector<80x32xf32> -> vector<80x32xf32>
    %c0_13 = arith.constant 0 : index
    %c0_14 = arith.constant 0 : index
    %13 = vector.load %arg11[%c0_13, %c0_14] : memref<1x32xf32, #tpu.memory_space<vmem>>, vector<1x32xf32>
    %14 = vector.broadcast %13 : vector<1x32xf32> to vector<80x32xf32>
    %15 = arith.addf %12, %14 : vector<80x32xf32>
    %16 = arith.truncf %4 : vector<16x32xf32> to vector<16x32xbf16>
    %c0_15 = arith.constant 0 : index
    %c0_16 = arith.constant 0 : index
    %17 = vector.load %arg12[%c0_15, %c0_16] : memref<32x32xf32, #tpu.memory_space<vmem>>, vector<32x32xf32>
    %18 = arith.truncf %17 : vector<32x32xf32> to vector<32x32xbf16>
    %cst_17 = arith.constant dense<0.000000e+00> : vector<16x32xf32>
    %19 = tpu.matmul %16, %18, %cst_17 {dimension_numbers = #tpu.dot_dimension_numbers<[1], [0], [0], [1], [0, 0, 1, 1], [], []>} : vector<16x32xbf16>, vector<32x32xbf16>, vector<16x32xf32> -> vector<16x32xf32>
    %c0_18 = arith.constant 0 : index
    %c0_19 = arith.constant 0 : index
    %20 = vector.load %arg13[%c0_18, %c0_19] : memref<1x32xf32, #tpu.memory_space<vmem>>, vector<1x32xf32>
    %21 = vector.broadcast %20 : vector<1x32xf32> to vector<16x32xf32>
    %22 = arith.addf %19, %21 : vector<16x32xf32>
    %23 = arith.truncf %4 : vector<16x32xf32> to vector<16x32xbf16>
    %c0_20 = arith.constant 0 : index
    %c0_21 = arith.constant 0 : index
    %24 = vector.load %arg14[%c0_20, %c0_21] : memref<32x16xf32, #tpu.memory_space<vmem>>, vector<32x16xf32>
    %25 = arith.truncf %24 : vector<32x16xf32> to vector<32x16xbf16>
    %cst_22 = arith.constant dense<0.000000e+00> : vector<16x16xf32>
    %26 = tpu.matmul %23, %25, %cst_22 {dimension_numbers = #tpu.dot_dimension_numbers<[1], [0], [0], [1], [0, 0, 1, 1], [], []>} : vector<16x32xbf16>, vector<32x16xbf16>, vector<16x16xf32> -> vector<16x16xf32>
    %c0_23 = arith.constant 0 : index
    %c0_24 = arith.constant 0 : index
    %27 = vector.load %arg15[%c0_23, %c0_24] : memref<1x16xf32, #tpu.memory_space<vmem>>, vector<1x16xf32>
    %28 = vector.broadcast %27 : vector<1x16xf32> to vector<16x16xf32>
    %29 = arith.addf %26, %28 : vector<16x16xf32>
    %30 = arith.truncf %15 : vector<80x32xf32> to vector<80x32xbf16>
    %31 = vector.extract_strided_slice %29 {offsets = [0, 0], sizes = [16, 4], strides = [1, 1]} : vector<16x16xf32> to vector<16x4xf32>
    %cst_25 = arith.constant dense<0xFF800000> : vector<16xf32>
    %32 = vector.multi_reduction <maximumf>, %31, %cst_25 [1] : vector<16x4xf32> to vector<16xf32>
    %33 = vector.shape_cast %32 : vector<16xf32> to vector<16x1xf32>
    %34 = vector.broadcast %33 : vector<16x1xf32> to vector<16x4xf32>
    %35 = arith.subf %31, %34 : vector<16x4xf32>
    %36 = math.exp %35 : vector<16x4xf32>
    %cst_26 = arith.constant dense<0.000000e+00> : vector<16xf32>
    %37 = vector.multi_reduction <add>, %36, %cst_26 [1] : vector<16x4xf32> to vector<16xf32>
    %38 = vector.shape_cast %37 : vector<16xf32> to vector<16x1xf32>
    %39 = tpu.reciprocal %38 {approx = true} : vector<16x1xf32> -> vector<16x1xf32>
    %40 = vector.broadcast %39 : vector<16x1xf32> to vector<16x4xf32>
    %41 = arith.mulf %36, %40 : vector<16x4xf32>
    %42 = vector.extract_strided_slice %29 {offsets = [0, 4], sizes = [16, 4], strides = [1, 1]} : vector<16x16xf32> to vector<16x4xf32>
    %cst_27 = arith.constant dense<0xFF800000> : vector<16xf32>
    %43 = vector.multi_reduction <maximumf>, %42, %cst_27 [1] : vector<16x4xf32> to vector<16xf32>
    %44 = vector.shape_cast %43 : vector<16xf32> to vector<16x1xf32>
    %45 = vector.broadcast %44 : vector<16x1xf32> to vector<16x4xf32>
    %46 = arith.subf %42, %45 : vector<16x4xf32>
    %47 = math.exp %46 : vector<16x4xf32>
    %cst_28 = arith.constant dense<0.000000e+00> : vector<16xf32>
    %48 = vector.multi_reduction <add>, %47, %cst_28 [1] : vector<16x4xf32> to vector<16xf32>
    %49 = vector.shape_cast %48 : vector<16xf32> to vector<16x1xf32>
    %50 = tpu.reciprocal %49 {approx = true} : vector<16x1xf32> -> vector<16x1xf32>
    %51 = vector.broadcast %50 : vector<16x1xf32> to vector<16x4xf32>
    %52 = arith.mulf %47, %51 : vector<16x4xf32>
    %53 = vector.extract_strided_slice %29 {offsets = [0, 8], sizes = [16, 4], strides = [1, 1]} : vector<16x16xf32> to vector<16x4xf32>
    %cst_29 = arith.constant dense<0xFF800000> : vector<16xf32>
    %54 = vector.multi_reduction <maximumf>, %53, %cst_29 [1] : vector<16x4xf32> to vector<16xf32>
    %55 = vector.shape_cast %54 : vector<16xf32> to vector<16x1xf32>
    %56 = vector.broadcast %55 : vector<16x1xf32> to vector<16x4xf32>
    %57 = arith.subf %53, %56 : vector<16x4xf32>
    %58 = math.exp %57 : vector<16x4xf32>
    %cst_30 = arith.constant dense<0.000000e+00> : vector<16xf32>
    %59 = vector.multi_reduction <add>, %58, %cst_30 [1] : vector<16x4xf32> to vector<16xf32>
    %60 = vector.shape_cast %59 : vector<16xf32> to vector<16x1xf32>
    %61 = tpu.reciprocal %60 {approx = true} : vector<16x1xf32> -> vector<16x1xf32>
    %62 = vector.broadcast %61 : vector<16x1xf32> to vector<16x4xf32>
    %63 = arith.mulf %58, %62 : vector<16x4xf32>
    %64 = vector.extract_strided_slice %29 {offsets = [0, 12], sizes = [16, 4], strides = [1, 1]} : vector<16x16xf32> to vector<16x4xf32>
    %cst_31 = arith.constant dense<0xFF800000> : vector<16xf32>
    %65 = vector.multi_reduction <maximumf>, %64, %cst_31 [1] : vector<16x4xf32> to vector<16xf32>
    %66 = vector.shape_cast %65 : vector<16xf32> to vector<16x1xf32>
    %67 = vector.broadcast %66 : vector<16x1xf32> to vector<16x4xf32>
    %68 = arith.subf %64, %67 : vector<16x4xf32>
    %69 = math.exp %68 : vector<16x4xf32>
    %cst_32 = arith.constant dense<0.000000e+00> : vector<16xf32>
    %70 = vector.multi_reduction <add>, %69, %cst_32 [1] : vector<16x4xf32> to vector<16xf32>
    %71 = vector.shape_cast %70 : vector<16xf32> to vector<16x1xf32>
    %72 = tpu.reciprocal %71 {approx = true} : vector<16x1xf32> -> vector<16x1xf32>
    %73 = vector.broadcast %72 : vector<16x1xf32> to vector<16x4xf32>
    %74 = arith.mulf %69, %73 : vector<16x4xf32>
    %cst_33 = arith.constant 0.000000e+00 : f32
    %75 = vector.broadcast %cst_33 : f32 to vector<16x8xf32>
    %cst_34 = arith.constant 0.000000e+00 : f32
    %76 = vector.broadcast %cst_34 : f32 to vector<16x8xf32>
    %cst_35 = arith.constant 0.000000e+00 : f32
    %77 = vector.broadcast %cst_35 : f32 to vector<16x8xf32>
    %cst_36 = arith.constant 0.000000e+00 : f32
    %78 = vector.broadcast %cst_36 : f32 to vector<16x8xf32>
    %c0_37 = arith.constant 0 : index
    %c0_38 = arith.constant 0 : index
    %79 = vector.load %arg6[%c0_37, %c0_38] : memref<1x64xf32, #tpu.memory_space<vmem>>, vector<1x64xf32>
    %c0_39 = arith.constant 0 : index
    %c0_40 = arith.constant 0 : index
    %80 = vector.load %arg7[%c0_39, %c0_40] : memref<1x64xf32, #tpu.memory_space<vmem>>, vector<1x64xf32>
    %81 = vector.extract_strided_slice %6 {offsets = [0, 0], sizes = [16, 1], strides = [1, 1]} : vector<16x4xf32> to vector<16x1xf32>
    %82 = vector.extract_strided_slice %6 {offsets = [0, 1], sizes = [16, 1], strides = [1, 1]} : vector<16x4xf32> to vector<16x1xf32>
    %83 = vector.extract_strided_slice %30 {offsets = [0, 0], sizes = [64, 32], strides = [1, 1]} : vector<80x32xbf16> to vector<64x32xbf16>
    %84 = vector.extract_strided_slice %22 {offsets = [0, 0], sizes = [16, 1], strides = [1, 1]} : vector<16x32xf32> to vector<16x1xf32>
    %85 = vector.extract_strided_slice %22 {offsets = [0, 1], sizes = [16, 1], strides = [1, 1]} : vector<16x32xf32> to vector<16x1xf32>
    %86 = vector.extract_strided_slice %41 {offsets = [0, 0], sizes = [16, 1], strides = [1, 1]} : vector<16x4xf32> to vector<16x1xf32>
    %cst_41 = arith.constant 1.250000e-01 : f32
    %87 = vector.broadcast %cst_41 : f32 to vector<16x1xf32>
    %88 = arith.mulf %84, %87 : vector<16x1xf32>
    %89 = arith.addf %81, %88 : vector<16x1xf32>
    %cst_42 = arith.constant 8.000000e+00 : f32
    %90 = vector.broadcast %cst_42 : f32 to vector<16x1xf32>
    %91 = arith.mulf %89, %90 : vector<16x1xf32>
    %cst_43 = arith.constant 5.000000e-01 : f32
    %92 = vector.broadcast %cst_43 : f32 to vector<16x1xf32>
    %93 = arith.subf %91, %92 : vector<16x1xf32>
    %cst_44 = arith.constant 1.250000e-01 : f32
    %94 = vector.broadcast %cst_44 : f32 to vector<16x1xf32>
    %95 = arith.mulf %85, %94 : vector<16x1xf32>
    %96 = arith.addf %82, %95 : vector<16x1xf32>
    %cst_45 = arith.constant 8.000000e+00 : f32
    %97 = vector.broadcast %cst_45 : f32 to vector<16x1xf32>
    %98 = arith.mulf %96, %97 : vector<16x1xf32>
    %cst_46 = arith.constant 5.000000e-01 : f32
    %99 = vector.broadcast %cst_46 : f32 to vector<16x1xf32>
    %100 = arith.subf %98, %99 : vector<16x1xf32>
    %101 = vector.broadcast %79 : vector<1x64xf32> to vector<16x64xf32>
    %102 = vector.broadcast %93 : vector<16x1xf32> to vector<16x64xf32>
    %103 = arith.subf %101, %102 : vector<16x64xf32>
    %104 = math.absf %103 : vector<16x64xf32>
    %cst_47 = arith.constant 1.000000e+00 : f32
    %105 = vector.broadcast %cst_47 : f32 to vector<16x64xf32>
    %106 = arith.subf %105, %104 : vector<16x64xf32>
    %cst_48 = arith.constant 0.000000e+00 : f32
    %107 = vector.broadcast %cst_48 : f32 to vector<16x64xf32>
    %108 = arith.maximumf %106, %107 : vector<16x64xf32>
    %109 = vector.broadcast %80 : vector<1x64xf32> to vector<16x64xf32>
    %110 = vector.broadcast %100 : vector<16x1xf32> to vector<16x64xf32>
    %111 = arith.subf %109, %110 : vector<16x64xf32>
    %112 = math.absf %111 : vector<16x64xf32>
    %cst_49 = arith.constant 1.000000e+00 : f32
    %113 = vector.broadcast %cst_49 : f32 to vector<16x64xf32>
    %114 = arith.subf %113, %112 : vector<16x64xf32>
    %cst_50 = arith.constant 0.000000e+00 : f32
    %115 = vector.broadcast %cst_50 : f32 to vector<16x64xf32>
    %116 = arith.maximumf %114, %115 : vector<16x64xf32>
    %117 = vector.broadcast %86 : vector<16x1xf32> to vector<16x64xf32>
    %118 = arith.mulf %117, %108 : vector<16x64xf32>
    %119 = arith.mulf %118, %116 : vector<16x64xf32>
    %120 = vector.extract_strided_slice %22 {offsets = [0, 2], sizes = [16, 1], strides = [1, 1]} : vector<16x32xf32> to vector<16x1xf32>
    %121 = vector.extract_strided_slice %22 {offsets = [0, 3], sizes = [16, 1], strides = [1, 1]} : vector<16x32xf32> to vector<16x1xf32>
    %122 = vector.extract_strided_slice %41 {offsets = [0, 1], sizes = [16, 1], strides = [1, 1]} : vector<16x4xf32> to vector<16x1xf32>
    %cst_51 = arith.constant 1.250000e-01 : f32
    %123 = vector.broadcast %cst_51 : f32 to vector<16x1xf32>
    %124 = arith.mulf %120, %123 : vector<16x1xf32>
    %125 = arith.addf %81, %124 : vector<16x1xf32>
    %cst_52 = arith.constant 8.000000e+00 : f32
    %126 = vector.broadcast %cst_52 : f32 to vector<16x1xf32>
    %127 = arith.mulf %125, %126 : vector<16x1xf32>
    %cst_53 = arith.constant 5.000000e-01 : f32
    %128 = vector.broadcast %cst_53 : f32 to vector<16x1xf32>
    %129 = arith.subf %127, %128 : vector<16x1xf32>
    %cst_54 = arith.constant 1.250000e-01 : f32
    %130 = vector.broadcast %cst_54 : f32 to vector<16x1xf32>
    %131 = arith.mulf %121, %130 : vector<16x1xf32>
    %132 = arith.addf %82, %131 : vector<16x1xf32>
    %cst_55 = arith.constant 8.000000e+00 : f32
    %133 = vector.broadcast %cst_55 : f32 to vector<16x1xf32>
    %134 = arith.mulf %132, %133 : vector<16x1xf32>
    %cst_56 = arith.constant 5.000000e-01 : f32
    %135 = vector.broadcast %cst_56 : f32 to vector<16x1xf32>
    %136 = arith.subf %134, %135 : vector<16x1xf32>
    %137 = vector.broadcast %79 : vector<1x64xf32> to vector<16x64xf32>
    %138 = vector.broadcast %129 : vector<16x1xf32> to vector<16x64xf32>
    %139 = arith.subf %137, %138 : vector<16x64xf32>
    %140 = math.absf %139 : vector<16x64xf32>
    %cst_57 = arith.constant 1.000000e+00 : f32
    %141 = vector.broadcast %cst_57 : f32 to vector<16x64xf32>
    %142 = arith.subf %141, %140 : vector<16x64xf32>
    %cst_58 = arith.constant 0.000000e+00 : f32
    %143 = vector.broadcast %cst_58 : f32 to vector<16x64xf32>
    %144 = arith.maximumf %142, %143 : vector<16x64xf32>
    %145 = vector.broadcast %80 : vector<1x64xf32> to vector<16x64xf32>
    %146 = vector.broadcast %136 : vector<16x1xf32> to vector<16x64xf32>
    %147 = arith.subf %145, %146 : vector<16x64xf32>
    %148 = math.absf %147 : vector<16x64xf32>
    %cst_59 = arith.constant 1.000000e+00 : f32
    %149 = vector.broadcast %cst_59 : f32 to vector<16x64xf32>
    %150 = arith.subf %149, %148 : vector<16x64xf32>
    %cst_60 = arith.constant 0.000000e+00 : f32
    %151 = vector.broadcast %cst_60 : f32 to vector<16x64xf32>
    %152 = arith.maximumf %150, %151 : vector<16x64xf32>
    %153 = vector.broadcast %122 : vector<16x1xf32> to vector<16x64xf32>
    %154 = arith.mulf %153, %144 : vector<16x64xf32>
    %155 = arith.mulf %154, %152 : vector<16x64xf32>
    %156 = arith.addf %119, %155 : vector<16x64xf32>
    %157 = arith.truncf %156 : vector<16x64xf32> to vector<16x64xbf16>
    %158 = vector.extract_strided_slice %83 {offsets = [0, 0], sizes = [64, 8], strides = [1, 1]} : vector<64x32xbf16> to vector<64x8xbf16>
    %cst_61 = arith.constant dense<0.000000e+00> : vector<16x8xf32>
    %159 = tpu.matmul %157, %158, %cst_61 {dimension_numbers = #tpu.dot_dimension_numbers<[1], [0], [0], [1], [0, 0, 1, 1], [], []>} : vector<16x64xbf16>, vector<64x8xbf16>, vector<16x8xf32> -> vector<16x8xf32>
    %160 = arith.addf %75, %159 : vector<16x8xf32>
    %161 = vector.extract_strided_slice %22 {offsets = [0, 8], sizes = [16, 1], strides = [1, 1]} : vector<16x32xf32> to vector<16x1xf32>
    %162 = vector.extract_strided_slice %22 {offsets = [0, 9], sizes = [16, 1], strides = [1, 1]} : vector<16x32xf32> to vector<16x1xf32>
    %163 = vector.extract_strided_slice %52 {offsets = [0, 0], sizes = [16, 1], strides = [1, 1]} : vector<16x4xf32> to vector<16x1xf32>
    %cst_62 = arith.constant 1.250000e-01 : f32
    %164 = vector.broadcast %cst_62 : f32 to vector<16x1xf32>
    %165 = arith.mulf %161, %164 : vector<16x1xf32>
    %166 = arith.addf %81, %165 : vector<16x1xf32>
    %cst_63 = arith.constant 8.000000e+00 : f32
    %167 = vector.broadcast %cst_63 : f32 to vector<16x1xf32>
    %168 = arith.mulf %166, %167 : vector<16x1xf32>
    %cst_64 = arith.constant 5.000000e-01 : f32
    %169 = vector.broadcast %cst_64 : f32 to vector<16x1xf32>
    %170 = arith.subf %168, %169 : vector<16x1xf32>
    %cst_65 = arith.constant 1.250000e-01 : f32
    %171 = vector.broadcast %cst_65 : f32 to vector<16x1xf32>
    %172 = arith.mulf %162, %171 : vector<16x1xf32>
    %173 = arith.addf %82, %172 : vector<16x1xf32>
    %cst_66 = arith.constant 8.000000e+00 : f32
    %174 = vector.broadcast %cst_66 : f32 to vector<16x1xf32>
    %175 = arith.mulf %173, %174 : vector<16x1xf32>
    %cst_67 = arith.constant 5.000000e-01 : f32
    %176 = vector.broadcast %cst_67 : f32 to vector<16x1xf32>
    %177 = arith.subf %175, %176 : vector<16x1xf32>
    %178 = vector.broadcast %79 : vector<1x64xf32> to vector<16x64xf32>
    %179 = vector.broadcast %170 : vector<16x1xf32> to vector<16x64xf32>
    %180 = arith.subf %178, %179 : vector<16x64xf32>
    %181 = math.absf %180 : vector<16x64xf32>
    %cst_68 = arith.constant 1.000000e+00 : f32
    %182 = vector.broadcast %cst_68 : f32 to vector<16x64xf32>
    %183 = arith.subf %182, %181 : vector<16x64xf32>
    %cst_69 = arith.constant 0.000000e+00 : f32
    %184 = vector.broadcast %cst_69 : f32 to vector<16x64xf32>
    %185 = arith.maximumf %183, %184 : vector<16x64xf32>
    %186 = vector.broadcast %80 : vector<1x64xf32> to vector<16x64xf32>
    %187 = vector.broadcast %177 : vector<16x1xf32> to vector<16x64xf32>
    %188 = arith.subf %186, %187 : vector<16x64xf32>
    %189 = math.absf %188 : vector<16x64xf32>
    %cst_70 = arith.constant 1.000000e+00 : f32
    %190 = vector.broadcast %cst_70 : f32 to vector<16x64xf32>
    %191 = arith.subf %190, %189 : vector<16x64xf32>
    %cst_71 = arith.constant 0.000000e+00 : f32
    %192 = vector.broadcast %cst_71 : f32 to vector<16x64xf32>
    %193 = arith.maximumf %191, %192 : vector<16x64xf32>
    %194 = vector.broadcast %163 : vector<16x1xf32> to vector<16x64xf32>
    %195 = arith.mulf %194, %185 : vector<16x64xf32>
    %196 = arith.mulf %195, %193 : vector<16x64xf32>
    %197 = vector.extract_strided_slice %22 {offsets = [0, 10], sizes = [16, 1], strides = [1, 1]} : vector<16x32xf32> to vector<16x1xf32>
    %198 = vector.extract_strided_slice %22 {offsets = [0, 11], sizes = [16, 1], strides = [1, 1]} : vector<16x32xf32> to vector<16x1xf32>
    %199 = vector.extract_strided_slice %52 {offsets = [0, 1], sizes = [16, 1], strides = [1, 1]} : vector<16x4xf32> to vector<16x1xf32>
    %cst_72 = arith.constant 1.250000e-01 : f32
    %200 = vector.broadcast %cst_72 : f32 to vector<16x1xf32>
    %201 = arith.mulf %197, %200 : vector<16x1xf32>
    %202 = arith.addf %81, %201 : vector<16x1xf32>
    %cst_73 = arith.constant 8.000000e+00 : f32
    %203 = vector.broadcast %cst_73 : f32 to vector<16x1xf32>
    %204 = arith.mulf %202, %203 : vector<16x1xf32>
    %cst_74 = arith.constant 5.000000e-01 : f32
    %205 = vector.broadcast %cst_74 : f32 to vector<16x1xf32>
    %206 = arith.subf %204, %205 : vector<16x1xf32>
    %cst_75 = arith.constant 1.250000e-01 : f32
    %207 = vector.broadcast %cst_75 : f32 to vector<16x1xf32>
    %208 = arith.mulf %198, %207 : vector<16x1xf32>
    %209 = arith.addf %82, %208 : vector<16x1xf32>
    %cst_76 = arith.constant 8.000000e+00 : f32
    %210 = vector.broadcast %cst_76 : f32 to vector<16x1xf32>
    %211 = arith.mulf %209, %210 : vector<16x1xf32>
    %cst_77 = arith.constant 5.000000e-01 : f32
    %212 = vector.broadcast %cst_77 : f32 to vector<16x1xf32>
    %213 = arith.subf %211, %212 : vector<16x1xf32>
    %214 = vector.broadcast %79 : vector<1x64xf32> to vector<16x64xf32>
    %215 = vector.broadcast %206 : vector<16x1xf32> to vector<16x64xf32>
    %216 = arith.subf %214, %215 : vector<16x64xf32>
    %217 = math.absf %216 : vector<16x64xf32>
    %cst_78 = arith.constant 1.000000e+00 : f32
    %218 = vector.broadcast %cst_78 : f32 to vector<16x64xf32>
    %219 = arith.subf %218, %217 : vector<16x64xf32>
    %cst_79 = arith.constant 0.000000e+00 : f32
    %220 = vector.broadcast %cst_79 : f32 to vector<16x64xf32>
    %221 = arith.maximumf %219, %220 : vector<16x64xf32>
    %222 = vector.broadcast %80 : vector<1x64xf32> to vector<16x64xf32>
    %223 = vector.broadcast %213 : vector<16x1xf32> to vector<16x64xf32>
    %224 = arith.subf %222, %223 : vector<16x64xf32>
    %225 = math.absf %224 : vector<16x64xf32>
    %cst_80 = arith.constant 1.000000e+00 : f32
    %226 = vector.broadcast %cst_80 : f32 to vector<16x64xf32>
    %227 = arith.subf %226, %225 : vector<16x64xf32>
    %cst_81 = arith.constant 0.000000e+00 : f32
    %228 = vector.broadcast %cst_81 : f32 to vector<16x64xf32>
    %229 = arith.maximumf %227, %228 : vector<16x64xf32>
    %230 = vector.broadcast %199 : vector<16x1xf32> to vector<16x64xf32>
    %231 = arith.mulf %230, %221 : vector<16x64xf32>
    %232 = arith.mulf %231, %229 : vector<16x64xf32>
    %233 = arith.addf %196, %232 : vector<16x64xf32>
    %234 = arith.truncf %233 : vector<16x64xf32> to vector<16x64xbf16>
    %235 = vector.extract_strided_slice %83 {offsets = [0, 8], sizes = [64, 8], strides = [1, 1]} : vector<64x32xbf16> to vector<64x8xbf16>
    %cst_82 = arith.constant dense<0.000000e+00> : vector<16x8xf32>
    %236 = tpu.matmul %234, %235, %cst_82 {dimension_numbers = #tpu.dot_dimension_numbers<[1], [0], [0], [1], [0, 0, 1, 1], [], []>} : vector<16x64xbf16>, vector<64x8xbf16>, vector<16x8xf32> -> vector<16x8xf32>
    %237 = arith.addf %76, %236 : vector<16x8xf32>
    %238 = vector.extract_strided_slice %22 {offsets = [0, 16], sizes = [16, 1], strides = [1, 1]} : vector<16x32xf32> to vector<16x1xf32>
    %239 = vector.extract_strided_slice %22 {offsets = [0, 17], sizes = [16, 1], strides = [1, 1]} : vector<16x32xf32> to vector<16x1xf32>
    %240 = vector.extract_strided_slice %63 {offsets = [0, 0], sizes = [16, 1], strides = [1, 1]} : vector<16x4xf32> to vector<16x1xf32>
    %cst_83 = arith.constant 1.250000e-01 : f32
    %241 = vector.broadcast %cst_83 : f32 to vector<16x1xf32>
    %242 = arith.mulf %238, %241 : vector<16x1xf32>
    %243 = arith.addf %81, %242 : vector<16x1xf32>
    %cst_84 = arith.constant 8.000000e+00 : f32
    %244 = vector.broadcast %cst_84 : f32 to vector<16x1xf32>
    %245 = arith.mulf %243, %244 : vector<16x1xf32>
    %cst_85 = arith.constant 5.000000e-01 : f32
    %246 = vector.broadcast %cst_85 : f32 to vector<16x1xf32>
    %247 = arith.subf %245, %246 : vector<16x1xf32>
    %cst_86 = arith.constant 1.250000e-01 : f32
    %248 = vector.broadcast %cst_86 : f32 to vector<16x1xf32>
    %249 = arith.mulf %239, %248 : vector<16x1xf32>
    %250 = arith.addf %82, %249 : vector<16x1xf32>
    %cst_87 = arith.constant 8.000000e+00 : f32
    %251 = vector.broadcast %cst_87 : f32 to vector<16x1xf32>
    %252 = arith.mulf %250, %251 : vector<16x1xf32>
    %cst_88 = arith.constant 5.000000e-01 : f32
    %253 = vector.broadcast %cst_88 : f32 to vector<16x1xf32>
    %254 = arith.subf %252, %253 : vector<16x1xf32>
    %255 = vector.broadcast %79 : vector<1x64xf32> to vector<16x64xf32>
    %256 = vector.broadcast %247 : vector<16x1xf32> to vector<16x64xf32>
    %257 = arith.subf %255, %256 : vector<16x64xf32>
    %258 = math.absf %257 : vector<16x64xf32>
    %cst_89 = arith.constant 1.000000e+00 : f32
    %259 = vector.broadcast %cst_89 : f32 to vector<16x64xf32>
    %260 = arith.subf %259, %258 : vector<16x64xf32>
    %cst_90 = arith.constant 0.000000e+00 : f32
    %261 = vector.broadcast %cst_90 : f32 to vector<16x64xf32>
    %262 = arith.maximumf %260, %261 : vector<16x64xf32>
    %263 = vector.broadcast %80 : vector<1x64xf32> to vector<16x64xf32>
    %264 = vector.broadcast %254 : vector<16x1xf32> to vector<16x64xf32>
    %265 = arith.subf %263, %264 : vector<16x64xf32>
    %266 = math.absf %265 : vector<16x64xf32>
    %cst_91 = arith.constant 1.000000e+00 : f32
    %267 = vector.broadcast %cst_91 : f32 to vector<16x64xf32>
    %268 = arith.subf %267, %266 : vector<16x64xf32>
    %cst_92 = arith.constant 0.000000e+00 : f32
    %269 = vector.broadcast %cst_92 : f32 to vector<16x64xf32>
    %270 = arith.maximumf %268, %269 : vector<16x64xf32>
    %271 = vector.broadcast %240 : vector<16x1xf32> to vector<16x64xf32>
    %272 = arith.mulf %271, %262 : vector<16x64xf32>
    %273 = arith.mulf %272, %270 : vector<16x64xf32>
    %274 = vector.extract_strided_slice %22 {offsets = [0, 18], sizes = [16, 1], strides = [1, 1]} : vector<16x32xf32> to vector<16x1xf32>
    %275 = vector.extract_strided_slice %22 {offsets = [0, 19], sizes = [16, 1], strides = [1, 1]} : vector<16x32xf32> to vector<16x1xf32>
    %276 = vector.extract_strided_slice %63 {offsets = [0, 1], sizes = [16, 1], strides = [1, 1]} : vector<16x4xf32> to vector<16x1xf32>
    %cst_93 = arith.constant 1.250000e-01 : f32
    %277 = vector.broadcast %cst_93 : f32 to vector<16x1xf32>
    %278 = arith.mulf %274, %277 : vector<16x1xf32>
    %279 = arith.addf %81, %278 : vector<16x1xf32>
    %cst_94 = arith.constant 8.000000e+00 : f32
    %280 = vector.broadcast %cst_94 : f32 to vector<16x1xf32>
    %281 = arith.mulf %279, %280 : vector<16x1xf32>
    %cst_95 = arith.constant 5.000000e-01 : f32
    %282 = vector.broadcast %cst_95 : f32 to vector<16x1xf32>
    %283 = arith.subf %281, %282 : vector<16x1xf32>
    %cst_96 = arith.constant 1.250000e-01 : f32
    %284 = vector.broadcast %cst_96 : f32 to vector<16x1xf32>
    %285 = arith.mulf %275, %284 : vector<16x1xf32>
    %286 = arith.addf %82, %285 : vector<16x1xf32>
    %cst_97 = arith.constant 8.000000e+00 : f32
    %287 = vector.broadcast %cst_97 : f32 to vector<16x1xf32>
    %288 = arith.mulf %286, %287 : vector<16x1xf32>
    %cst_98 = arith.constant 5.000000e-01 : f32
    %289 = vector.broadcast %cst_98 : f32 to vector<16x1xf32>
    %290 = arith.subf %288, %289 : vector<16x1xf32>
    %291 = vector.broadcast %79 : vector<1x64xf32> to vector<16x64xf32>
    %292 = vector.broadcast %283 : vector<16x1xf32> to vector<16x64xf32>
    %293 = arith.subf %291, %292 : vector<16x64xf32>
    %294 = math.absf %293 : vector<16x64xf32>
    %cst_99 = arith.constant 1.000000e+00 : f32
    %295 = vector.broadcast %cst_99 : f32 to vector<16x64xf32>
    %296 = arith.subf %295, %294 : vector<16x64xf32>
    %cst_100 = arith.constant 0.000000e+00 : f32
    %297 = vector.broadcast %cst_100 : f32 to vector<16x64xf32>
    %298 = arith.maximumf %296, %297 : vector<16x64xf32>
    %299 = vector.broadcast %80 : vector<1x64xf32> to vector<16x64xf32>
    %300 = vector.broadcast %290 : vector<16x1xf32> to vector<16x64xf32>
    %301 = arith.subf %299, %300 : vector<16x64xf32>
    %302 = math.absf %301 : vector<16x64xf32>
    %cst_101 = arith.constant 1.000000e+00 : f32
    %303 = vector.broadcast %cst_101 : f32 to vector<16x64xf32>
    %304 = arith.subf %303, %302 : vector<16x64xf32>
    %cst_102 = arith.constant 0.000000e+00 : f32
    %305 = vector.broadcast %cst_102 : f32 to vector<16x64xf32>
    %306 = arith.maximumf %304, %305 : vector<16x64xf32>
    %307 = vector.broadcast %276 : vector<16x1xf32> to vector<16x64xf32>
    %308 = arith.mulf %307, %298 : vector<16x64xf32>
    %309 = arith.mulf %308, %306 : vector<16x64xf32>
    %310 = arith.addf %273, %309 : vector<16x64xf32>
    %311 = arith.truncf %310 : vector<16x64xf32> to vector<16x64xbf16>
    %312 = vector.extract_strided_slice %83 {offsets = [0, 16], sizes = [64, 8], strides = [1, 1]} : vector<64x32xbf16> to vector<64x8xbf16>
    %cst_103 = arith.constant dense<0.000000e+00> : vector<16x8xf32>
    %313 = tpu.matmul %311, %312, %cst_103 {dimension_numbers = #tpu.dot_dimension_numbers<[1], [0], [0], [1], [0, 0, 1, 1], [], []>} : vector<16x64xbf16>, vector<64x8xbf16>, vector<16x8xf32> -> vector<16x8xf32>
    %314 = arith.addf %77, %313 : vector<16x8xf32>
    %315 = vector.extract_strided_slice %22 {offsets = [0, 24], sizes = [16, 1], strides = [1, 1]} : vector<16x32xf32> to vector<16x1xf32>
    %316 = vector.extract_strided_slice %22 {offsets = [0, 25], sizes = [16, 1], strides = [1, 1]} : vector<16x32xf32> to vector<16x1xf32>
    %317 = vector.extract_strided_slice %74 {offsets = [0, 0], sizes = [16, 1], strides = [1, 1]} : vector<16x4xf32> to vector<16x1xf32>
    %cst_104 = arith.constant 1.250000e-01 : f32
    %318 = vector.broadcast %cst_104 : f32 to vector<16x1xf32>
    %319 = arith.mulf %315, %318 : vector<16x1xf32>
    %320 = arith.addf %81, %319 : vector<16x1xf32>
    %cst_105 = arith.constant 8.000000e+00 : f32
    %321 = vector.broadcast %cst_105 : f32 to vector<16x1xf32>
    %322 = arith.mulf %320, %321 : vector<16x1xf32>
    %cst_106 = arith.constant 5.000000e-01 : f32
    %323 = vector.broadcast %cst_106 : f32 to vector<16x1xf32>
    %324 = arith.subf %322, %323 : vector<16x1xf32>
    %cst_107 = arith.constant 1.250000e-01 : f32
    %325 = vector.broadcast %cst_107 : f32 to vector<16x1xf32>
    %326 = arith.mulf %316, %325 : vector<16x1xf32>
    %327 = arith.addf %82, %326 : vector<16x1xf32>
    %cst_108 = arith.constant 8.000000e+00 : f32
    %328 = vector.broadcast %cst_108 : f32 to vector<16x1xf32>
    %329 = arith.mulf %327, %328 : vector<16x1xf32>
    %cst_109 = arith.constant 5.000000e-01 : f32
    %330 = vector.broadcast %cst_109 : f32 to vector<16x1xf32>
    %331 = arith.subf %329, %330 : vector<16x1xf32>
    %332 = vector.broadcast %79 : vector<1x64xf32> to vector<16x64xf32>
    %333 = vector.broadcast %324 : vector<16x1xf32> to vector<16x64xf32>
    %334 = arith.subf %332, %333 : vector<16x64xf32>
    %335 = math.absf %334 : vector<16x64xf32>
    %cst_110 = arith.constant 1.000000e+00 : f32
    %336 = vector.broadcast %cst_110 : f32 to vector<16x64xf32>
    %337 = arith.subf %336, %335 : vector<16x64xf32>
    %cst_111 = arith.constant 0.000000e+00 : f32
    %338 = vector.broadcast %cst_111 : f32 to vector<16x64xf32>
    %339 = arith.maximumf %337, %338 : vector<16x64xf32>
    %340 = vector.broadcast %80 : vector<1x64xf32> to vector<16x64xf32>
    %341 = vector.broadcast %331 : vector<16x1xf32> to vector<16x64xf32>
    %342 = arith.subf %340, %341 : vector<16x64xf32>
    %343 = math.absf %342 : vector<16x64xf32>
    %cst_112 = arith.constant 1.000000e+00 : f32
    %344 = vector.broadcast %cst_112 : f32 to vector<16x64xf32>
    %345 = arith.subf %344, %343 : vector<16x64xf32>
    %cst_113 = arith.constant 0.000000e+00 : f32
    %346 = vector.broadcast %cst_113 : f32 to vector<16x64xf32>
    %347 = arith.maximumf %345, %346 : vector<16x64xf32>
    %348 = vector.broadcast %317 : vector<16x1xf32> to vector<16x64xf32>
    %349 = arith.mulf %348, %339 : vector<16x64xf32>
    %350 = arith.mulf %349, %347 : vector<16x64xf32>
    %351 = vector.extract_strided_slice %22 {offsets = [0, 26], sizes = [16, 1], strides = [1, 1]} : vector<16x32xf32> to vector<16x1xf32>
    %352 = vector.extract_strided_slice %22 {offsets = [0, 27], sizes = [16, 1], strides = [1, 1]} : vector<16x32xf32> to vector<16x1xf32>
    %353 = vector.extract_strided_slice %74 {offsets = [0, 1], sizes = [16, 1], strides = [1, 1]} : vector<16x4xf32> to vector<16x1xf32>
    %cst_114 = arith.constant 1.250000e-01 : f32
    %354 = vector.broadcast %cst_114 : f32 to vector<16x1xf32>
    %355 = arith.mulf %351, %354 : vector<16x1xf32>
    %356 = arith.addf %81, %355 : vector<16x1xf32>
    %cst_115 = arith.constant 8.000000e+00 : f32
    %357 = vector.broadcast %cst_115 : f32 to vector<16x1xf32>
    %358 = arith.mulf %356, %357 : vector<16x1xf32>
    %cst_116 = arith.constant 5.000000e-01 : f32
    %359 = vector.broadcast %cst_116 : f32 to vector<16x1xf32>
    %360 = arith.subf %358, %359 : vector<16x1xf32>
    %cst_117 = arith.constant 1.250000e-01 : f32
    %361 = vector.broadcast %cst_117 : f32 to vector<16x1xf32>
    %362 = arith.mulf %352, %361 : vector<16x1xf32>
    %363 = arith.addf %82, %362 : vector<16x1xf32>
    %cst_118 = arith.constant 8.000000e+00 : f32
    %364 = vector.broadcast %cst_118 : f32 to vector<16x1xf32>
    %365 = arith.mulf %363, %364 : vector<16x1xf32>
    %cst_119 = arith.constant 5.000000e-01 : f32
    %366 = vector.broadcast %cst_119 : f32 to vector<16x1xf32>
    %367 = arith.subf %365, %366 : vector<16x1xf32>
    %368 = vector.broadcast %79 : vector<1x64xf32> to vector<16x64xf32>
    %369 = vector.broadcast %360 : vector<16x1xf32> to vector<16x64xf32>
    %370 = arith.subf %368, %369 : vector<16x64xf32>
    %371 = math.absf %370 : vector<16x64xf32>
    %cst_120 = arith.constant 1.000000e+00 : f32
    %372 = vector.broadcast %cst_120 : f32 to vector<16x64xf32>
    %373 = arith.subf %372, %371 : vector<16x64xf32>
    %cst_121 = arith.constant 0.000000e+00 : f32
    %374 = vector.broadcast %cst_121 : f32 to vector<16x64xf32>
    %375 = arith.maximumf %373, %374 : vector<16x64xf32>
    %376 = vector.broadcast %80 : vector<1x64xf32> to vector<16x64xf32>
    %377 = vector.broadcast %367 : vector<16x1xf32> to vector<16x64xf32>
    %378 = arith.subf %376, %377 : vector<16x64xf32>
    %379 = math.absf %378 : vector<16x64xf32>
    %cst_122 = arith.constant 1.000000e+00 : f32
    %380 = vector.broadcast %cst_122 : f32 to vector<16x64xf32>
    %381 = arith.subf %380, %379 : vector<16x64xf32>
    %cst_123 = arith.constant 0.000000e+00 : f32
    %382 = vector.broadcast %cst_123 : f32 to vector<16x64xf32>
    %383 = arith.maximumf %381, %382 : vector<16x64xf32>
    %384 = vector.broadcast %353 : vector<16x1xf32> to vector<16x64xf32>
    %385 = arith.mulf %384, %375 : vector<16x64xf32>
    %386 = arith.mulf %385, %383 : vector<16x64xf32>
    %387 = arith.addf %350, %386 : vector<16x64xf32>
    %388 = arith.truncf %387 : vector<16x64xf32> to vector<16x64xbf16>
    %389 = vector.extract_strided_slice %83 {offsets = [0, 24], sizes = [64, 8], strides = [1, 1]} : vector<64x32xbf16> to vector<64x8xbf16>
    %cst_124 = arith.constant dense<0.000000e+00> : vector<16x8xf32>
    %390 = tpu.matmul %388, %389, %cst_124 {dimension_numbers = #tpu.dot_dimension_numbers<[1], [0], [0], [1], [0, 0, 1, 1], [], []>} : vector<16x64xbf16>, vector<64x8xbf16>, vector<16x8xf32> -> vector<16x8xf32>
    %391 = arith.addf %78, %390 : vector<16x8xf32>
    %c0_125 = arith.constant 0 : index
    %c0_126 = arith.constant 0 : index
    %392 = vector.load %arg8[%c0_125, %c0_126] : memref<1x16xf32, #tpu.memory_space<vmem>>, vector<1x16xf32>
    %c0_127 = arith.constant 0 : index
    %c0_128 = arith.constant 0 : index
    %393 = vector.load %arg9[%c0_127, %c0_128] : memref<1x16xf32, #tpu.memory_space<vmem>>, vector<1x16xf32>
    %394 = vector.extract_strided_slice %6 {offsets = [0, 2], sizes = [16, 1], strides = [1, 1]} : vector<16x4xf32> to vector<16x1xf32>
    %395 = vector.extract_strided_slice %6 {offsets = [0, 3], sizes = [16, 1], strides = [1, 1]} : vector<16x4xf32> to vector<16x1xf32>
    %396 = vector.extract_strided_slice %30 {offsets = [64, 0], sizes = [16, 32], strides = [1, 1]} : vector<80x32xbf16> to vector<16x32xbf16>
    %397 = vector.extract_strided_slice %22 {offsets = [0, 4], sizes = [16, 1], strides = [1, 1]} : vector<16x32xf32> to vector<16x1xf32>
    %398 = vector.extract_strided_slice %22 {offsets = [0, 5], sizes = [16, 1], strides = [1, 1]} : vector<16x32xf32> to vector<16x1xf32>
    %399 = vector.extract_strided_slice %41 {offsets = [0, 2], sizes = [16, 1], strides = [1, 1]} : vector<16x4xf32> to vector<16x1xf32>
    %cst_129 = arith.constant 2.500000e-01 : f32
    %400 = vector.broadcast %cst_129 : f32 to vector<16x1xf32>
    %401 = arith.mulf %397, %400 : vector<16x1xf32>
    %402 = arith.addf %394, %401 : vector<16x1xf32>
    %cst_130 = arith.constant 4.000000e+00 : f32
    %403 = vector.broadcast %cst_130 : f32 to vector<16x1xf32>
    %404 = arith.mulf %402, %403 : vector<16x1xf32>
    %cst_131 = arith.constant 5.000000e-01 : f32
    %405 = vector.broadcast %cst_131 : f32 to vector<16x1xf32>
    %406 = arith.subf %404, %405 : vector<16x1xf32>
    %cst_132 = arith.constant 2.500000e-01 : f32
    %407 = vector.broadcast %cst_132 : f32 to vector<16x1xf32>
    %408 = arith.mulf %398, %407 : vector<16x1xf32>
    %409 = arith.addf %395, %408 : vector<16x1xf32>
    %cst_133 = arith.constant 4.000000e+00 : f32
    %410 = vector.broadcast %cst_133 : f32 to vector<16x1xf32>
    %411 = arith.mulf %409, %410 : vector<16x1xf32>
    %cst_134 = arith.constant 5.000000e-01 : f32
    %412 = vector.broadcast %cst_134 : f32 to vector<16x1xf32>
    %413 = arith.subf %411, %412 : vector<16x1xf32>
    %414 = vector.broadcast %392 : vector<1x16xf32> to vector<16x16xf32>
    %415 = vector.broadcast %406 : vector<16x1xf32> to vector<16x16xf32>
    %416 = arith.subf %414, %415 : vector<16x16xf32>
    %417 = math.absf %416 : vector<16x16xf32>
    %cst_135 = arith.constant 1.000000e+00 : f32
    %418 = vector.broadcast %cst_135 : f32 to vector<16x16xf32>
    %419 = arith.subf %418, %417 : vector<16x16xf32>
    %cst_136 = arith.constant 0.000000e+00 : f32
    %420 = vector.broadcast %cst_136 : f32 to vector<16x16xf32>
    %421 = arith.maximumf %419, %420 : vector<16x16xf32>
    %422 = vector.broadcast %393 : vector<1x16xf32> to vector<16x16xf32>
    %423 = vector.broadcast %413 : vector<16x1xf32> to vector<16x16xf32>
    %424 = arith.subf %422, %423 : vector<16x16xf32>
    %425 = math.absf %424 : vector<16x16xf32>
    %cst_137 = arith.constant 1.000000e+00 : f32
    %426 = vector.broadcast %cst_137 : f32 to vector<16x16xf32>
    %427 = arith.subf %426, %425 : vector<16x16xf32>
    %cst_138 = arith.constant 0.000000e+00 : f32
    %428 = vector.broadcast %cst_138 : f32 to vector<16x16xf32>
    %429 = arith.maximumf %427, %428 : vector<16x16xf32>
    %430 = vector.broadcast %399 : vector<16x1xf32> to vector<16x16xf32>
    %431 = arith.mulf %430, %421 : vector<16x16xf32>
    %432 = arith.mulf %431, %429 : vector<16x16xf32>
    %433 = vector.extract_strided_slice %22 {offsets = [0, 6], sizes = [16, 1], strides = [1, 1]} : vector<16x32xf32> to vector<16x1xf32>
    %434 = vector.extract_strided_slice %22 {offsets = [0, 7], sizes = [16, 1], strides = [1, 1]} : vector<16x32xf32> to vector<16x1xf32>
    %435 = vector.extract_strided_slice %41 {offsets = [0, 3], sizes = [16, 1], strides = [1, 1]} : vector<16x4xf32> to vector<16x1xf32>
    %cst_139 = arith.constant 2.500000e-01 : f32
    %436 = vector.broadcast %cst_139 : f32 to vector<16x1xf32>
    %437 = arith.mulf %433, %436 : vector<16x1xf32>
    %438 = arith.addf %394, %437 : vector<16x1xf32>
    %cst_140 = arith.constant 4.000000e+00 : f32
    %439 = vector.broadcast %cst_140 : f32 to vector<16x1xf32>
    %440 = arith.mulf %438, %439 : vector<16x1xf32>
    %cst_141 = arith.constant 5.000000e-01 : f32
    %441 = vector.broadcast %cst_141 : f32 to vector<16x1xf32>
    %442 = arith.subf %440, %441 : vector<16x1xf32>
    %cst_142 = arith.constant 2.500000e-01 : f32
    %443 = vector.broadcast %cst_142 : f32 to vector<16x1xf32>
    %444 = arith.mulf %434, %443 : vector<16x1xf32>
    %445 = arith.addf %395, %444 : vector<16x1xf32>
    %cst_143 = arith.constant 4.000000e+00 : f32
    %446 = vector.broadcast %cst_143 : f32 to vector<16x1xf32>
    %447 = arith.mulf %445, %446 : vector<16x1xf32>
    %cst_144 = arith.constant 5.000000e-01 : f32
    %448 = vector.broadcast %cst_144 : f32 to vector<16x1xf32>
    %449 = arith.subf %447, %448 : vector<16x1xf32>
    %450 = vector.broadcast %392 : vector<1x16xf32> to vector<16x16xf32>
    %451 = vector.broadcast %442 : vector<16x1xf32> to vector<16x16xf32>
    %452 = arith.subf %450, %451 : vector<16x16xf32>
    %453 = math.absf %452 : vector<16x16xf32>
    %cst_145 = arith.constant 1.000000e+00 : f32
    %454 = vector.broadcast %cst_145 : f32 to vector<16x16xf32>
    %455 = arith.subf %454, %453 : vector<16x16xf32>
    %cst_146 = arith.constant 0.000000e+00 : f32
    %456 = vector.broadcast %cst_146 : f32 to vector<16x16xf32>
    %457 = arith.maximumf %455, %456 : vector<16x16xf32>
    %458 = vector.broadcast %393 : vector<1x16xf32> to vector<16x16xf32>
    %459 = vector.broadcast %449 : vector<16x1xf32> to vector<16x16xf32>
    %460 = arith.subf %458, %459 : vector<16x16xf32>
    %461 = math.absf %460 : vector<16x16xf32>
    %cst_147 = arith.constant 1.000000e+00 : f32
    %462 = vector.broadcast %cst_147 : f32 to vector<16x16xf32>
    %463 = arith.subf %462, %461 : vector<16x16xf32>
    %cst_148 = arith.constant 0.000000e+00 : f32
    %464 = vector.broadcast %cst_148 : f32 to vector<16x16xf32>
    %465 = arith.maximumf %463, %464 : vector<16x16xf32>
    %466 = vector.broadcast %435 : vector<16x1xf32> to vector<16x16xf32>
    %467 = arith.mulf %466, %457 : vector<16x16xf32>
    %468 = arith.mulf %467, %465 : vector<16x16xf32>
    %469 = arith.addf %432, %468 : vector<16x16xf32>
    %470 = arith.truncf %469 : vector<16x16xf32> to vector<16x16xbf16>
    %471 = vector.extract_strided_slice %396 {offsets = [0, 0], sizes = [16, 8], strides = [1, 1]} : vector<16x32xbf16> to vector<16x8xbf16>
    %cst_149 = arith.constant dense<0.000000e+00> : vector<16x8xf32>
    %472 = tpu.matmul %470, %471, %cst_149 {dimension_numbers = #tpu.dot_dimension_numbers<[1], [0], [0], [1], [0, 0, 1, 1], [], []>} : vector<16x16xbf16>, vector<16x8xbf16>, vector<16x8xf32> -> vector<16x8xf32>
    %473 = arith.addf %160, %472 : vector<16x8xf32>
    %474 = vector.extract_strided_slice %22 {offsets = [0, 12], sizes = [16, 1], strides = [1, 1]} : vector<16x32xf32> to vector<16x1xf32>
    %475 = vector.extract_strided_slice %22 {offsets = [0, 13], sizes = [16, 1], strides = [1, 1]} : vector<16x32xf32> to vector<16x1xf32>
    %476 = vector.extract_strided_slice %52 {offsets = [0, 2], sizes = [16, 1], strides = [1, 1]} : vector<16x4xf32> to vector<16x1xf32>
    %cst_150 = arith.constant 2.500000e-01 : f32
    %477 = vector.broadcast %cst_150 : f32 to vector<16x1xf32>
    %478 = arith.mulf %474, %477 : vector<16x1xf32>
    %479 = arith.addf %394, %478 : vector<16x1xf32>
    %cst_151 = arith.constant 4.000000e+00 : f32
    %480 = vector.broadcast %cst_151 : f32 to vector<16x1xf32>
    %481 = arith.mulf %479, %480 : vector<16x1xf32>
    %cst_152 = arith.constant 5.000000e-01 : f32
    %482 = vector.broadcast %cst_152 : f32 to vector<16x1xf32>
    %483 = arith.subf %481, %482 : vector<16x1xf32>
    %cst_153 = arith.constant 2.500000e-01 : f32
    %484 = vector.broadcast %cst_153 : f32 to vector<16x1xf32>
    %485 = arith.mulf %475, %484 : vector<16x1xf32>
    %486 = arith.addf %395, %485 : vector<16x1xf32>
    %cst_154 = arith.constant 4.000000e+00 : f32
    %487 = vector.broadcast %cst_154 : f32 to vector<16x1xf32>
    %488 = arith.mulf %486, %487 : vector<16x1xf32>
    %cst_155 = arith.constant 5.000000e-01 : f32
    %489 = vector.broadcast %cst_155 : f32 to vector<16x1xf32>
    %490 = arith.subf %488, %489 : vector<16x1xf32>
    %491 = vector.broadcast %392 : vector<1x16xf32> to vector<16x16xf32>
    %492 = vector.broadcast %483 : vector<16x1xf32> to vector<16x16xf32>
    %493 = arith.subf %491, %492 : vector<16x16xf32>
    %494 = math.absf %493 : vector<16x16xf32>
    %cst_156 = arith.constant 1.000000e+00 : f32
    %495 = vector.broadcast %cst_156 : f32 to vector<16x16xf32>
    %496 = arith.subf %495, %494 : vector<16x16xf32>
    %cst_157 = arith.constant 0.000000e+00 : f32
    %497 = vector.broadcast %cst_157 : f32 to vector<16x16xf32>
    %498 = arith.maximumf %496, %497 : vector<16x16xf32>
    %499 = vector.broadcast %393 : vector<1x16xf32> to vector<16x16xf32>
    %500 = vector.broadcast %490 : vector<16x1xf32> to vector<16x16xf32>
    %501 = arith.subf %499, %500 : vector<16x16xf32>
    %502 = math.absf %501 : vector<16x16xf32>
    %cst_158 = arith.constant 1.000000e+00 : f32
    %503 = vector.broadcast %cst_158 : f32 to vector<16x16xf32>
    %504 = arith.subf %503, %502 : vector<16x16xf32>
    %cst_159 = arith.constant 0.000000e+00 : f32
    %505 = vector.broadcast %cst_159 : f32 to vector<16x16xf32>
    %506 = arith.maximumf %504, %505 : vector<16x16xf32>
    %507 = vector.broadcast %476 : vector<16x1xf32> to vector<16x16xf32>
    %508 = arith.mulf %507, %498 : vector<16x16xf32>
    %509 = arith.mulf %508, %506 : vector<16x16xf32>
    %510 = vector.extract_strided_slice %22 {offsets = [0, 14], sizes = [16, 1], strides = [1, 1]} : vector<16x32xf32> to vector<16x1xf32>
    %511 = vector.extract_strided_slice %22 {offsets = [0, 15], sizes = [16, 1], strides = [1, 1]} : vector<16x32xf32> to vector<16x1xf32>
    %512 = vector.extract_strided_slice %52 {offsets = [0, 3], sizes = [16, 1], strides = [1, 1]} : vector<16x4xf32> to vector<16x1xf32>
    %cst_160 = arith.constant 2.500000e-01 : f32
    %513 = vector.broadcast %cst_160 : f32 to vector<16x1xf32>
    %514 = arith.mulf %510, %513 : vector<16x1xf32>
    %515 = arith.addf %394, %514 : vector<16x1xf32>
    %cst_161 = arith.constant 4.000000e+00 : f32
    %516 = vector.broadcast %cst_161 : f32 to vector<16x1xf32>
    %517 = arith.mulf %515, %516 : vector<16x1xf32>
    %cst_162 = arith.constant 5.000000e-01 : f32
    %518 = vector.broadcast %cst_162 : f32 to vector<16x1xf32>
    %519 = arith.subf %517, %518 : vector<16x1xf32>
    %cst_163 = arith.constant 2.500000e-01 : f32
    %520 = vector.broadcast %cst_163 : f32 to vector<16x1xf32>
    %521 = arith.mulf %511, %520 : vector<16x1xf32>
    %522 = arith.addf %395, %521 : vector<16x1xf32>
    %cst_164 = arith.constant 4.000000e+00 : f32
    %523 = vector.broadcast %cst_164 : f32 to vector<16x1xf32>
    %524 = arith.mulf %522, %523 : vector<16x1xf32>
    %cst_165 = arith.constant 5.000000e-01 : f32
    %525 = vector.broadcast %cst_165 : f32 to vector<16x1xf32>
    %526 = arith.subf %524, %525 : vector<16x1xf32>
    %527 = vector.broadcast %392 : vector<1x16xf32> to vector<16x16xf32>
    %528 = vector.broadcast %519 : vector<16x1xf32> to vector<16x16xf32>
    %529 = arith.subf %527, %528 : vector<16x16xf32>
    %530 = math.absf %529 : vector<16x16xf32>
    %cst_166 = arith.constant 1.000000e+00 : f32
    %531 = vector.broadcast %cst_166 : f32 to vector<16x16xf32>
    %532 = arith.subf %531, %530 : vector<16x16xf32>
    %cst_167 = arith.constant 0.000000e+00 : f32
    %533 = vector.broadcast %cst_167 : f32 to vector<16x16xf32>
    %534 = arith.maximumf %532, %533 : vector<16x16xf32>
    %535 = vector.broadcast %393 : vector<1x16xf32> to vector<16x16xf32>
    %536 = vector.broadcast %526 : vector<16x1xf32> to vector<16x16xf32>
    %537 = arith.subf %535, %536 : vector<16x16xf32>
    %538 = math.absf %537 : vector<16x16xf32>
    %cst_168 = arith.constant 1.000000e+00 : f32
    %539 = vector.broadcast %cst_168 : f32 to vector<16x16xf32>
    %540 = arith.subf %539, %538 : vector<16x16xf32>
    %cst_169 = arith.constant 0.000000e+00 : f32
    %541 = vector.broadcast %cst_169 : f32 to vector<16x16xf32>
    %542 = arith.maximumf %540, %541 : vector<16x16xf32>
    %543 = vector.broadcast %512 : vector<16x1xf32> to vector<16x16xf32>
    %544 = arith.mulf %543, %534 : vector<16x16xf32>
    %545 = arith.mulf %544, %542 : vector<16x16xf32>
    %546 = arith.addf %509, %545 : vector<16x16xf32>
    %547 = arith.truncf %546 : vector<16x16xf32> to vector<16x16xbf16>
    %548 = vector.extract_strided_slice %396 {offsets = [0, 8], sizes = [16, 8], strides = [1, 1]} : vector<16x32xbf16> to vector<16x8xbf16>
    %cst_170 = arith.constant dense<0.000000e+00> : vector<16x8xf32>
    %549 = tpu.matmul %547, %548, %cst_170 {dimension_numbers = #tpu.dot_dimension_numbers<[1], [0], [0], [1], [0, 0, 1, 1], [], []>} : vector<16x16xbf16>, vector<16x8xbf16>, vector<16x8xf32> -> vector<16x8xf32>
    %550 = arith.addf %237, %549 : vector<16x8xf32>
    %551 = vector.extract_strided_slice %22 {offsets = [0, 20], sizes = [16, 1], strides = [1, 1]} : vector<16x32xf32> to vector<16x1xf32>
    %552 = vector.extract_strided_slice %22 {offsets = [0, 21], sizes = [16, 1], strides = [1, 1]} : vector<16x32xf32> to vector<16x1xf32>
    %553 = vector.extract_strided_slice %63 {offsets = [0, 2], sizes = [16, 1], strides = [1, 1]} : vector<16x4xf32> to vector<16x1xf32>
    %cst_171 = arith.constant 2.500000e-01 : f32
    %554 = vector.broadcast %cst_171 : f32 to vector<16x1xf32>
    %555 = arith.mulf %551, %554 : vector<16x1xf32>
    %556 = arith.addf %394, %555 : vector<16x1xf32>
    %cst_172 = arith.constant 4.000000e+00 : f32
    %557 = vector.broadcast %cst_172 : f32 to vector<16x1xf32>
    %558 = arith.mulf %556, %557 : vector<16x1xf32>
    %cst_173 = arith.constant 5.000000e-01 : f32
    %559 = vector.broadcast %cst_173 : f32 to vector<16x1xf32>
    %560 = arith.subf %558, %559 : vector<16x1xf32>
    %cst_174 = arith.constant 2.500000e-01 : f32
    %561 = vector.broadcast %cst_174 : f32 to vector<16x1xf32>
    %562 = arith.mulf %552, %561 : vector<16x1xf32>
    %563 = arith.addf %395, %562 : vector<16x1xf32>
    %cst_175 = arith.constant 4.000000e+00 : f32
    %564 = vector.broadcast %cst_175 : f32 to vector<16x1xf32>
    %565 = arith.mulf %563, %564 : vector<16x1xf32>
    %cst_176 = arith.constant 5.000000e-01 : f32
    %566 = vector.broadcast %cst_176 : f32 to vector<16x1xf32>
    %567 = arith.subf %565, %566 : vector<16x1xf32>
    %568 = vector.broadcast %392 : vector<1x16xf32> to vector<16x16xf32>
    %569 = vector.broadcast %560 : vector<16x1xf32> to vector<16x16xf32>
    %570 = arith.subf %568, %569 : vector<16x16xf32>
    %571 = math.absf %570 : vector<16x16xf32>
    %cst_177 = arith.constant 1.000000e+00 : f32
    %572 = vector.broadcast %cst_177 : f32 to vector<16x16xf32>
    %573 = arith.subf %572, %571 : vector<16x16xf32>
    %cst_178 = arith.constant 0.000000e+00 : f32
    %574 = vector.broadcast %cst_178 : f32 to vector<16x16xf32>
    %575 = arith.maximumf %573, %574 : vector<16x16xf32>
    %576 = vector.broadcast %393 : vector<1x16xf32> to vector<16x16xf32>
    %577 = vector.broadcast %567 : vector<16x1xf32> to vector<16x16xf32>
    %578 = arith.subf %576, %577 : vector<16x16xf32>
    %579 = math.absf %578 : vector<16x16xf32>
    %cst_179 = arith.constant 1.000000e+00 : f32
    %580 = vector.broadcast %cst_179 : f32 to vector<16x16xf32>
    %581 = arith.subf %580, %579 : vector<16x16xf32>
    %cst_180 = arith.constant 0.000000e+00 : f32
    %582 = vector.broadcast %cst_180 : f32 to vector<16x16xf32>
    %583 = arith.maximumf %581, %582 : vector<16x16xf32>
    %584 = vector.broadcast %553 : vector<16x1xf32> to vector<16x16xf32>
    %585 = arith.mulf %584, %575 : vector<16x16xf32>
    %586 = arith.mulf %585, %583 : vector<16x16xf32>
    %587 = vector.extract_strided_slice %22 {offsets = [0, 22], sizes = [16, 1], strides = [1, 1]} : vector<16x32xf32> to vector<16x1xf32>
    %588 = vector.extract_strided_slice %22 {offsets = [0, 23], sizes = [16, 1], strides = [1, 1]} : vector<16x32xf32> to vector<16x1xf32>
    %589 = vector.extract_strided_slice %63 {offsets = [0, 3], sizes = [16, 1], strides = [1, 1]} : vector<16x4xf32> to vector<16x1xf32>
    %cst_181 = arith.constant 2.500000e-01 : f32
    %590 = vector.broadcast %cst_181 : f32 to vector<16x1xf32>
    %591 = arith.mulf %587, %590 : vector<16x1xf32>
    %592 = arith.addf %394, %591 : vector<16x1xf32>
    %cst_182 = arith.constant 4.000000e+00 : f32
    %593 = vector.broadcast %cst_182 : f32 to vector<16x1xf32>
    %594 = arith.mulf %592, %593 : vector<16x1xf32>
    %cst_183 = arith.constant 5.000000e-01 : f32
    %595 = vector.broadcast %cst_183 : f32 to vector<16x1xf32>
    %596 = arith.subf %594, %595 : vector<16x1xf32>
    %cst_184 = arith.constant 2.500000e-01 : f32
    %597 = vector.broadcast %cst_184 : f32 to vector<16x1xf32>
    %598 = arith.mulf %588, %597 : vector<16x1xf32>
    %599 = arith.addf %395, %598 : vector<16x1xf32>
    %cst_185 = arith.constant 4.000000e+00 : f32
    %600 = vector.broadcast %cst_185 : f32 to vector<16x1xf32>
    %601 = arith.mulf %599, %600 : vector<16x1xf32>
    %cst_186 = arith.constant 5.000000e-01 : f32
    %602 = vector.broadcast %cst_186 : f32 to vector<16x1xf32>
    %603 = arith.subf %601, %602 : vector<16x1xf32>
    %604 = vector.broadcast %392 : vector<1x16xf32> to vector<16x16xf32>
    %605 = vector.broadcast %596 : vector<16x1xf32> to vector<16x16xf32>
    %606 = arith.subf %604, %605 : vector<16x16xf32>
    %607 = math.absf %606 : vector<16x16xf32>
    %cst_187 = arith.constant 1.000000e+00 : f32
    %608 = vector.broadcast %cst_187 : f32 to vector<16x16xf32>
    %609 = arith.subf %608, %607 : vector<16x16xf32>
    %cst_188 = arith.constant 0.000000e+00 : f32
    %610 = vector.broadcast %cst_188 : f32 to vector<16x16xf32>
    %611 = arith.maximumf %609, %610 : vector<16x16xf32>
    %612 = vector.broadcast %393 : vector<1x16xf32> to vector<16x16xf32>
    %613 = vector.broadcast %603 : vector<16x1xf32> to vector<16x16xf32>
    %614 = arith.subf %612, %613 : vector<16x16xf32>
    %615 = math.absf %614 : vector<16x16xf32>
    %cst_189 = arith.constant 1.000000e+00 : f32
    %616 = vector.broadcast %cst_189 : f32 to vector<16x16xf32>
    %617 = arith.subf %616, %615 : vector<16x16xf32>
    %cst_190 = arith.constant 0.000000e+00 : f32
    %618 = vector.broadcast %cst_190 : f32 to vector<16x16xf32>
    %619 = arith.maximumf %617, %618 : vector<16x16xf32>
    %620 = vector.broadcast %589 : vector<16x1xf32> to vector<16x16xf32>
    %621 = arith.mulf %620, %611 : vector<16x16xf32>
    %622 = arith.mulf %621, %619 : vector<16x16xf32>
    %623 = arith.addf %586, %622 : vector<16x16xf32>
    %624 = arith.truncf %623 : vector<16x16xf32> to vector<16x16xbf16>
    %625 = vector.extract_strided_slice %396 {offsets = [0, 16], sizes = [16, 8], strides = [1, 1]} : vector<16x32xbf16> to vector<16x8xbf16>
    %cst_191 = arith.constant dense<0.000000e+00> : vector<16x8xf32>
    %626 = tpu.matmul %624, %625, %cst_191 {dimension_numbers = #tpu.dot_dimension_numbers<[1], [0], [0], [1], [0, 0, 1, 1], [], []>} : vector<16x16xbf16>, vector<16x8xbf16>, vector<16x8xf32> -> vector<16x8xf32>
    %627 = arith.addf %314, %626 : vector<16x8xf32>
    %628 = vector.extract_strided_slice %22 {offsets = [0, 28], sizes = [16, 1], strides = [1, 1]} : vector<16x32xf32> to vector<16x1xf32>
    %629 = vector.extract_strided_slice %22 {offsets = [0, 29], sizes = [16, 1], strides = [1, 1]} : vector<16x32xf32> to vector<16x1xf32>
    %630 = vector.extract_strided_slice %74 {offsets = [0, 2], sizes = [16, 1], strides = [1, 1]} : vector<16x4xf32> to vector<16x1xf32>
    %cst_192 = arith.constant 2.500000e-01 : f32
    %631 = vector.broadcast %cst_192 : f32 to vector<16x1xf32>
    %632 = arith.mulf %628, %631 : vector<16x1xf32>
    %633 = arith.addf %394, %632 : vector<16x1xf32>
    %cst_193 = arith.constant 4.000000e+00 : f32
    %634 = vector.broadcast %cst_193 : f32 to vector<16x1xf32>
    %635 = arith.mulf %633, %634 : vector<16x1xf32>
    %cst_194 = arith.constant 5.000000e-01 : f32
    %636 = vector.broadcast %cst_194 : f32 to vector<16x1xf32>
    %637 = arith.subf %635, %636 : vector<16x1xf32>
    %cst_195 = arith.constant 2.500000e-01 : f32
    %638 = vector.broadcast %cst_195 : f32 to vector<16x1xf32>
    %639 = arith.mulf %629, %638 : vector<16x1xf32>
    %640 = arith.addf %395, %639 : vector<16x1xf32>
    %cst_196 = arith.constant 4.000000e+00 : f32
    %641 = vector.broadcast %cst_196 : f32 to vector<16x1xf32>
    %642 = arith.mulf %640, %641 : vector<16x1xf32>
    %cst_197 = arith.constant 5.000000e-01 : f32
    %643 = vector.broadcast %cst_197 : f32 to vector<16x1xf32>
    %644 = arith.subf %642, %643 : vector<16x1xf32>
    %645 = vector.broadcast %392 : vector<1x16xf32> to vector<16x16xf32>
    %646 = vector.broadcast %637 : vector<16x1xf32> to vector<16x16xf32>
    %647 = arith.subf %645, %646 : vector<16x16xf32>
    %648 = math.absf %647 : vector<16x16xf32>
    %cst_198 = arith.constant 1.000000e+00 : f32
    %649 = vector.broadcast %cst_198 : f32 to vector<16x16xf32>
    %650 = arith.subf %649, %648 : vector<16x16xf32>
    %cst_199 = arith.constant 0.000000e+00 : f32
    %651 = vector.broadcast %cst_199 : f32 to vector<16x16xf32>
    %652 = arith.maximumf %650, %651 : vector<16x16xf32>
    %653 = vector.broadcast %393 : vector<1x16xf32> to vector<16x16xf32>
    %654 = vector.broadcast %644 : vector<16x1xf32> to vector<16x16xf32>
    %655 = arith.subf %653, %654 : vector<16x16xf32>
    %656 = math.absf %655 : vector<16x16xf32>
    %cst_200 = arith.constant 1.000000e+00 : f32
    %657 = vector.broadcast %cst_200 : f32 to vector<16x16xf32>
    %658 = arith.subf %657, %656 : vector<16x16xf32>
    %cst_201 = arith.constant 0.000000e+00 : f32
    %659 = vector.broadcast %cst_201 : f32 to vector<16x16xf32>
    %660 = arith.maximumf %658, %659 : vector<16x16xf32>
    %661 = vector.broadcast %630 : vector<16x1xf32> to vector<16x16xf32>
    %662 = arith.mulf %661, %652 : vector<16x16xf32>
    %663 = arith.mulf %662, %660 : vector<16x16xf32>
    %664 = vector.extract_strided_slice %22 {offsets = [0, 30], sizes = [16, 1], strides = [1, 1]} : vector<16x32xf32> to vector<16x1xf32>
    %665 = vector.extract_strided_slice %22 {offsets = [0, 31], sizes = [16, 1], strides = [1, 1]} : vector<16x32xf32> to vector<16x1xf32>
    %666 = vector.extract_strided_slice %74 {offsets = [0, 3], sizes = [16, 1], strides = [1, 1]} : vector<16x4xf32> to vector<16x1xf32>
    %cst_202 = arith.constant 2.500000e-01 : f32
    %667 = vector.broadcast %cst_202 : f32 to vector<16x1xf32>
    %668 = arith.mulf %664, %667 : vector<16x1xf32>
    %669 = arith.addf %394, %668 : vector<16x1xf32>
    %cst_203 = arith.constant 4.000000e+00 : f32
    %670 = vector.broadcast %cst_203 : f32 to vector<16x1xf32>
    %671 = arith.mulf %669, %670 : vector<16x1xf32>
    %cst_204 = arith.constant 5.000000e-01 : f32
    %672 = vector.broadcast %cst_204 : f32 to vector<16x1xf32>
    %673 = arith.subf %671, %672 : vector<16x1xf32>
    %cst_205 = arith.constant 2.500000e-01 : f32
    %674 = vector.broadcast %cst_205 : f32 to vector<16x1xf32>
    %675 = arith.mulf %665, %674 : vector<16x1xf32>
    %676 = arith.addf %395, %675 : vector<16x1xf32>
    %cst_206 = arith.constant 4.000000e+00 : f32
    %677 = vector.broadcast %cst_206 : f32 to vector<16x1xf32>
    %678 = arith.mulf %676, %677 : vector<16x1xf32>
    %cst_207 = arith.constant 5.000000e-01 : f32
    %679 = vector.broadcast %cst_207 : f32 to vector<16x1xf32>
    %680 = arith.subf %678, %679 : vector<16x1xf32>
    %681 = vector.broadcast %392 : vector<1x16xf32> to vector<16x16xf32>
    %682 = vector.broadcast %673 : vector<16x1xf32> to vector<16x16xf32>
    %683 = arith.subf %681, %682 : vector<16x16xf32>
    %684 = math.absf %683 : vector<16x16xf32>
    %cst_208 = arith.constant 1.000000e+00 : f32
    %685 = vector.broadcast %cst_208 : f32 to vector<16x16xf32>
    %686 = arith.subf %685, %684 : vector<16x16xf32>
    %cst_209 = arith.constant 0.000000e+00 : f32
    %687 = vector.broadcast %cst_209 : f32 to vector<16x16xf32>
    %688 = arith.maximumf %686, %687 : vector<16x16xf32>
    %689 = vector.broadcast %393 : vector<1x16xf32> to vector<16x16xf32>
    %690 = vector.broadcast %680 : vector<16x1xf32> to vector<16x16xf32>
    %691 = arith.subf %689, %690 : vector<16x16xf32>
    %692 = math.absf %691 : vector<16x16xf32>
    %cst_210 = arith.constant 1.000000e+00 : f32
    %693 = vector.broadcast %cst_210 : f32 to vector<16x16xf32>
    %694 = arith.subf %693, %692 : vector<16x16xf32>
    %cst_211 = arith.constant 0.000000e+00 : f32
    %695 = vector.broadcast %cst_211 : f32 to vector<16x16xf32>
    %696 = arith.maximumf %694, %695 : vector<16x16xf32>
    %697 = vector.broadcast %666 : vector<16x1xf32> to vector<16x16xf32>
    %698 = arith.mulf %697, %688 : vector<16x16xf32>
    %699 = arith.mulf %698, %696 : vector<16x16xf32>
    %700 = arith.addf %663, %699 : vector<16x16xf32>
    %701 = arith.truncf %700 : vector<16x16xf32> to vector<16x16xbf16>
    %702 = vector.extract_strided_slice %396 {offsets = [0, 24], sizes = [16, 8], strides = [1, 1]} : vector<16x32xbf16> to vector<16x8xbf16>
    %cst_212 = arith.constant dense<0.000000e+00> : vector<16x8xf32>
    %703 = tpu.matmul %701, %702, %cst_212 {dimension_numbers = #tpu.dot_dimension_numbers<[1], [0], [0], [1], [0, 0, 1, 1], [], []>} : vector<16x16xbf16>, vector<16x8xbf16>, vector<16x8xf32> -> vector<16x8xf32>
    %704 = arith.addf %391, %703 : vector<16x8xf32>
    %705 = tpu.concatenate %473, %550, %627, %704 in 1 : vector<16x8xf32>, vector<16x8xf32>, vector<16x8xf32>, vector<16x8xf32> -> vector<16x32xf32>
    %706 = arith.truncf %705 : vector<16x32xf32> to vector<16x32xbf16>
    %c0_213 = arith.constant 0 : index
    %c0_214 = arith.constant 0 : index
    %707 = vector.load %arg16[%c0_213, %c0_214] : memref<32x32xf32, #tpu.memory_space<vmem>>, vector<32x32xf32>
    %708 = arith.truncf %707 : vector<32x32xf32> to vector<32x32xbf16>
    %cst_215 = arith.constant dense<0.000000e+00> : vector<16x32xf32>
    %709 = tpu.matmul %706, %708, %cst_215 {dimension_numbers = #tpu.dot_dimension_numbers<[1], [0], [0], [1], [0, 0, 1, 1], [], []>} : vector<16x32xbf16>, vector<32x32xbf16>, vector<16x32xf32> -> vector<16x32xf32>
    %c0_216 = arith.constant 0 : index
    %c0_217 = arith.constant 0 : index
    %710 = vector.load %arg17[%c0_216, %c0_217] : memref<1x32xf32, #tpu.memory_space<vmem>>, vector<1x32xf32>
    %711 = vector.broadcast %710 : vector<1x32xf32> to vector<16x32xf32>
    %712 = arith.addf %709, %711 : vector<16x32xf32>
    %713 = arith.addf %1, %712 : vector<16x32xf32>
    %c0_218 = arith.constant 0 : index
    %c0_219 = arith.constant 0 : index
    %714 = vector.load %arg18[%c0_218, %c0_219] : memref<1x32xf32, #tpu.memory_space<vmem>>, vector<1x32xf32>
    %c0_220 = arith.constant 0 : index
    %c0_221 = arith.constant 0 : index
    %715 = vector.load %arg19[%c0_220, %c0_221] : memref<1x32xf32, #tpu.memory_space<vmem>>, vector<1x32xf32>
    %cst_222 = arith.constant dense<0.000000e+00> : vector<16xf32>
    %716 = vector.multi_reduction <add>, %713, %cst_222 [1] : vector<16x32xf32> to vector<16xf32>
    %717 = vector.shape_cast %716 : vector<16xf32> to vector<16x1xf32>
    %cst_223 = arith.constant 3.200000e+01 : f32
    %718 = vector.broadcast %cst_223 : f32 to vector<16x1xf32>
    %719 = arith.divf %717, %718 : vector<16x1xf32>
    %720 = vector.broadcast %719 : vector<16x1xf32> to vector<16x32xf32>
    %721 = arith.subf %713, %720 : vector<16x32xf32>
    %722 = arith.mulf %721, %721 : vector<16x32xf32>
    %cst_224 = arith.constant dense<0.000000e+00> : vector<16xf32>
    %723 = vector.multi_reduction <add>, %722, %cst_224 [1] : vector<16x32xf32> to vector<16xf32>
    %724 = vector.shape_cast %723 : vector<16xf32> to vector<16x1xf32>
    %cst_225 = arith.constant 3.200000e+01 : f32
    %725 = vector.broadcast %cst_225 : f32 to vector<16x1xf32>
    %726 = arith.divf %724, %725 : vector<16x1xf32>
    %727 = vector.broadcast %719 : vector<16x1xf32> to vector<16x32xf32>
    %728 = arith.subf %713, %727 : vector<16x32xf32>
    %cst_226 = arith.constant 9.99999974E-6 : f32
    %729 = vector.broadcast %cst_226 : f32 to vector<16x1xf32>
    %730 = arith.addf %726, %729 : vector<16x1xf32>
    %731 = math.rsqrt %730 : vector<16x1xf32>
    %732 = vector.broadcast %731 : vector<16x1xf32> to vector<16x32xf32>
    %733 = arith.mulf %728, %732 : vector<16x32xf32>
    %734 = vector.broadcast %714 : vector<1x32xf32> to vector<16x32xf32>
    %735 = arith.mulf %733, %734 : vector<16x32xf32>
    %736 = vector.broadcast %715 : vector<1x32xf32> to vector<16x32xf32>
    %737 = arith.addf %735, %736 : vector<16x32xf32>
    %738 = arith.truncf %737 : vector<16x32xf32> to vector<16x32xbf16>
    %c0_227 = arith.constant 0 : index
    %c0_228 = arith.constant 0 : index
    %739 = vector.load %arg20[%c0_227, %c0_228] : memref<32x64xf32, #tpu.memory_space<vmem>>, vector<32x64xf32>
    %740 = arith.truncf %739 : vector<32x64xf32> to vector<32x64xbf16>
    %cst_229 = arith.constant dense<0.000000e+00> : vector<16x64xf32>
    %741 = tpu.matmul %738, %740, %cst_229 {dimension_numbers = #tpu.dot_dimension_numbers<[1], [0], [0], [1], [0, 0, 1, 1], [], []>} : vector<16x32xbf16>, vector<32x64xbf16>, vector<16x64xf32> -> vector<16x64xf32>
    %c0_230 = arith.constant 0 : index
    %c0_231 = arith.constant 0 : index
    %742 = vector.load %arg21[%c0_230, %c0_231] : memref<1x64xf32, #tpu.memory_space<vmem>>, vector<1x64xf32>
    %743 = vector.broadcast %742 : vector<1x64xf32> to vector<16x64xf32>
    %744 = arith.addf %741, %743 : vector<16x64xf32>
    %cst_232 = arith.constant 0.000000e+00 : f32
    %745 = vector.broadcast %cst_232 : f32 to vector<16x64xf32>
    %746 = arith.maximumf %744, %745 : vector<16x64xf32>
    %747 = arith.truncf %746 : vector<16x64xf32> to vector<16x64xbf16>
    %c0_233 = arith.constant 0 : index
    %c0_234 = arith.constant 0 : index
    %748 = vector.load %arg22[%c0_233, %c0_234] : memref<64x32xf32, #tpu.memory_space<vmem>>, vector<64x32xf32>
    %749 = arith.truncf %748 : vector<64x32xf32> to vector<64x32xbf16>
    %cst_235 = arith.constant dense<0.000000e+00> : vector<16x32xf32>
    %750 = tpu.matmul %747, %749, %cst_235 {dimension_numbers = #tpu.dot_dimension_numbers<[1], [0], [0], [1], [0, 0, 1, 1], [], []>} : vector<16x64xbf16>, vector<64x32xbf16>, vector<16x32xf32> -> vector<16x32xf32>
    %c0_236 = arith.constant 0 : index
    %c0_237 = arith.constant 0 : index
    %751 = vector.load %arg23[%c0_236, %c0_237] : memref<1x32xf32, #tpu.memory_space<vmem>>, vector<1x32xf32>
    %752 = vector.broadcast %751 : vector<1x32xf32> to vector<16x32xf32>
    %753 = arith.addf %750, %752 : vector<16x32xf32>
    %754 = arith.addf %737, %753 : vector<16x32xf32>
    %c0_238 = arith.constant 0 : index
    %c0_239 = arith.constant 0 : index
    %755 = vector.load %arg24[%c0_238, %c0_239] : memref<1x32xf32, #tpu.memory_space<vmem>>, vector<1x32xf32>
    %c0_240 = arith.constant 0 : index
    %c0_241 = arith.constant 0 : index
    %756 = vector.load %arg25[%c0_240, %c0_241] : memref<1x32xf32, #tpu.memory_space<vmem>>, vector<1x32xf32>
    %cst_242 = arith.constant dense<0.000000e+00> : vector<16xf32>
    %757 = vector.multi_reduction <add>, %754, %cst_242 [1] : vector<16x32xf32> to vector<16xf32>
    %758 = vector.shape_cast %757 : vector<16xf32> to vector<16x1xf32>
    %cst_243 = arith.constant 3.200000e+01 : f32
    %759 = vector.broadcast %cst_243 : f32 to vector<16x1xf32>
    %760 = arith.divf %758, %759 : vector<16x1xf32>
    %761 = vector.broadcast %760 : vector<16x1xf32> to vector<16x32xf32>
    %762 = arith.subf %754, %761 : vector<16x32xf32>
    %763 = arith.mulf %762, %762 : vector<16x32xf32>
    %cst_244 = arith.constant dense<0.000000e+00> : vector<16xf32>
    %764 = vector.multi_reduction <add>, %763, %cst_244 [1] : vector<16x32xf32> to vector<16xf32>
    %765 = vector.shape_cast %764 : vector<16xf32> to vector<16x1xf32>
    %cst_245 = arith.constant 3.200000e+01 : f32
    %766 = vector.broadcast %cst_245 : f32 to vector<16x1xf32>
    %767 = arith.divf %765, %766 : vector<16x1xf32>
    %768 = vector.broadcast %760 : vector<16x1xf32> to vector<16x32xf32>
    %769 = arith.subf %754, %768 : vector<16x32xf32>
    %cst_246 = arith.constant 9.99999974E-6 : f32
    %770 = vector.broadcast %cst_246 : f32 to vector<16x1xf32>
    %771 = arith.addf %767, %770 : vector<16x1xf32>
    %772 = math.rsqrt %771 : vector<16x1xf32>
    %773 = vector.broadcast %772 : vector<16x1xf32> to vector<16x32xf32>
    %774 = arith.mulf %769, %773 : vector<16x32xf32>
    %775 = vector.broadcast %755 : vector<1x32xf32> to vector<16x32xf32>
    %776 = arith.mulf %774, %775 : vector<16x32xf32>
    %777 = vector.broadcast %756 : vector<1x32xf32> to vector<16x32xf32>
    %778 = arith.addf %776, %777 : vector<16x32xf32>
    %c0_247 = arith.constant 0 : index
    %c0_248 = arith.constant 0 : index
    %c0_249 = arith.constant 0 : index
    %779 = vector.load %arg26[%c0_247, %c0_248, %c0_249] : memref<1x16x32xf32, #tpu.memory_space<vmem>>, vector<1x16x32xf32>
    %780 = vector.shape_cast %779 : vector<1x16x32xf32> to vector<16x32xf32>
    %781 = vector.shape_cast %778 : vector<16x32xf32> to vector<1x16x32xf32>
    tpu.vector_store %arg26[%c0_247, %c0_248, %c0_249], %781 {strides = array<i32>} : memref<1x16x32xf32, #tpu.memory_space<vmem>>, vector<1x16x32xf32>,
    return
  }
  func.func @transform_0(%arg0: i32, %arg1: i32) -> (i32, i32, i32) {
    %c0_i32 = arith.constant 0 : i32
    %c0_i32_0 = arith.constant 0 : i32
    return %arg0, %arg1, %c0_i32 : i32, i32, i32
  }
  func.func @transform_1(%arg0: i32, %arg1: i32) -> (i32, i32, i32) {
    %c0_i32 = arith.constant 0 : i32
    %c0_i32_0 = arith.constant 0 : i32
    return %arg0, %arg1, %c0_i32 : i32, i32, i32
  }
  func.func @transform_2(%arg0: i32, %arg1: i32) -> (i32, i32, i32) {
    %c0_i32 = arith.constant 0 : i32
    %c0_i32_0 = arith.constant 0 : i32
    return %arg0, %arg1, %c0_i32 : i32, i32, i32
  }
  func.func @transform_3(%arg0: i32, %arg1: i32) -> (i32, i32, i32) {
    %c0_i32 = arith.constant 0 : i32
    %c0_i32_0 = arith.constant 0 : i32
    %c0_i32_1 = arith.constant 0 : i32
    return %arg0, %c0_i32, %c0_i32_0 : i32, i32, i32
  }
  func.func @transform_4(%arg0: i32, %arg1: i32) -> (i32, i32) {
    %c0_i32 = arith.constant 0 : i32
    %c0_i32_0 = arith.constant 0 : i32
    %c0_i32_1 = arith.constant 0 : i32
    return %c0_i32, %c0_i32_0 : i32, i32
  }
  func.func @transform_5(%arg0: i32, %arg1: i32) -> (i32, i32) {
    %c0_i32 = arith.constant 0 : i32
    %c0_i32_0 = arith.constant 0 : i32
    %c0_i32_1 = arith.constant 0 : i32
    return %c0_i32, %c0_i32_0 : i32, i32
  }
  func.func @transform_6(%arg0: i32, %arg1: i32) -> (i32, i32) {
    %c0_i32 = arith.constant 0 : i32
    %c0_i32_0 = arith.constant 0 : i32
    %c0_i32_1 = arith.constant 0 : i32
    return %c0_i32, %c0_i32_0 : i32, i32
  }
  func.func @transform_7(%arg0: i32, %arg1: i32) -> (i32, i32) {
    %c0_i32 = arith.constant 0 : i32
    %c0_i32_0 = arith.constant 0 : i32
    %c0_i32_1 = arith.constant 0 : i32
    return %c0_i32, %c0_i32_0 : i32, i32
  }
  func.func @transform_8(%arg0: i32, %arg1: i32) -> (i32, i32) {
    %c0_i32 = arith.constant 0 : i32
    %c0_i32_0 = arith.constant 0 : i32
    %c0_i32_1 = arith.constant 0 : i32
    return %c0_i32, %c0_i32_0 : i32, i32
  }
  func.func @transform_9(%arg0: i32, %arg1: i32) -> (i32, i32) {
    %c0_i32 = arith.constant 0 : i32
    %c0_i32_0 = arith.constant 0 : i32
    %c0_i32_1 = arith.constant 0 : i32
    return %c0_i32, %c0_i32_0 : i32, i32
  }
  func.func @transform_10(%arg0: i32, %arg1: i32) -> (i32, i32) {
    %c0_i32 = arith.constant 0 : i32
    %c0_i32_0 = arith.constant 0 : i32
    %c0_i32_1 = arith.constant 0 : i32
    return %c0_i32, %c0_i32_0 : i32, i32
  }
  func.func @transform_11(%arg0: i32, %arg1: i32) -> (i32, i32) {
    %c0_i32 = arith.constant 0 : i32
    %c0_i32_0 = arith.constant 0 : i32
    %c0_i32_1 = arith.constant 0 : i32
    return %c0_i32, %c0_i32_0 : i32, i32
  }
  func.func @transform_12(%arg0: i32, %arg1: i32) -> (i32, i32) {
    %c0_i32 = arith.constant 0 : i32
    %c0_i32_0 = arith.constant 0 : i32
    %c0_i32_1 = arith.constant 0 : i32
    return %c0_i32, %c0_i32_0 : i32, i32
  }
  func.func @transform_13(%arg0: i32, %arg1: i32) -> (i32, i32) {
    %c0_i32 = arith.constant 0 : i32
    %c0_i32_0 = arith.constant 0 : i32
    %c0_i32_1 = arith.constant 0 : i32
    return %c0_i32, %c0_i32_0 : i32, i32
  }
  func.func @transform_14(%arg0: i32, %arg1: i32) -> (i32, i32) {
    %c0_i32 = arith.constant 0 : i32
    %c0_i32_0 = arith.constant 0 : i32
    %c0_i32_1 = arith.constant 0 : i32
    return %c0_i32, %c0_i32_0 : i32, i32
  }
  func.func @transform_15(%arg0: i32, %arg1: i32) -> (i32, i32) {
    %c0_i32 = arith.constant 0 : i32
    %c0_i32_0 = arith.constant 0 : i32
    %c0_i32_1 = arith.constant 0 : i32
    return %c0_i32, %c0_i32_0 : i32, i32
  }
  func.func @transform_16(%arg0: i32, %arg1: i32) -> (i32, i32) {
    %c0_i32 = arith.constant 0 : i32
    %c0_i32_0 = arith.constant 0 : i32
    %c0_i32_1 = arith.constant 0 : i32
    return %c0_i32, %c0_i32_0 : i32, i32
  }
  func.func @transform_17(%arg0: i32, %arg1: i32) -> (i32, i32) {
    %c0_i32 = arith.constant 0 : i32
    %c0_i32_0 = arith.constant 0 : i32
    %c0_i32_1 = arith.constant 0 : i32
    return %c0_i32, %c0_i32_0 : i32, i32
  }
  func.func @transform_18(%arg0: i32, %arg1: i32) -> (i32, i32) {
    %c0_i32 = arith.constant 0 : i32
    %c0_i32_0 = arith.constant 0 : i32
    %c0_i32_1 = arith.constant 0 : i32
    return %c0_i32, %c0_i32_0 : i32, i32
  }
  func.func @transform_19(%arg0: i32, %arg1: i32) -> (i32, i32) {
    %c0_i32 = arith.constant 0 : i32
    %c0_i32_0 = arith.constant 0 : i32
    %c0_i32_1 = arith.constant 0 : i32
    return %c0_i32, %c0_i32_0 : i32, i32
  }
  func.func @transform_20(%arg0: i32, %arg1: i32) -> (i32, i32) {
    %c0_i32 = arith.constant 0 : i32
    %c0_i32_0 = arith.constant 0 : i32
    %c0_i32_1 = arith.constant 0 : i32
    return %c0_i32, %c0_i32_0 : i32, i32
  }
  func.func @transform_21(%arg0: i32, %arg1: i32) -> (i32, i32) {
    %c0_i32 = arith.constant 0 : i32
    %c0_i32_0 = arith.constant 0 : i32
    %c0_i32_1 = arith.constant 0 : i32
    return %c0_i32, %c0_i32_0 : i32, i32
  }
  func.func @transform_22(%arg0: i32, %arg1: i32) -> (i32, i32) {
    %c0_i32 = arith.constant 0 : i32
    %c0_i32_0 = arith.constant 0 : i32
    %c0_i32_1 = arith.constant 0 : i32
    return %c0_i32, %c0_i32_0 : i32, i32
  }
  func.func @transform_23(%arg0: i32, %arg1: i32) -> (i32, i32) {
    %c0_i32 = arith.constant 0 : i32
    %c0_i32_0 = arith.constant 0 : i32
    %c0_i32_1 = arith.constant 0 : i32
    return %c0_i32, %c0_i32_0 : i32, i32
  }
  func.func @transform_24(%arg0: i32, %arg1: i32) -> (i32, i32, i32) {
    %c0_i32 = arith.constant 0 : i32
    %c0_i32_0 = arith.constant 0 : i32
    return %arg0, %arg1, %c0_i32 : i32, i32, i32
  }
}

</mosaic_0001>

<bundles_post_ra>
// kernel: tpu_custom_call.1
= control target key start
LH: loop header
LB: loop body
LE: loop exit
PB: predicated region body
PF: predicated region fallthrough
CT: control target
= control target key end

     0   :  { %s3742_s26 = smov 0   ;;  %s3744_s27 = smov 0   ;;  %s4813_s0 = inlined_call_operand.vmem [shape: f32[2,80,32], index: 0, kind: input, shape index: {}]   ;;  %s4814_s1 = inlined_call_operand.vmem [shape: f32[2,80,32], index: 1, kind: input, shape index: {}]   ;;  %s4815_s2 = inlined_call_operand.vmem [shape: f32[2,80,4], index: 2, kind: input, shape index: {}]   ;;  %s4816_s3 = inlined_call_operand.vmem [shape: f32[2,80,32], index: 3, kind: input, shape index: {}]   ;;  %s4817_s4 = inlined_call_operand.vmem [shape: f32[1,64], index: 4, kind: input, shape index: {}]   ;;  %s4818_s5 = inlined_call_operand.vmem [shape: f32[1,64], index: 5, kind: input, shape index: {}]   ;;  %s4819_s6 = inlined_call_operand.vmem [shape: f32[1,16], index: 6, kind: input, shape index: {}]   ;;  %s4820_s7 = inlined_call_operand.vmem [shape: f32[1,16], index: 7, kind: input, shape index: {}]   ;;  %s4821_s8 = inlined_call_operand.vmem [shape: f32[32,32], index: 8, kind: input, shape index: {}]   ;;  %s4822_s9 = inlined_call_operand.vmem [shape: f32[1,32], index: 9, kind: input, shape index: {}]   ;;  %s4823_s10 = inlined_call_operand.vmem [shape: f32[32,32], index: 10, kind: input, shape index: {}]   ;;  %s4824_s11 = inlined_call_operand.vmem [shape: f32[1,32], index: 11, kind: input, shape index: {}]   ;;  %s4825_s12 = inlined_call_operand.vmem [shape: f32[32,16], index: 12, kind: input, shape index: {}]   ;;  %s4826_s13 = inlined_call_operand.vmem [shape: f32[1,16], index: 13, kind: input, shape index: {}]   ;;  %s4827_s14 = inlined_call_operand.vmem [shape: f32[32,32], index: 14, kind: input, shape index: {}]   ;;  %s4828_s15 = inlined_call_operand.vmem [shape: f32[1,32], index: 15, kind: input, shape index: {}]   ;;  %s4829_s16 = inlined_call_operand.vmem [shape: f32[1,32], index: 16, kind: input, shape index: {}]   ;;  %s4830_s17 = inlined_call_operand.vmem [shape: f32[1,32], index: 17, kind: input, shape index: {}]   ;;  %s4831_s18 = inlined_call_operand.vmem [shape: f32[32,64], index: 18, kind: input, shape index: {}]   ;;  %s4832_s19 = inlined_call_operand.vmem [shape: f32[1,64], index: 19, kind: input, shape index: {}]   ;;  %s4833_s20 = inlined_call_operand.vmem [shape: f32[64,32], index: 20, kind: input, shape index: {}]   ;;  %s4834_s21 = inlined_call_operand.vmem [shape: f32[1,32], index: 21, kind: input, shape index: {}]   ;;  %s4835_s22 = inlined_call_operand.vmem [shape: f32[1,32], index: 22, kind: input, shape index: {}]   ;;  %s4836_s23 = inlined_call_operand.vmem [shape: f32[1,32], index: 23, kind: input, shape index: {}]   ;;  %s4837_s24 = inlined_call_operand.vmem [shape: f32[2,80,32], index: 24, kind: output, shape index: {}]  }
   0x1   :  { %4852 = sst [smem:[#allocation38_spill]] %s4813_s0  ;;  %s3746_s28 = smov 0  }
   0x2   :  { %4853 = sst [smem:[#allocation39_spill]] %s4814_s1 }
   0x3   :  { %4854 = sst [smem:[#allocation40_spill]] %s4815_s2 }
   0x4   :  { %4855 = sst [smem:[#allocation41_spill]] %s4816_s3 }
   0x5   :  { %4856 = sst [smem:[#allocation42_spill]] %s4817_s4 }
   0x6   :  { %4857 = sst [smem:[#allocation43_spill]] %s4818_s5  ;;  %s3740_s5 = smov 0  }
   0x7   :  { %4858 = sst [smem:[#allocation44_spill]] %s4819_s6  ;;  %s3748_s6 = smov 0  }
   0x8   :  { %4859 = sst [smem:[#allocation45_spill]] %s4820_s7 }
   0x9   :  { %4860 = sst [smem:[#allocation46_spill]] %s4821_s8 }
   0xa   :  { %4861 = sst [smem:[#allocation47_spill]] %s4823_s10 }
   0xb LB: > { %4862 = sst [smem:[#allocation2_spill]] %s3577_s28  ;;  %s43_s2 = sadd.s32 1, %s3573_s27  ;;  %s3581_s6 = sphi %s3748_s6, %s34_s6   ;;  %s3577_s28 = sphi %s3746_s28, %s4956_s28   ;;  %s3573_s27 = sphi %s3744_s27, %s4958_s27   ;;  %s3569_s26 = sphi %s3742_s26, %s4954_s26   ;;  %s3565_s5 = sphi %s3740_s5, %s4957_s5  }
   0xc   : > { %s46_s29 = sadd.s32 1, %s3577_s28  ;;  %p44_p0 = scmp.ge.s32.totalorder %s43_s2, 5 }
   0xd   : > { %p3073_p1 = scmp.ge.s32.totalorder %s3581_s6, 1  ;;  %p727_p2 = scmp.lt.s32.totalorder %s3581_s6, 11 }
   0xe   : > { %s4960_s2 = smov (%p44_p0, %s43_s2), 0  ;;  %s4962_s29 = smov (!%p44_p0, %s46_s29), %s3577_s28 }
   0xf   : > { %4863 = sst [smem:[#allocation3_spill]] %s4960_s2  ;;  %p728_p3 = pnand %p3073_p1, %p727_p2 }
  0x10   : > { %p48_p4 = scmp.ge.s32.totalorder %s4962_s29, 2 }
  0x11   : > { %731 = sbr.rel (%p728_p3) target bundleno = 2692 (0xa84), region = 116 }
  0x12   : > { %s4964_s29 = smov (%p48_p4, %s4962_s29), 0 }
  0x13   : > { %4864 = sst [smem:[#allocation4_spill]] %s4964_s29 }
  0x18   : > { %s4865_s30 = sld [smem:[#allocation46_spill]]  ;;  %p825_p5 = scmp.lt.s32.totalorder %s3569_s26, 1  ;;  %v4843_v3 = vmov 0.0   ;;  %vm3584_vm0 = vmmov 0   ;;  %vm906_vm1 = vcmask 261120   ;;  %v1053_v16 = vld [vmem:[%s4825_s12] sm:$0xff] }
  0x19   : > { %3201 = vmatprep.subr.bf16.mxu0 %v4843_v3  ;;  %3225 = vmatprep.subr.bf16.mxu1 %v4843_v3  ;;  %s4866_s10 = sld [smem:[#allocation47_spill]]  ;;  %s3074_s8 = sshll.u32 %s3565_s5, 1  ;;  %v1054_v19 = vld [vmem:[%s4825_s12 + $0x8] sm:$0xff]  ;;  %v1055_v29 = vld [vmem:[%s4825_s12 + $0x10] sm:$0xff]  ;;  %v1056_v30 = vld [vmem:[%s4825_s12 + $0x18] sm:$0xff]  ;;  %v4846_v41 = vmov 0  }
  0x1a   : > { %3205 = vmatprep.mubr.msk.bf16.mxu0 %vm3584_vm0, %v4843_v3  ;;  %s4966_s26 = smov (!%p825_p5, %s3569_s26), 1  ;;  %3229 = vmatprep.mubr.msk.bf16.mxu1 %vm3584_vm0, %v4843_v3  ;;  %p827_p6 = scmp.lt.s32.totalorder %s3074_s8, 9  ;;  %v1057_v27 = vpack.c.bf16 %v1054_v19, %v1053_v16  ;;  %v1058_v31 = vpack.c.bf16 %v1056_v30, %v1055_v29  ;;  %v3880_v42 = vld [vmem:[%s4822_s9] ss:$0 sm:$0xff]  ;;  %vm1135_vm2 = vcmask 64544   ;;  %vm1197_vm3 = vcmask 130144  }
  0x1b   : > { %s3358_s5 = smul.u32 80, %s4966_s26  ;;  %s4867_s7 = sld [smem:[#allocation41_spill]]  ;;  %3431 = vset.pattern.permute.xlu1 %v4846_v41  ;;  %3432 = vset.pattern.permute.xlu0 %v4846_v41  ;;  %v3089_v50 = vld [vmem:[%s4824_s11] ss:$0 sm:$0xff]  ;;  %vm1112_vm4 = vcmask 31744   ;;  %vm1166_vm5 = vcmask 97344  }
  0x1c   : > { %s4968_s8 = smov (!%p827_p6, %s3074_s8), 9  ;;  %s3357_s25 = smul.u32 10, %s4966_s26  ;;  %vm1861_vm6 = vcmask 130048   ;;  %vm1906_vm7 = vcmask 523264   ;;  %vm2646_vm8 = vcmask 64512   ;;  %vm2651_vm9 = vcmask 195584  }
  0x1d   : > { %s4868_s29 = sld [smem:[#allocation38_spill]]  ;;  %s3591_s0 = smov 110  }
  0x1e   : > { %v893_v0 = vld [vmem:[%s4865_s30] sm:$0xff]  ;;  %v894_v1 = vld [vmem:[%s4865_s30 + $0x8] sm:$0xff]  ;;  %v895_v2 = vld [vmem:[%s4865_s30 + $0x10] sm:$0xff]  ;;  %s830_s4 = sadd.s32 %s3357_s25, %s4968_s8  ;;  %s3587_s8 = smov 124  }
  0x1f   : > { %v897_v4 = vpack.c.bf16 %v894_v1, %v893_v0  ;;  %v896_v5 = vld [vmem:[%s4865_s30 + $0x18] sm:$0xff]  ;;  %v996_v6 = vld [vmem:[%s4866_s10] sm:$0xff]  ;;  %v997_v7 = vld [vmem:[%s4866_s10 + $0x8] sm:$0xff]  ;;  %s3817_s1 = sshll.u32 %s830_s4, 3  ;;  %s3588_s25 = smov 126  }
  0x20   : > { %v1000_v8 = vpack.c.bf16 %v997_v7, %v996_v6  ;;  %v998_v9 = vld [vmem:[%s4866_s10 + $0x10] sm:$0xff]  ;;  %v999_v10 = vld [vmem:[%s4866_s10 + $0x18] sm:$0xff]  ;;  %v898_v11 = vpack.c.bf16 %v896_v5, %v895_v2  ;;  %s4869_s10 = sld [smem:[#allocation39_spill]]  ;;  %s3592_s28 = smov 108  }
  0x21   : > { %3202 = vmatpush3.bf16.msra.mxu0 %v897_v4  ;;  %v1001_v12 = vpack.c.bf16 %v999_v10, %v998_v9  ;;  %s3812_s3 = scalar_lea.vmem %s4867_s7, %s3358_s5  ;;  %s3593_s30 = smov 102  }
  0x22   : > { %3203 = vmatprep.subr.bf16.mxu0 %v4843_v3  ;;  %3226 = vmatpush3.bf16.msra.mxu1 %v1000_v8  ;;  %v878_v13 = vld [vmem:[%s3812_s3] sm:$0xff]  ;;  %v879_v14 = vld [vmem:[%s3812_s3 + $0x8] sm:$0xff]  ;;  %v880_v17 = vld [vmem:[%s3812_s3 + $0x10] sm:$0xff]  ;;  %s3594_s5 = smov 100   ;;  %s3595_s26 = smov 112  }
  0x23   : > { %3227 = vmatprep.subr.bf16.mxu1 %v4843_v3  ;;  %v888_v15 = vpack.c.bf16 %v879_v14, %v878_v13  ;;  %s3828_s7 = scalar_lea.vmem %s4868_s29, %s3817_s1  ;;  %v881_v18 = vld [vmem:[%s3812_s3 + $0x18] sm:$0xff]  ;;  %v882_v32 = vld [vmem:[%s3812_s3 + $0x20] sm:$0xff]  ;;  %v883_v33 = vld [vmem:[%s3812_s3 + $0x28] sm:$0xff]  ;;  %s3586_s29 = smov 120  }
  0x24   : > { %v870_v20 = vld [vmem:[%s3828_s7] sm:$0xff]  ;;  %v871_v21 = vld [vmem:[%s3828_s7 + $0x8] sm:$0xff]  ;;  %v889_v26 = vpack.c.bf16 %v881_v18, %v880_v17  ;;  %v890_v34 = vpack.c.bf16 %v883_v33, %v882_v32  ;;  %v884_v35 = vld [vmem:[%s3812_s3 + $0x30] sm:$0xff] }
  0x25   : > { %3204 = vmatpush3.bf16.msra.mxu0 %v898_v11  ;;  %v885_v36 = vld [vmem:[%s3812_s3 + $0x38] sm:$0xff]  ;;  %v886_v38 = vld [vmem:[%s3812_s3 + $0x40] sm:$0xff]  ;;  %v887_v39 = vld [vmem:[%s3812_s3 + $0x48] sm:$0xff]  ;;  %s3596_s3 = smov 104  }
  0x26   : > { %3228 = vmatpush3.bf16.msra.mxu1 %v1001_v12  ;;  %3259 = vmatprep.subr.bf16.mxu0 %v4843_v3  ;;  %s842_s4 = scalar_lea.vmem %s4869_s10, %s3817_s1  ;;  %v891_v37 = vpack.c.bf16 %v885_v36, %v884_v35  ;;  %v892_v40 = vpack.c.bf16 %v887_v39, %v886_v38  ;;  %s4841_s10 = smov 116   ;;  %v4849_v36 = vmov 1  }
  0x27   : > { %3233 = vmatprep.subr.bf16.mxu1 %v4843_v3  ;;  %v872_v22 = vld [vmem:[%s842_s4] sm:$0xff]  ;;  %v873_v23 = vld [vmem:[%s842_s4 + $0x8] sm:$0xff]  ;;  %s3589_s4 = smov 118  }
  0x28   : > { %3206 = vmatmul.mubr.msk.bf16.vlgmr.msra.gmra.mrb[0].mxu0 %vm906_vm1, %v888_v15  ;;  %v874_v24 = vadd.f32 %v872_v22, %v870_v20  ;;  %v875_v25 = vadd.f32 %v873_v23, %v871_v21 }
  0x29   : > { %3209 = vmatprep.mubr.msk.bf16.mxu0 %vm3584_vm0, %v4843_v3 }
  0x2a   : > { %v995_v28 = vpack.c.bf16 %v875_v25, %v874_v24 }
  0x2c   : > { %3230 = vmatmul.mubr.msk.bf16.vlgmr.msra.gmra.mrb[0].mxu1 %vm906_vm1, %v995_v28 }
  0x2d   : > { %3234 = vmatpush3.bf16.msra.mxu1 %v1057_v27  ;;  %3237 = vmatprep.mubr.msk.bf16.mxu1 %vm3584_vm0, %v4843_v3 }
  0x2e   : > { %3235 = vmatprep.subr.bf16.mxu1 %v4843_v3 }
  0x30   : > { %3210 = vmatmul.mubr.msk.bf16.gmra.mrb[4].mxu0 %vm906_vm1, %v889_v26 }
  0x31   : > { %3213 = vmatprep.mubr.msk.bf16.mxu0 %vm3584_vm0, %v4843_v3  ;;  %3236 = vmatpush3.bf16.msra.mxu1 %v1058_v31 }
  0x32   : > { %3241 = vmatprep.subr.bf16.mxu1 %v4843_v3 }
  0x34   : > { %3238 = vmatmul.mubr.msk.bf16.vlgmr.msra.gmra.mrb[4].mxu1 %vm906_vm1, %v995_v28 }
  0x35   : > { %3243 = vmatprep.mubr.msk.bf16.mxu1 %vm3584_vm0, %v4843_v3 }
  0x38   : > { %3214 = vmatmul.mubr.msk.bf16.gmra.mrb[8].mxu0 %vm906_vm1, %v890_v34  ;;  %v3091_v34 = vld [vmem:[%s4826_s13] ss:$0 sm:$0xff] }
  0x39   : > { %3217 = vmatprep.mubr.msk.bf16.mxu0 %vm3584_vm0, %v4843_v3 }
  0x40   : > { %3218 = vmatmul.mubr.msk.bf16.gmra.mrb[12].mxu0 %vm906_vm1, %v891_v37 }
  0x41   : > { %3221 = vmatprep.mubr.msk.bf16.mxu0 %vm3584_vm0, %v4843_v3 }
  0x48   : > { %3222 = vmatmul.mubr.msk.bf16.gmra.mrb[16].mxu0 %vm906_vm1, %v892_v40 }
  0x49   : > { %3261 = vmatprep.mubr.msk.bf16.mxu0 %vm3584_vm0, %v4843_v3 }
  0xfb   : > { %v956_v43 = vpop.f32.mrb[0].mxu0 }
  0xfc   : > { %v957_v44 = vadd.f32 %v3880_v42, %v956_v43  ;;  %v3207_v45 = vpop.f32.mrb[1].mxu0 }
  0xfd   : > { %v959_v46 = vpop.f32.mrb[2].mxu0 }
  0xfe   : > { %v960_v47 = vadd.f32 %v3880_v42, %v959_v46  ;;  %v3208_v48 = vpop.f32.mrb[3].mxu0  ;;  %v4845_v46 = vmov 3  }
  0xff   : > { %v1046_v51 = vpop.f32.mrb[0].mxu1 }
 0x100   : > { %v3884_v49 = vpack.c.bf16 %v960_v47, %v957_v44  ;;  %v1047_v52 = vadd.f32 %v3089_v50, %v1046_v51  ;;  %v3231_v53 = vpop.f32.mrb[1].mxu1  ;;  %v4848_v51 = vmov 2  }
 0x101   : > { %v1049_v55 = vpop.f32.mrb[2].mxu1 }
 0x102   : > { %2122 = vrot.lane.b32.xlu0 %v3884_v49, %s3586_s29  ;;  %v1726_v58 = vmul.f32 0.25, %v1047_v52  ;;  %v3232_v59 = vpop.f32.mrb[3].mxu1  ;;  %v3896_v0 = vmul.f32 0.125, %v1047_v52  ;;  %v1050_v1 = vadd.f32 %v3089_v50, %v1049_v55 }
 0x103   : > { %v964_v54 = vpop.f32.mrb[4].mxu0 }
 0x104   : > { %v965_v56 = vadd.f32 %v3880_v42, %v964_v54  ;;  %v3211_v57 = vpop.f32.mrb[5].mxu0  ;;  %1800 = vrot.lane.b32.xlu1 %v1726_v58, %s3587_s8  ;;  %v1727_v6 = vmul.f32 0.25, %v1050_v1  ;;  %v3913_v8 = vmul.f32 0.125, %v1050_v1 }
 0x105   : > { %v967_v60 = vpop.f32.mrb[6].mxu0 }
 0x106   : > { %v968_v61 = vadd.f32 %v3880_v42, %v967_v60  ;;  %v3212_v62 = vpop.f32.mrb[7].mxu0  ;;  %1730 = vrot.lane.b32.xlu0 %v1726_v58, %s3588_s25 }
 0x107   : > { %v3898_v2 = vpop.f32.mrb[4].mxu1 }
 0x108   : > { %v3894_v63 = vpack.c.bf16 %v968_v61, %v965_v56  ;;  %1361 = vrot.lane.b32.xlu1 %v3896_v0, %s3586_s29  ;;  %v3239_v4 = vpop.f32.mrb[5].mxu1  ;;  %v3973_v35 = vadd.f32 %v3091_v34, %v3898_v2 }
 0x109   : > { %v3903_v5 = vpop.f32.mrb[6].mxu1 }
 0x10a   : > { %1951 = vrot.lane.b32.xlu0 %v1726_v58, %s3589_s4  ;;  %v3240_v7 = vpop.f32.mrb[7].mxu1  ;;  %v1136_v37 = vsel %vm1135_vm2, %v3973_v35, -inf  ;;  %v1198_v38 = vsel %vm1197_vm3, %v3973_v35, -inf  ;;  %v1113_v39 = vsel %vm1112_vm4, %v3973_v35, -inf  ;;  %v1167_v44 = vsel %vm1166_vm5, %v3973_v35, -inf }
 0x10b   : > { %v972_v9 = vpop.f32.mrb[8].mxu0  ;;  %v3994_v53 = vadd.f32 %v3091_v34, %v3903_v5 }
 0x10c   : > { %1732 = vrot.lane.b32.xlu1 %v1727_v6, %s3588_s25  ;;  %v3215_v10 = vpop.f32.mrb[9].mxu0  ;;  %v973_v12 = vadd.f32 %v3880_v42, %v972_v9 }
 0x10d   : > { %v975_v11 = vpop.f32.mrb[10].mxu0  ;;  %v1139_v56 = vsel %vm1135_vm2, %v3994_v53, -inf  ;;  %v1170_v5 = vsel %vm1166_vm5, %v3994_v53, -inf  ;;  %v1201_v9 = vsel %vm1197_vm3, %v3994_v53, -inf }
 0x10e   : > { %2009 = vrot.lane.b32.xlu0 %v1726_v58, %s4841_s10  ;;  %v3216_v13 = vpop.f32.mrb[11].mxu0  ;;  %v976_v15 = vadd.f32 %v3880_v42, %v975_v11 }
 0x110   : > { %1802 = vrot.lane.b32.xlu1 %v1727_v6, %s3587_s8  ;;  %v3924_v19 = vpack.c.bf16 %v976_v15, %v973_v12 }
 0x112   : > { %1300 = vrot.lane.b32.xlu0 %v3896_v0, %s3588_s25 }
 0x113   : > { %v980_v14 = vpop.f32.mrb[12].mxu0 }
 0x114   : > { %1953 = vrot.lane.b32.xlu1 %v1727_v6, %s3589_s4  ;;  %v981_v16 = vadd.f32 %v3880_v42, %v980_v14  ;;  %v3219_v17 = vpop.f32.mrb[13].mxu0  ;;  %v1116_v14 = vsel %vm1112_vm4, %v3994_v53, -inf }
 0x115   : > { %v983_v18 = vpop.f32.mrb[14].mxu0 }
 0x116   : > { %1421 = vrot.lane.b32.xlu0 %v3896_v0, %s3589_s4  ;;  %v984_v20 = vadd.f32 %v3880_v42, %v983_v18  ;;  %v3220_v21 = vpop.f32.mrb[15].mxu0 }
 0x118   : > { %2011 = vrot.lane.b32.xlu1 %v1727_v6, %s4841_s10  ;;  %v3927_v22 = vpack.c.bf16 %v984_v20, %v981_v16 }
 0x11a   : > { %2178 = vrot.lane.b32.xlu0 %v1726_v58, %s3591_s0 }
 0x11b   : > { %v988_v23 = vpop.f32.mrb[16].mxu0 }
 0x11c   : > { %1302 = vrot.lane.b32.xlu1 %v3913_v8, %s3588_s25  ;;  %v3223_v24 = vpop.f32.mrb[17].mxu0  ;;  %v989_v26 = vadd.f32 %v3880_v42, %v988_v23  ;;  %s4910_s25 = sld [smem:[#allocation44_spill]] }
 0x11d   : > { %v991_v27 = vpop.f32.mrb[18].mxu0 }
 0x11e   : > { %2236 = vrot.lane.b32.xlu0 %v1726_v58, %s3592_s28  ;;  %v992_v28 = vadd.f32 %v3880_v42, %v991_v27  ;;  %v3224_v29 = vpop.f32.mrb[19].mxu0 }
 0x120   : > { %1363 = vrot.lane.b32.xlu1 %v3913_v8, %s3586_s29  ;;  %v3956_v31 = vpack.c.bf16 %v992_v28, %v989_v26 }
 0x122   : > { %2400 = vrot.lane.b32.xlu0 %v1726_v58, %s3593_s30  ;;  %3242 = vmatpush3.bf16.msra.mxu1 %v3956_v31 }
 0x123   : > { %3247 = vmatprep.subr.bf16.mxu1 %v4843_v3 }
 0x124   : > { %1423 = vrot.lane.b32.xlu1 %v3913_v8, %s3589_s4  ;;  %s4870_s4 = sld [smem:[#allocation40_spill]] }
 0x126   : > { %2458 = vrot.lane.b32.xlu0 %v1726_v58, %s3594_s5 }
 0x128   : > { %2180 = vrot.lane.b32.xlu1 %v1727_v6, %s3591_s0 }
 0x12a   : > { %1482 = vrot.lane.b32.xlu0 %v3896_v0, %s3595_s26  ;;  %s3943_s10 = scalar_lea.vmem %s4870_s4, %s3817_s1 }
 0x12b   : > { %v3948_v25 = vld [vmem:[%s3943_s10] sm:$0xff]  ;;  %v3983_v40 = vld [vmem:[%s3943_s10 + $0x8] sm:$0xff]  ;;  %s4872_s10 = smov 116  }
 0x12c   : > { %2238 = vrot.lane.b32.xlu1 %v1727_v6, %s3592_s28  ;;  %v1232_v30 = vadd.f32 %v3896_v0, %v3948_v25  ;;  %v1233_v42 = vadd.f32 %v3913_v8, %v3983_v40  ;;  %s3613_s28 = smov 24  }
 0x12e   : > { %1542 = vrot.lane.b32.xlu0 %v3896_v0, %s3591_s0  ;;  %v1234_v32 = vmul.f32 8.0, %v1232_v30  ;;  %v1235_v43 = vmul.f32 8.0, %v1233_v42 }
 0x130   : > { %2402 = vrot.lane.b32.xlu1 %v1727_v6, %s3593_s30  ;;  %v3964_v33 = vadd.f32 -0.5, %v1234_v32  ;;  %v3094_v45 = vadd.f32 -0.5, %v1235_v43 }
 0x132   : > { %1603 = vrot.lane.b32.xlu0 %v3896_v0, %s3596_s3 }
 0x134   : > { %2460 = vrot.lane.b32.xlu1 %v1727_v6, %s3594_s5 }
 0x136   : > { %1663 = vrot.lane.b32.xlu0 %v3896_v0, %s3593_s30 }
 0x138   : > { %1484 = vrot.lane.b32.xlu1 %v3913_v8, %s3595_s26 }
 0x13c   : > { %1544 = vrot.lane.b32.xlu1 %v3913_v8, %s3591_s0  ;;  %s4911_s0 = sld [smem:[#allocation45_spill]] }
 0x140   : > { %1605 = vrot.lane.b32.xlu1 %v3913_v8, %s3596_s3 }
 0x144   : > { %1665 = vrot.lane.b32.xlu1 %v3913_v8, %s3593_s30  ;;  %s4909_s30 = sld [smem:[#allocation42_spill]] }
 0x148   : > { %1246 = vperm.xlu1 %3431, %v3964_v33  }
 0x14c   : > { %2124 = vrot.lane.b32.xlu1 %v3894_v63, %s3586_s29 }
 0x14d   : > { %3433 = vset.pattern.permute.xlu1 %v4849_v36 }
 0x155   : > { %1137 = vmax.xlane.f32.xlu0 %v1136_v37 }
 0x159   : > { %1199 = vmax.xlane.f32.xlu0 %v1198_v38 }
 0x15d   : > { %1114 = vmax.xlane.f32.xlu0 %v1113_v39 }
 0x170   : > { %1168 = vmax.xlane.f32.xlu1 %v1167_v44 }
 0x173   : > { %1251 = vperm.xlu0 %3432, %v3094_v45  }
 0x174   : > { %v3996_v54 = vpop.permute.xlu0 %2122 }
 0x175   : > { %4871 = vst [vmem:[#allocation5_spill] sm:$0xff] %v3996_v54 }
 0x176   : > { %v1801_v47 = vpop.permute.xlu1 %1800 }
 0x177   : > { %3436 = vset.pattern.permute.xlu0 %v4845_v46  ;;  %v1806_v37 = vadd.f32 %v1801_v47, %v3948_v25 }
 0x178   : > { %v4002_v57 = vpop.permute.xlu0 %1730 }
 0x17a   : > { %v1362_v48 = vpop.permute.xlu1 %1361 }
 0x17b   : > { %v1367_v10 = vadd.f32 %v1362_v48, %v3948_v25 }
 0x17c   : > { %v1952_v59 = vpop.permute.xlu0 %1951 }
 0x17d   : > { %v1957_v62 = vadd.f32 %v1952_v59, %v3948_v25  ;;  %v1369_v15 = vmul.f32 8.0, %v1367_v10 }
 0x17e   : > { %v1733_v50 = vpop.permute.xlu1 %1732 }
 0x17f   : > { %v1959_v2 = vmul.f32 4.0, %v1957_v62  ;;  %v4028_v18 = vadd.f32 -0.5, %v1369_v15  ;;  %v1737_v26 = vadd.f32 %v1733_v50, %v3983_v40 }
 0x180   : > { %v2010_v61 = vpop.permute.xlu0 %2009 }
 0x181   : > { %1273 = vperm.xlu1 %3433, %v3094_v45   ;;  %v2015_v4 = vadd.f32 %v2010_v61, %v3948_v25  ;;  %v3119_v7 = vadd.f32 -0.5, %v1959_v2  ;;  %v1739_v30 = vmul.f32 4.0, %v1737_v26  ;;  %v1808_v45 = vmul.f32 4.0, %v1806_v37 }
 0x182   : > { %v3991_v52 = vpop.permute.xlu1 %1802 }
 0x183   : > { %v2017_v8 = vmul.f32 4.0, %v2015_v4  ;;  %v4045_v38 = vadd.f32 -0.5, %v1739_v30 }
 0x184   : > { %v4011_v1 = vpop.permute.xlu0 %1300 }
 0x185   : > { %3434 = vset.pattern.permute.xlu1 %v4848_v51  ;;  %v3121_v12 = vadd.f32 -0.5, %v2017_v8 }
 0x186   : > { %v3998_v55 = vpop.permute.xlu1 %1953 }
 0x188   : > { %v1422_v11 = vpop.permute.xlu0 %1421 }
 0x189   : > { %v1427_v16 = vadd.f32 %v1422_v11, %v3948_v25 }
 0x18a   : > { %v4004_v58 = vpop.permute.xlu1 %2011 }
 0x18b   : > { %v1429_v20 = vmul.f32 8.0, %v1427_v16 }
 0x18c   : > { %v2179_v17 = vpop.permute.xlu0 %2178 }
 0x18d   : > { %v2184_v21 = vadd.f32 %v2179_v17, %v3948_v25  ;;  %v4033_v24 = vadd.f32 -0.5, %v1429_v20 }
 0x18e   : > { %v4006_v60 = vpop.permute.xlu1 %1302 }
 0x18f   : > { %v2186_v27 = vmul.f32 4.0, %v2184_v21 }
 0x190   : > { %v4037_v28 = vpop.permute.xlu0 %2236 }
 0x191   : > { %v4039_v32 = vadd.f32 -0.5, %v2186_v27 }
 0x192   : > { %1140 = vmax.xlane.f32.xlu0 %v1139_v56  ;;  %v4009_v0 = vpop.permute.xlu1 %1363  ;;  %v3115_v56 = vadd.f32 -0.5, %v1808_v45 }
 0x194   : > { %v2401_v39 = vpop.permute.xlu0 %2400 }
 0x195   : > { %v2406_v30 = vadd.f32 %v2401_v39, %v3948_v25 }
 0x196   : > { %v4016_v6 = vpop.permute.xlu1 %1423 }
 0x198   : > { %v2459_v59 = vpop.permute.xlu0 %2458 }
 0x199   : > { %v2464_v37 = vadd.f32 %v2459_v59, %v3948_v25 }
 0x19a   : > { %v4023_v13 = vpop.permute.xlu1 %2180 }
 0x19c   : > { %v1483_v8 = vpop.permute.xlu0 %1482 }
 0x19e   : > { %v2239_v23 = vpop.permute.xlu1 %2238 }
 0x19f   : > { %v2243_v34 = vadd.f32 %v2239_v23, %v3983_v40 }
 0x1a0   : > { %v4068_v15 = vpop.permute.xlu0 %1542 }
 0x1a1   : > { %v2245_v42 = vmul.f32 4.0, %v2243_v34  ;;  %v2408_v34 = vmul.f32 4.0, %v2406_v30  ;;  %v1428_v30 = vadd.f32 %v4016_v6, %v3983_v40 }
 0x1a2   : > { %v2403_v29 = vpop.permute.xlu1 %2402 }
 0x1a3   : > { %v2407_v43 = vadd.f32 %v2403_v29, %v3983_v40  ;;  %v4051_v48 = vadd.f32 -0.5, %v2245_v42 }
 0x1a4   : > { %v4078_v17 = vpop.permute.xlu0 %1603 }
 0x1a5   : > { %1171 = vmax.xlane.f32.xlu1 %v1170_v5  ;;  %v2409_v50 = vmul.f32 4.0, %v2407_v43  ;;  %v1736_v5 = vadd.f32 %v4002_v57, %v3948_v25  ;;  %v1306_v57 = vadd.f32 %v4011_v1, %v3948_v25  ;;  %v3131_v43 = vadd.f32 -0.5, %v2408_v34 }
 0x1a6   : > { %v2461_v44 = vpop.permute.xlu1 %2460 }
 0x1a7   : > { %v2465_v47 = vadd.f32 %v2461_v44, %v3983_v40  ;;  %v4057_v62 = vadd.f32 -0.5, %v2409_v50  ;;  %v1738_v11 = vmul.f32 4.0, %v1736_v5  ;;  %v2466_v44 = vmul.f32 4.0, %v2464_v37 }
 0x1a8   : > { %2128 = vrot.lane.b32.xlu0 %v3927_v22, %s3586_s29  ;;  %v4081_v20 = vpop.permute.xlu0 %1663  ;;  %v1958_v5 = vadd.f32 %v3998_v55, %v3983_v40 }
 0x1a9   : > { %1202 = vmax.xlane.f32.xlu1 %v1201_v9  ;;  %v2467_v2 = vmul.f32 4.0, %v2465_v47  ;;  %v4071_v16 = vadd.f32 -0.5, %v1738_v11 }
 0x1aa   : > { %v1485_v61 = vpop.permute.xlu1 %1484 }
 0x1ab   : > { %v1489_v4 = vadd.f32 %v1485_v61, %v3983_v40  ;;  %v4063_v9 = vadd.f32 -0.5, %v2467_v2  ;;  %v1807_v2 = vadd.f32 %v3991_v52, %v3983_v40  ;;  %v2016_v52 = vadd.f32 %v4004_v58, %v3983_v40 }
 0x1ac   : > { %1982 = vperm.xlu0 %3436, %v3119_v7  }
 0x1ad   : > { %1117 = vmax.xlane.f32.xlu1 %v1116_v14  ;;  %v1491_v10 = vmul.f32 8.0, %v1489_v4  ;;  %v1809_v4 = vmul.f32 4.0, %v1807_v2 }
 0x1af   : > { %v4066_v14 = vadd.f32 -0.5, %v1491_v10  ;;  %v4122_v11 = vadd.f32 -0.5, %v1809_v4 }
 0x1b0   : > { %2040 = vperm.xlu0 %3436, %v3121_v12  }
 0x1b4   : > { %3438 = vset.pattern.permute.xlu0 %v4846_v41 }
 0x1b5   : > { %1375 = vperm.xlu0 %3438, %v4028_v18  }
 0x1b9   : > { %1435 = vperm.xlu0 %3438, %v4033_v24  }
 0x1bd   : > { %3441 = vset.pattern.permute.xlu0 %v4845_v46 }
 0x1be   : > { %2209 = vperm.xlu0 %3441, %v4039_v32   ;;  %2126 = vrot.lane.b32.xlu1 %v3924_v19, %s3586_s29 }
 0x1c2   : > { %1777 = vperm.xlu0 %3441, %v4045_v38   ;;  %2071 = vrot.lane.b32.xlu1 %v3956_v31, %s3586_s29 }
 0x1c6   : > { %2271 = vperm.xlu0 %3441, %v4051_v48   ;;  %1814 = vperm.xlu1 %3434, %v3115_v56  }
 0x1ca   : > { %2435 = vperm.xlu0 %3441, %v4057_v62   ;;  %1965 = vperm.xlu1 %3434, %v3119_v7   ;;  %v1308_v7 = vmul.f32 8.0, %v1306_v57  ;;  %v1960_v57 = vmul.f32 4.0, %v1958_v5 }
 0x1ce   : > { %2493 = vperm.xlu0 %3441, %v4063_v9   ;;  %2023 = vperm.xlu1 %3434, %v3121_v12   ;;  %v3097_v12 = vadd.f32 -0.5, %v1308_v7 }
 0x1d2   : > { %3449 = vset.pattern.permute.xlu0 %v4846_v41  ;;  %3435 = vset.pattern.permute.xlu1 %v4845_v46 }
 0x1d3   : > { %1501 = vperm.xlu0 %3449, %v4066_v14   ;;  %1773 = vperm.xlu1 %3435, %v4071_v16  }
 0x1d7   : > { %1831 = vperm.xlu1 %3435, %v3115_v56  }
 0x1db   : > { %3437 = vset.pattern.permute.xlu1 %v4846_v41 }
 0x1dc   : > { %1314 = vperm.xlu1 %3437, %v3097_v12  }
 0x1e0   : > { %3439 = vset.pattern.permute.xlu1 %v4849_v36 }
 0x1e1   : > { %1331 = vperm.xlu1 %3439, %v3097_v12   ;;  %v4132_v12 = vadd.f32 -0.5, %v1960_v57 }
 0x1e2   : > { %v1138_v21 = vpop.xlane.xlu0 %1137 }
 0x1e3   : > { %v1142_v1 = vsub.f32 %v3973_v35, %v1138_v21  ;;  %v1307_v21 = vadd.f32 %v4006_v60, %v3983_v40  ;;  %v1609_v60 = vadd.f32 %v4078_v17, %v3948_v25 }
 0x1e5   : > { %v1144_v23 = vmul.f32 1.442695, %v1142_v1  ;;  %1392 = vperm.xlu1 %3439, %v4028_v18   ;;  %v2242_v18 = vadd.f32 %v4037_v28, %v3948_v25  ;;  %v1488_v28 = vadd.f32 %v1483_v8, %v3948_v25  ;;  %v4117_v8 = vpop.permute.xlu1 %1544  ;;  %v1309_v58 = vmul.f32 8.0, %v1307_v21 }
 0x1e6   : > { %v1200_v26 = vpop.xlane.xlu0 %1199  ;;  %v1549_v21 = vadd.f32 %v4117_v8, %v3983_v40 }
 0x1e7   : > { %3501 = vpow2.f32 %v1144_v23  ;;  %v1204_v27 = vsub.f32 %v3973_v35, %v1200_v26  ;;  %v2244_v45 = vmul.f32 4.0, %v2242_v18  ;;  %v1490_v59 = vmul.f32 8.0, %v1488_v28 }
 0x1e8   : > { %v1368_v23 = vadd.f32 %v4009_v0, %v3983_v40  ;;  %v2185_v0 = vadd.f32 %v4023_v13, %v3983_v40  ;;  %v1669_v18 = vadd.f32 %v4081_v20, %v3948_v25 }
 0x1e9   : > { %v1206_v29 = vmul.f32 1.442695, %v1204_v27  ;;  %1452 = vperm.xlu1 %3439, %v4033_v24   ;;  %v3133_v24 = vadd.f32 -0.5, %v2466_v44  ;;  %v4108_v61 = vadd.f32 -0.5, %v1490_v59  ;;  %v4130_v7 = vpop.permute.xlu1 %1605  ;;  %v3098_v27 = vadd.f32 -0.5, %v1309_v58 }
 0x1ea   : > { %v1115_v50 = vpop.xlane.xlu0 %1114  ;;  %v1611_v44 = vmul.f32 8.0, %v1609_v60 }
 0x1eb   : > { %3503 = vpow2.f32 %v1206_v29  ;;  %v1119_v47 = vsub.f32 %v3973_v35, %v1115_v50  ;;  %v1370_v29 = vmul.f32 8.0, %v1368_v23 }
 0x1ec   : > { %v4157_v50 = vadd.f32 -0.5, %v1611_v44 }
 0x1ed   : > { %3440 = vset.pattern.permute.xlu1 %v4848_v51  ;;  %v1121_v56 = vmul.f32 1.442695, %v1119_v47  ;;  %v4141_v26 = vpop.permute.xlu1 %1665  ;;  %v3100_v37 = vadd.f32 -0.5, %v1370_v29  ;;  %v1671_v47 = vmul.f32 8.0, %v1669_v18 }
 0x1ee   : > { %2192 = vperm.xlu1 %3440, %v4039_v32   ;;  %v4102_v32 = vadd.f32 -0.5, %v2244_v45  ;;  %v2187_v45 = vmul.f32 4.0, %v2185_v0  ;;  %v1670_v0 = vadd.f32 %v4141_v26, %v3983_v40 }
 0x1ef   : > { %3505 = vpow2.f32 %v1121_v56  ;;  %v4163_v59 = vadd.f32 -0.5, %v1671_v47 }
 0x1f0   : > { %v3126_v56 = vadd.f32 -0.5, %v2187_v45 }
 0x1f1   : > { %v4092_v42 = vpop.eup %3501  ;;  %v4146_v34 = vpop.permute.xlu1 %1246 }
 0x1f2   : > { %1150 = vrot.lane.b32.xlu0 %v4092_v42, %s3587_s8  ;;  %2414 = vperm.xlu1 %3440, %v3131_v43   ;;  %v4159_v28 = vpop.permute.xlu0 %1251 }
 0x1f5   : > { %v4098_v39 = vpop.eup %3503 }
 0x1f6   : > { %1212 = vrot.lane.b32.xlu0 %v4098_v39, %s4872_s10  ;;  %2472 = vperm.xlu1 %3440, %v3133_v24  }
 0x1f9   : > { %v4120_v10 = vpop.eup %3505 }
 0x1fa   : > { %3442 = vset.pattern.permute.xlu1 %v4845_v46  ;;  %v1125_v55 = vsel %vm1112_vm4, %v4120_v10, 0.0 }
 0x1fb   : > { %2267 = vperm.xlu1 %3442, %v4102_v32  }
 0x1ff   : > { %2431 = vperm.xlu1 %3442, %v3131_v43   ;;  %v1430_v43 = vmul.f32 8.0, %v1428_v30 }
 0x201   : > { %v3102_v6 = vadd.f32 -0.5, %v1430_v43 }
 0x203   : > { %2489 = vperm.xlu1 %3442, %v3133_v24   ;;  %v4155_v24 = vpop.permute.xlu1 %2124 }
 0x204   : > { %4873 = vst [vmem:[#allocation6_spill] sm:$0xff] %v4155_v24 }
 0x207   : > { %3443 = vset.pattern.permute.xlu1 %v4846_v41  ;;  %v1169_v17 = vpop.xlane.xlu1 %1168 }
 0x208   : > { %1496 = vperm.xlu1 %3443, %v4108_v61   ;;  %v1173_v13 = vsub.f32 %v3973_v35, %v1169_v17 }
 0x20a   : > { %v1175_v2 = vmul.f32 1.442695, %v1173_v13 }
 0x20b   : > { %v4167_v4 = vpop.permute.xlu1 %1273 }
 0x20c   : > { %3444 = vset.pattern.permute.xlu1 %v4848_v51  ;;  %3507 = vpow2.f32 %v1175_v2 }
 0x20d   : > { %1755 = vperm.xlu1 %3444, %v4045_v38   ;;  %v2018_v38 = vmul.f32 4.0, %v2016_v52 }
 0x20f   : > { %v4137_v1 = vadd.f32 -0.5, %v2018_v38 }
 0x211   : > { %3445 = vset.pattern.permute.xlu1 %v4845_v46 }
 0x212   : > { %1835 = vperm.xlu1 %3445, %v4122_v11  }
 0x215   : > { %1126 = vadd.xlane.f32.xlu0 %v1125_v55 }
 0x216   : > { %1986 = vperm.xlu1 %3445, %v4132_v12   ;;  %v4179_v38 = vpop.eup %3507 }
 0x21a   : > { %2044 = vperm.xlu1 %3445, %v4137_v1  }
 0x21e   : > { %3446 = vset.pattern.permute.xlu1 %v4846_v41 }
 0x21f   : > { %1319 = vperm.xlu1 %3446, %v3098_v27   ;;  %v1141_v20 = vpop.xlane.xlu0 %1140 }
 0x220   : > { %v1143_v5 = vsub.f32 %v3994_v53, %v1141_v20 }
 0x222   : > { %v1146_v57 = vmul.f32 1.442695, %v1143_v5 }
 0x223   : > { %1380 = vperm.xlu1 %3446, %v3100_v37  }
 0x224   : > { %3509 = vpow2.f32 %v1146_v57 }
 0x227   : > { %1440 = vperm.xlu1 %3446, %v3102_v6  }
 0x22b   : > { %1617 = vperm.xlu0 %3449, %v4157_v50   ;;  %3447 = vset.pattern.permute.xlu1 %v4848_v51 }
 0x22c   : > { %2197 = vperm.xlu1 %3447, %v3126_v56  }
 0x22e   : > { %v4189_v23 = vpop.eup %3509 }
 0x22f   : > { %1677 = vperm.xlu0 %3449, %v4163_v59  }
 0x230   : > { %2255 = vperm.xlu1 %3447, %v4051_v48   ;;  %v1548_v48 = vadd.f32 %v4068_v15, %v3948_v25  ;;  %v1610_v25 = vadd.f32 %v4130_v7, %v3983_v40  ;;  %v4195_v15 = vpop.permute.xlu0 %2128 }
 0x231   : > { %4875 = vst [vmem:[#allocation8_spill] sm:$0xff] %v4195_v15 }
 0x232   : > { %v1172_v35 = vpop.xlane.xlu1 %1171  ;;  %v1550_v58 = vmul.f32 8.0, %v1548_v48  ;;  %v1612_v43 = vmul.f32 8.0, %v1610_v25 }
 0x233   : > { %3451 = vset.pattern.permute.xlu0 %v4849_v36 }
 0x234   : > { %1269 = vperm.xlu0 %3451, %v3964_v33   ;;  %2477 = vperm.xlu1 %3447, %v4063_v9   ;;  %v1174_v33 = vsub.f32 %v3994_v53, %v1172_v35  ;;  %v3105_v60 = vadd.f32 -0.5, %v1550_v58  ;;  %v3108_v18 = vadd.f32 -0.5, %v1612_v43  ;;  %v4204_v45 = vpop.permute.xlu0 %1982 }
 0x236   : > { %v1203_v52 = vpop.xlane.xlu1 %1202  ;;  %v1177_v8 = vmul.f32 1.442695, %v1174_v33 }
 0x237   : > { %v1205_v29 = vsub.f32 %v3994_v53, %v1203_v52 }
 0x238   : > { %1335 = vperm.xlu0 %3451, %v3098_v27   ;;  %3448 = vset.pattern.permute.xlu1 %v4845_v46  ;;  %v1551_v27 = vmul.f32 8.0, %v1549_v21  ;;  %3511 = vpow2.f32 %v1177_v8  ;;  %v4208_v40 = vpop.permute.xlu0 %2040 }
 0x239   : > { %2213 = vperm.xlu1 %3448, %v3126_v56   ;;  %v1208_v7 = vmul.f32 1.442695, %v1205_v29 }
 0x23a   : > { %v4175_v55 = vpop.xlane.xlu1 %1117 }
 0x23b   : > { %3513 = vpow2.f32 %v1208_v7 }
 0x23c   : > { %1396 = vperm.xlu0 %3451, %v3100_v37   ;;  %v3106_v37 = vadd.f32 -0.5, %v1551_v27  ;;  %v4222_v20 = vpop.permute.xlu0 %1375 }
 0x23d   : > { %1181 = vrot.lane.b32.xlu1 %v4179_v38, %s3586_s29 }
 0x23e   : > { %v4186_v9 = vpop.permute.xlu1 %2126  ;;  %3450 = vset.pattern.permute.xlu1 %v4846_v41 }
 0x23f   : > { %4874 = vst [vmem:[#allocation7_spill] sm:$0xff] %v4186_v9 }
 0x240   : > { %1456 = vperm.xlu0 %3451, %v3102_v6   ;;  %v1672_v6 = vmul.f32 8.0, %v1670_v0  ;;  %v4229_v5 = vpop.permute.xlu0 %1435 }
 0x241   : > { %1152 = vrot.lane.b32.xlu1 %v4189_v23, %s3587_s8 }
 0x242   : > { %v2072_v30 = vpop.permute.xlu1 %2071  ;;  %v3110_v47 = vadd.f32 -0.5, %v1672_v6  ;;  %v4212_v17 = vpop.eup %3511 }
 0x243   : > { %3260 = vmatpush3.bf16.msra.mxu0 %v2072_v30 }
 0x244   : > { %1513 = vperm.xlu0 %3451, %v4108_v61   ;;  %3265 = vmatprep.subr.bf16.mxu0 %v4843_v3 }
 0x245   : > { %1556 = vperm.xlu1 %3450, %v3105_v60   ;;  %v4220_v13 = vpop.eup %3513 }
 0x246   : > { %v4202_v44 = vpop.permute.xlu1 %1814 }
 0x248   : > { %1577 = vperm.xlu0 %3451, %v3106_v37  }
 0x249   : > { %1561 = vperm.xlu1 %3450, %v3106_v37  }
 0x24a   : > { %v4206_v61 = vpop.permute.xlu1 %1965 }
 0x24c   : > { %1638 = vperm.xlu0 %3451, %v3108_v18  }
 0x24d   : > { %1622 = vperm.xlu1 %3450, %v3108_v18  }
 0x24e   : > { %v4210_v26 = vpop.permute.xlu1 %2023 }
 0x250   : > { %1698 = vperm.xlu0 %3451, %v3110_v47  }
 0x251   : > { %1183 = vrot.lane.b32.xlu1 %v4212_v17, %s3586_s29  ;;  %s4912_s29 = sld [smem:[#allocation43_spill]] }
 0x252   : > { %v4216_v56 = vpop.permute.xlu1 %1773 }
 0x254   : > { %3453 = vset.pattern.permute.xlu0 %v4848_v51 }
 0x255   : > { %1750 = vperm.xlu0 %3453, %v4071_v16   ;;  %1214 = vrot.lane.b32.xlu1 %v4220_v13, %s4872_s10  ;;  %v4237_v16 = vpop.permute.xlu0 %2209  ;;  %s3614_s10 = smov 16  }
 0x256   : > { %v4226_v2 = vpop.permute.xlu1 %1831 }
 0x259   : > { %1819 = vperm.xlu0 %3453, %v4122_v11   ;;  %1682 = vperm.xlu1 %3450, %v3110_v47   ;;  %v4244_v52 = vpop.permute.xlu0 %1777 }
 0x25b   : > { %v4231_v57 = vpop.permute.xlu1 %1314 }
 0x25d   : > { %1970 = vperm.xlu0 %3453, %v4132_v12   ;;  %3452 = vset.pattern.permute.xlu1 %v4849_v36 }
 0x25e   : > { %1517 = vperm.xlu1 %3452, %v4066_v14   ;;  %v4251_v14 = vpop.permute.xlu0 %2271 }
 0x260   : > { %v4239_v35 = vpop.permute.xlu1 %1331 }
 0x261   : > { %2028 = vperm.xlu0 %3453, %v4137_v1  }
 0x262   : > { %1573 = vperm.xlu1 %3452, %v3105_v60  }
 0x264   : > { %v4242_v11 = vpop.permute.xlu1 %1392 }
 0x265   : > { %2250 = vperm.xlu0 %3453, %v4102_v32   ;;  %v4258_v32 = vpop.permute.xlu0 %2435 }
 0x266   : > { %1634 = vperm.xlu1 %3452, %v4157_v50   ;;  %v1120_v50 = vsub.f32 %v3994_v53, %v4175_v55 }
 0x268   : > { %v4248_v12 = vpop.permute.xlu1 %1452 }
 0x269   : > { %2419 = vperm.xlu0 %3453, %v4057_v62   ;;  %v4264_v62 = vpop.permute.xlu0 %2493 }
 0x26a   : > { %1694 = vperm.xlu1 %3452, %v4163_v59   ;;  %v1123_v59 = vmul.f32 1.442695, %v1120_v50 }
 0x26c   : > { %3515 = vpow2.f32 %v1123_v59 }
 0x26d   : > { %v4253_v1 = vpop.permute.xlu1 %2192  ;;  %v4268_v58 = vpop.permute.xlu0 %1501 }
 0x26e   : > { %3454 = vset.pattern.permute.xlu1 %v4845_v46 }
 0x271   : > { %v4256_v48 = vpop.permute.xlu1 %2414  ;;  %v1151_v25 = vpop.permute.xlu0 %1150 }
 0x272   : > { %v1156_v29 = vsel %vm1112_vm4, %v1151_v25, 0.0 }
 0x275   : > { %v4260_v21 = vpop.permute.xlu1 %2472 }
 0x276   : > { %v4277_v60 = vpop.eup %3515 }
 0x277   : > { %v1128_v55 = vsel %vm1112_vm4, %v4277_v60, 0.0 }
 0x27a   : > { %v4266_v33 = vpop.permute.xlu1 %2267 }
 0x27e   : > { %v4270_v27 = vpop.permute.xlu1 %2431 }
 0x27f   : > { %4876 = vst [vmem:[#allocation9_spill] sm:$0xff] %v4270_v27 }
 0x282   : > { %v4272_v8 = vpop.permute.xlu1 %2489 }
 0x283   : > { %4877 = vst [vmem:[#allocation10_spill] sm:$0xff] %v4272_v8 }
 0x287   : > { %v4275_v30 = vpop.permute.xlu1 %1496 }
 0x288   : > { %1157 = vadd.xlane.f32.xlu0 %v1156_v29  ;;  %4878 = vst [vmem:[#allocation11_spill] sm:$0xff] %v4275_v30  ;;  %v1213_v29 = vpop.permute.xlu0 %1212 }
 0x289   : > { %v1218_v51 = vsel %vm1112_vm4, %v1213_v29, 0.0 }
 0x28c   : > { %v4279_v53 = vpop.permute.xlu1 %1755 }
 0x28e   : > { %1129 = vadd.xlane.f32.xlu1 %v1128_v55 }
 0x291   : > { %v4283_v37 = vpop.permute.xlu1 %1835 }
 0x295   : > { %v4285_v43 = vpop.permute.xlu1 %1986 }
 0x296   : > { %4879 = vst [vmem:[#allocation12_spill] sm:$0xff] %v4285_v43 }
 0x299   : > { %v4287_v0 = vpop.permute.xlu1 %2044 }
 0x29a   : > { %4880 = vst [vmem:[#allocation13_spill] sm:$0xff] %v4287_v0 }
 0x29e   : > { %v4289_v7 = vpop.permute.xlu1 %1319 }
 0x2a2   : > { %v4291_v18 = vpop.permute.xlu1 %1380  ;;  %v1127_v46 = vpop.xlane.xlu0 %1126 }
 0x2a3   : > { %4881 = vst [vmem:[#allocation14_spill] sm:$0xff] %v4291_v18  ;;  %3517 = vrcp.f32 %v1127_v46  ;;  %v4896_v46 = vmov 2  }
 0x2a6   : > { %v4293_v6 = vpop.permute.xlu1 %1440 }
 0x2a7   : > { %4882 = vst [vmem:[#allocation15_spill] sm:$0xff] %v4293_v6 }
 0x2aa   : > { %v4305_v36 = vpop.permute.xlu0 %1617 }
 0x2ab   : > { %v4295_v47 = vpop.permute.xlu1 %2197  ;;  %4887 = vst [vmem:[#allocation20_spill] sm:$0xff] %v4305_v36 }
 0x2ac   : > { %4883 = vst [vmem:[#allocation16_spill] sm:$0xff] %v4295_v47 }
 0x2af   : > { %v4297_v50 = vpop.permute.xlu1 %2255 }
 0x2b0   : > { %4884 = vst [vmem:[#allocation17_spill] sm:$0xff] %v4297_v50  ;;  %v4895_v50 = vmov 1  }
 0x2b3   : > { %v4299_v59 = vpop.permute.xlu1 %2477 }
 0x2b4   : > { %4885 = vst [vmem:[#allocation18_spill] sm:$0xff] %v4299_v59 }
 0x2b8   : > { %v4301_v25 = vpop.permute.xlu1 %2213 }
 0x2b9   : > { %4886 = vst [vmem:[#allocation19_spill] sm:$0xff] %v4301_v25  ;;  %v4312_v25 = vpop.permute.xlu0 %1677 }
 0x2ba   : > { %4890 = vst [vmem:[#allocation23_spill] sm:$0xff] %v4312_v25 }
 0x2bc   : > { %v1182_v55 = vpop.permute.xlu1 %1181 }
 0x2bd   : > { %v1187_v3 = vsel %vm1112_vm4, %v1182_v55, 0.0  ;;  %v4316_v55 = vpop.permute.xlu0 %1269 }
 0x2be   : > { %1188 = vadd.xlane.f32.xlu0 %v1187_v3 }
 0x2c0   : > { %v1153_v41 = vpop.permute.xlu1 %1152 }
 0x2c1   : > { %v1159_v9 = vsel %vm1112_vm4, %v1153_v41, 0.0  ;;  %v4319_v29 = vpop.permute.xlu0 %1335 }
 0x2c2   : > { %1219 = vadd.xlane.f32.xlu0 %v1218_v51 }
 0x2c4   : > { %v4307_v15 = vpop.permute.xlu1 %1556 }
 0x2c5   : > { %4888 = vst [vmem:[#allocation21_spill] sm:$0xff] %v4307_v15  ;;  %v4322_v41 = vpop.permute.xlu0 %1396 }
 0x2c6   : > { %1160 = vadd.xlane.f32.xlu0 %v1159_v9  ;;  %4892 = vst [vmem:[#allocation25_spill] sm:$0xff] %v4322_v41  ;;  %v3518_v9 = vpop.eup %3517 }
 0x2c7   : > { %v1133_v25 = vmul.f32 %v3518_v9, %v4120_v10 }
 0x2c8   : > { %v4310_v24 = vpop.permute.xlu1 %1561 }
 0x2c9   : > { %4889 = vst [vmem:[#allocation22_spill] sm:$0xff] %v4310_v24  ;;  %v4324_v24 = vpop.permute.xlu0 %1456 }
 0x2ca   : > { %4893 = vst [vmem:[#allocation26_spill] sm:$0xff] %v4324_v24 }
 0x2cc   : > { %v4314_v59 = vpop.permute.xlu1 %1622 }
 0x2cd   : > { %4891 = vst [vmem:[#allocation24_spill] sm:$0xff] %v4314_v59  ;;  %v4327_v59 = vpop.permute.xlu0 %1513 }
 0x2ce   : > { %4894 = vst [vmem:[#allocation27_spill] sm:$0xff] %v4327_v59 }
 0x2d0   : > { %v1184_v3 = vpop.permute.xlu1 %1183 }
 0x2d1   : > { %v1190_v54 = vsel %vm1112_vm4, %v1184_v3, 0.0  ;;  %v4898_v3 = vmov 0  }
 0x2d2   : > { %1191 = vadd.xlane.f32.xlu1 %v1190_v54  ;;  %v4331_v54 = vpop.permute.xlu0 %1577 }
 0x2d3   : > { %4897 = vst [vmem:[#allocation28_spill] sm:$0xff] %v4331_v54 }
 0x2d4   : > { %v1215_v51 = vpop.permute.xlu1 %1214 }
 0x2d5   : > { %v1221_v36 = vsel %vm1112_vm4, %v1215_v51, 0.0  ;;  %v4900_v51 = vmov 3  }
 0x2d6   : > { %1222 = vadd.xlane.f32.xlu0 %v1221_v36  ;;  %v4334_v36 = vpop.permute.xlu0 %1638 }
 0x2d7   : > { %4899 = vst [vmem:[#allocation29_spill] sm:$0xff] %v4334_v36 }
 0x2d8   : > { %v4341_v9 = vpop.permute.xlu1 %1682 }
 0x2d9   : > { %4902 = vst [vmem:[#allocation31_spill] sm:$0xff] %v4341_v9 }
 0x2da   : > { %v4337_v24 = vpop.permute.xlu0 %1698 }
 0x2db   : > { %4901 = vst [vmem:[#allocation30_spill] sm:$0xff] %v4337_v24 }
 0x2dd   : > { %v4345_v47 = vpop.permute.xlu1 %1517 }
 0x2de   : > { %v4339_v10 = vpop.permute.xlu0 %1750  ;;  %4903 = vst [vmem:[#allocation32_spill] sm:$0xff] %v4345_v47 }
 0x2e1   : > { %v4349_v54 = vpop.permute.xlu1 %1573 }
 0x2e2   : > { %v4343_v41 = vpop.permute.xlu0 %1819  ;;  %4904 = vst [vmem:[#allocation33_spill] sm:$0xff] %v4349_v54 }
 0x2e3   : > { %1847 = vperm.xlu1 %3454, %v1133_v25  }
 0x2e7   : > { %3456 = vset.pattern.permute.xlu1 %v4895_v50 }
 0x2e8   : > { %1347 = vperm.xlu1 %3456, %v1133_v25  }
 0x2ec   : > { %1789 = vperm.xlu0 %3453, %v1133_v25   ;;  %3457 = vset.pattern.permute.xlu1 %v4896_v46  ;;  %v4347_v46 = vpop.permute.xlu0 %1970 }
 0x2f0   : > { %3455 = vset.pattern.permute.xlu0 %v4898_v3  ;;  %v4351_v15 = vpop.permute.xlu0 %2028 }
 0x2f1   : > { %1286 = vperm.xlu0 %3455, %v1133_v25   ;;  %v4353_v25 = vpop.permute.xlu1 %1634 }
 0x2f2   : > { %4905 = vst [vmem:[#allocation34_spill] sm:$0xff] %v4353_v25 }
 0x2f4   : > { %v4355_v36 = vpop.permute.xlu0 %2250 }
 0x2f5   : > { %3458 = vset.pattern.permute.xlu0 %v4900_v51  ;;  %4906 = vst [vmem:[#allocation35_spill] sm:$0xff] %v4355_v36  ;;  %v4357_v51 = vpop.permute.xlu1 %1694  ;;  %v3600_v36 = vmov 7  }
 0x2f6   : > { %4907 = vst [vmem:[#allocation36_spill] sm:$0xff] %v4357_v51 }
 0x2f8   : > { %v4359_v59 = vpop.permute.xlu0 %2419 }
 0x2f9   : > { %4908 = vst [vmem:[#allocation37_spill] sm:$0xff] %v4359_v59 }
 0x315   : > { %v1158_v9 = vpop.xlane.xlu0 %1157 }
 0x31b   : > { %v1130_v24 = vpop.xlane.xlu1 %1129 }
 0x31c   : > { %3519 = vrcp.f32 %v1130_v24  ;;  %v3601_v24 = vmov 6  }
 0x31d   : > { %3521 = vrcp.f32 %v1158_v9  ;;  %v3602_v9 = vmov 4  }
 0x326   : > { %v3520_v6 = vpop.eup %3519 }
 0x327   : > { %v1134_v47 = vmul.f32 %v3520_v6, %v4277_v60  ;;  %v3522_v25 = vpop.eup %3521  ;;  %v3603_v60 = vmov 10   ;;  %v3604_v6 = vmov 5  }
 0x328   : > { %v1164_v51 = vmul.f32 %v3522_v25, %v4092_v42 }
 0x329   : > { %1851 = vperm.xlu0 %3458, %v1134_v47   ;;  %1793 = vperm.xlu1 %3457, %v1134_v47  }
 0x32d   : > { %3460 = vset.pattern.permute.xlu0 %v4895_v50  ;;  %3459 = vset.pattern.permute.xlu1 %v4898_v3  ;;  %v3605_v50 = vmov 11  }
 0x32e   : > { %1351 = vperm.xlu0 %3460, %v1134_v47   ;;  %1291 = vperm.xlu1 %3459, %v1134_v47  }
 0x332   : > { %3462 = vset.pattern.permute.xlu0 %v3600_v36  ;;  %3461 = vset.pattern.permute.xlu1 %v3601_v24 }
 0x333   : > { %2056 = vperm.xlu0 %3462, %v1164_v51   ;;  %1998 = vperm.xlu1 %3461, %v1164_v51  }
 0x337   : > { %3463 = vset.pattern.permute.xlu1 %v3602_v9  ;;  %3465 = vset.pattern.permute.xlu0 %v3603_v60 }
 0x338   : > { %1409 = vperm.xlu1 %3463, %v1164_v51  }
 0x33c   : > { %3464 = vset.pattern.permute.xlu1 %v3604_v6 }
 0x33d   : > { %1468 = vperm.xlu1 %3464, %v1164_v51   ;;  %v3606_v51 = vmov 14  }
 0x341   : > { %3466 = vset.pattern.permute.xlu1 %v3605_v50 }
 0x34b   : > { %v1189_v3 = vpop.xlane.xlu0 %1188 }
 0x34c   : > { %3523 = vrcp.f32 %v1189_v3 }
 0x34f   : > { %v1220_v47 = vpop.xlane.xlu0 %1219 }
 0x350   : > { %3525 = vrcp.f32 %v1220_v47  ;;  %v3607_v47 = vmov 15  }
 0x353   : > { %v1161_v42 = vpop.xlane.xlu0 %1160 }
 0x354   : > { %3527 = vrcp.f32 %v1161_v42 }
 0x356   : > { %v3524_v25 = vpop.eup %3523 }
 0x357   : > { %v1195_v59 = vmul.f32 %v3524_v25, %v4179_v38 }
 0x359   : > { %2225 = vperm.xlu0 %3465, %v1195_v59   ;;  %2283 = vperm.xlu1 %3466, %v1195_v59  }
 0x35a   : > { %v3526_v54 = vpop.eup %3525 }
 0x35b   : > { %v1226_v18 = vmul.f32 %v3526_v54, %v4098_v39 }
 0x35d   : > { %2519 = vrot.lane.b32.xlu0 %v3956_v31, %s3596_s3  ;;  %3467 = vset.pattern.permute.xlu1 %v3606_v51 }
 0x35e   : > { %2447 = vperm.xlu1 %3467, %v1226_v18   ;;  %3473 = vset.pattern.permute.xlu0 %v3602_v9  ;;  %v3528_v8 = vpop.eup %3527 }
 0x35f   : > { %v1192_v3 = vpop.xlane.xlu1 %1191  ;;  %v1165_v42 = vmul.f32 %v3528_v8, %v4189_v23  ;;  %v3608_v23 = vmov 8   ;;  %v3609_v8 = vmov 9  }
 0x360   : > { %3529 = vrcp.f32 %v1192_v3 }
 0x361   : > { %2344 = vrot.lane.b32.xlu0 %v3884_v49, %s3595_s26 }
 0x362   : > { %3468 = vset.pattern.permute.xlu1 %v3607_v47 }
 0x363   : > { %v1223_v38 = vpop.xlane.xlu0 %1222  ;;  %2505 = vperm.xlu1 %3468, %v1226_v18  }
 0x364   : > { %3531 = vrcp.f32 %v1223_v38 }
 0x365   : > { %1414 = vperm.xlu0 %3473, %v1165_v42  }
 0x367   : > { %3469 = vset.pattern.permute.xlu1 %v3601_v24 }
 0x368   : > { %2002 = vperm.xlu1 %3469, %v1165_v42  }
 0x369   : > { %3476 = vset.pattern.permute.xlu0 %v3605_v50 }
 0x36a   : > { %v3530_v39 = vpop.eup %3529 }
 0x36b   : > { %v1196_v54 = vmul.f32 %v3530_v39, %v4212_v17  ;;  %v3610_v17 = vmov 12  }
 0x36c   : > { %3470 = vset.pattern.permute.xlu1 %v3600_v36 }
 0x36d   : > { %2060 = vperm.xlu1 %3470, %v1165_v42   ;;  %2287 = vperm.xlu0 %3476, %v1196_v54  }
 0x36e   : > { %v3532_v9 = vpop.eup %3531 }
 0x36f   : > { %v1227_v25 = vmul.f32 %v3532_v9, %v4220_v13  ;;  %v4387_v13 = vld [vmem:[%s4909_s30] ss:$0 sm:$0xff]  ;;  %v1790_v9 = vpop.permute.xlu0 %1789 }
 0x370   : > { %v1254_v24 = vsub.f32 %v4387_v13, %v4146_v34 }
 0x371   : > { %2297 = vrot.lane.b32.xlu1 %v3956_v31, %s3595_s26  ;;  %3477 = vset.pattern.permute.xlu0 %v3606_v51  ;;  %v3611_v31 = vmov 13  }
 0x372   : > { %2451 = vperm.xlu0 %3477, %v1227_v25   ;;  %3471 = vset.pattern.permute.xlu1 %v3608_v23 }
 0x375   : > { %1530 = vperm.xlu1 %3471, %v1195_v59  }
 0x376   : > { %2566 = vrot.lane.b32.xlu0 %v3884_v49, %s3596_s3 }
 0x377   : > { %3481 = vset.pattern.permute.xlu0 %v3608_v23 }
 0x379   : > { %3472 = vset.pattern.permute.xlu1 %v3609_v8 }
 0x37a   : > { %1589 = vperm.xlu1 %3472, %v1195_v59   ;;  %1535 = vperm.xlu0 %3481, %v1196_v54   ;;  %v4392_v59 = vld [vmem:[%s4910_s25] ss:$0 sm:$0xff] }
 0x37b   : > { %v1758_v36 = vsub.f32 %v4392_v59, %v4339_v10  ;;  %v1759_v51 = vsub.f32 %v4392_v59, %v4279_v53 }
 0x37d   : > { %v1760_v3 = vand.u32 2147483647, %v1758_v36  ;;  %v1761_v23 = vand.u32 2147483647, %v1759_v51 }
 0x37e   : > { %3474 = vset.pattern.permute.xlu1 %v3604_v6  ;;  %3483 = vset.pattern.permute.xlu0 %v3610_v17  ;;  %v4408_v6 = vld [vmem:[%s4912_s29] ss:$0 sm:$0xff] }
 0x37f   : > { %1472 = vperm.xlu1 %3474, %v1165_v42   ;;  %1656 = vperm.xlu0 %3483, %v1227_v25  }
 0x383   : > { %3475 = vset.pattern.permute.xlu1 %v3603_v60  ;;  %2568 = vrot.lane.b32.xlu0 %v3894_v63, %s3596_s3  ;;  %v1822_v60 = vsub.f32 %v4392_v59, %v4202_v44  ;;  %v1823_v44 = vsub.f32 %v4392_v59, %v4343_v41  ;;  %v1848_v41 = vpop.permute.xlu1 %1847 }
 0x384   : > { %2229 = vperm.xlu1 %3475, %v1196_v54   ;;  %3500 = vset.pattern.permute.xlu0 %v3607_v47 }
 0x385   : > { %v1824_v42 = vand.u32 2147483647, %v1822_v60 }
 0x387   : > { %2570 = vrot.lane.b32.xlu0 %v3924_v19, %s3596_s3  ;;  %v1826_v60 = vsub.f32 1.0, %v1824_v42  ;;  %v1287_v42 = vpop.permute.xlu0 %1286 }
 0x388   : > { %3478 = vset.pattern.permute.xlu1 %v3607_v47  ;;  %v1256_v47 = vand.u32 2147483647, %v1254_v24 }
 0x389   : > { %2509 = vperm.xlu1 %3478, %v1227_v25  }
 0x38b   : > { %2572 = vrot.lane.b32.xlu0 %v3927_v22, %s3596_s3 }
 0x38d   : > { %3479 = vset.pattern.permute.xlu1 %v3610_v17  ;;  %v1825_v17 = vand.u32 2147483647, %v1823_v44 }
 0x38e   : > { %1651 = vperm.xlu1 %3479, %v1226_v18  }
 0x392   : > { %3480 = vset.pattern.permute.xlu1 %v3611_v31 }
 0x393   : > { %1710 = vperm.xlu1 %3480, %v1226_v18   ;;  %v4401_v18 = vld [vmem:[%s4911_s0] ss:$0 sm:$0xff] }
 0x394   : > { %v1781_v10 = vsub.f32 %v4401_v18, %v4244_v52  ;;  %v1780_v34 = vsub.f32 %v4401_v18, %v4216_v56  ;;  %v1838_v50 = vsub.f32 %v4401_v18, %v4226_v2  ;;  %v1839_v38 = vsub.f32 %v4401_v18, %v4283_v37 }
 0x395   : > { %v1255_v52 = vsub.f32 %v4387_v13, %v4159_v28  ;;  %v1277_v56 = vsub.f32 %v4408_v6, %v4167_v4  ;;  %v1338_v37 = vsub.f32 %v4408_v6, %v4239_v35  ;;  %v1258_v28 = vsub.f32 1.0, %v1256_v47 }
 0x396   : > { %v1783_v2 = vand.u32 2147483647, %v1781_v10  ;;  %v1782_v39 = vand.u32 2147483647, %v1780_v34  ;;  %v1840_v53 = vand.u32 2147483647, %v1838_v50  ;;  %v1323_v4 = vsub.f32 %v4387_v13, %v4289_v7 }
 0x397   : > { %3482 = vset.pattern.permute.xlu1 %v3609_v8  ;;  %v1762_v8 = vsub.f32 1.0, %v1760_v3  ;;  %v1257_v36 = vand.u32 2147483647, %v1255_v52  ;;  %v1279_v24 = vand.u32 2147483647, %v1277_v56  ;;  %v1763_v3 = vsub.f32 1.0, %v1761_v23  ;;  %v1348_v52 = vpop.permute.xlu1 %1347 }
 0x398   : > { %1593 = vperm.xlu1 %3482, %v1196_v54   ;;  %v1322_v54 = vsub.f32 %v4387_v13, %v4231_v57  ;;  %v1339_v57 = vsub.f32 %v4408_v6, %v4319_v29  ;;  %v1785_v35 = vsub.f32 1.0, %v1783_v2  ;;  %v1784_v10 = vsub.f32 1.0, %v1782_v39 }
 0x399   : > { %v1842_v34 = vsub.f32 1.0, %v1840_v53  ;;  %v1340_v51 = vand.u32 2147483647, %v1338_v37  ;;  %v1764_v44 = vmax.f32 %v1762_v8, 0.0  ;;  %v1827_v7 = vsub.f32 1.0, %v1825_v17 }
 0x39a   : > { %v1324_v50 = vand.u32 2147483647, %v1322_v54  ;;  %v1260_v56 = vmax.f32 %v1258_v28, 0.0  ;;  %v1259_v30 = vsub.f32 1.0, %v1257_v36  ;;  %v1341_v27 = vand.u32 2147483647, %v1339_v57 }
 0x39b   : > { %v1828_v29 = vmax.f32 %v1826_v60, 0.0  ;;  %v1796_v0 = vmul.f32 %v1790_v9, %v1764_v44  ;;  %v1281_v2 = vsub.f32 1.0, %v1279_v24  ;;  %v1787_v39 = vmax.f32 %v1785_v35, 0.0 }
 0x39c   : > { %3484 = vset.pattern.permute.xlu1 %v3611_v31  ;;  %v1841_v31 = vand.u32 2147483647, %v1839_v38  ;;  %v1325_v38 = vand.u32 2147483647, %v1323_v4  ;;  %v1786_v53 = vmax.f32 %v1784_v10, 0.0  ;;  %v1326_v54 = vsub.f32 1.0, %v1324_v50 }
 0x39d   : > { %1714 = vperm.xlu1 %3484, %v1227_v25   ;;  %v1276_v25 = vsub.f32 %v4408_v6, %v4316_v55  ;;  %v1844_v37 = vmax.f32 %v1842_v34, 0.0  ;;  %v1829_v23 = vmax.f32 %v1827_v7, 0.0  ;;  %v1854_v8 = vmul.f32 %v1848_v41, %v1828_v29 }
 0x39e   : > { %v1843_v47 = vsub.f32 1.0, %v1841_v31  ;;  %v1765_v17 = vmax.f32 %v1763_v3, 0.0  ;;  %v1342_v31 = vsub.f32 1.0, %v1340_v51  ;;  %v1343_v57 = vsub.f32 1.0, %v1341_v27 }
 0x39f   : > { %v1278_v55 = vand.u32 2147483647, %v1276_v25  ;;  %v1327_v25 = vsub.f32 1.0, %v1325_v38  ;;  %v1798_v60 = vmul.f32 %v1796_v0, %v1786_v53  ;;  %v1328_v24 = vmax.f32 %v1326_v54, 0.0 }
 0x3a0   : > { %v1845_v4 = vmax.f32 %v1843_v47, 0.0  ;;  %v1294_v35 = vmul.f32 %v1287_v42, %v1260_v56  ;;  %v1856_v10 = vmul.f32 %v1854_v8, %v1844_v37  ;;  %v1261_v41 = vmax.f32 %v1259_v30, 0.0 }
 0x3a1   : > { %2346 = vrot.lane.b32.xlu1 %v3894_v63, %s3595_s26  ;;  %v1280_v28 = vsub.f32 1.0, %v1278_v55  ;;  %v1283_v3 = vmax.f32 %v1281_v2, 0.0  ;;  %v1354_v7 = vmul.f32 %v1348_v52, %v1328_v24  ;;  %v1329_v47 = vmax.f32 %v1327_v25, 0.0 }
 0x3a2   : > { %v1344_v38 = vmax.f32 %v1342_v31, 0.0  ;;  %v1345_v55 = vmax.f32 %v1343_v57, 0.0  ;;  %v1858_v29 = vadd.f32 %v1856_v10, %v1798_v60  ;;  %v4913_v52 = vmov 0.0  }
 0x3a3   : > { %v1282_v51 = vmax.f32 %v1280_v28, 0.0  ;;  %v1443_v31 = vsub.f32 %v4387_v13, %v4229_v5  ;;  %v2439_v5 = vsub.f32 %v4401_v18, %v4258_v32 }
 0x3a4   : > { %v1356_v56 = vmul.f32 %v1354_v7, %v1344_v38 }
 0x3a5   : > { %2348 = vrot.lane.b32.xlu1 %v3924_v19, %s3595_s26  ;;  %v1296_v53 = vmul.f32 %v1294_v35, %v1282_v51  ;;  %v1445_v57 = vand.u32 2147483647, %v1443_v31  ;;  %v1505_v51 = vsub.f32 %v4387_v13, %v4268_v58  ;;  %v2200_v58 = vsub.f32 %v4392_v59, %v4253_v1 }
 0x3a7   : > { %v1358_v30 = vadd.f32 %v1356_v56, %v1296_v53  ;;  %v1447_v10 = vsub.f32 1.0, %v1445_v57  ;;  %v4916_v57 = vld [vmem:[#allocation9_spill] sm:$0xff] }
 0x3a8   : > { %v1852_v43 = vpop.permute.xlu0 %1851  ;;  %v1794_v36 = vpop.permute.xlu1 %1793 }
 0x3a9   : > { %v1855_v9 = vmul.f32 %v1852_v43, %v1829_v23  ;;  %v1797_v44 = vmul.f32 %v1794_v36, %v1765_v17  ;;  %2350 = vrot.lane.b32.xlu1 %v3927_v22, %s3595_s26  ;;  %v2275_v36 = vsub.f32 %v4401_v18, %v4251_v14  ;;  %s3612_s26 = smov 8  }
 0x3ab   : > { %v1857_v34 = vmul.f32 %v1855_v9, %v1845_v4  ;;  %v1799_v50 = vmul.f32 %v1797_v44, %v1787_v39  ;;  %v2216_v4 = vsub.f32 %v4401_v18, %v4237_v16  ;;  %v2277_v24 = vand.u32 2147483647, %v2275_v36 }
 0x3ac   : > { %v1973_v16 = vsub.f32 %v4392_v59, %v4206_v61  ;;  %v1399_v61 = vsub.f32 %v4408_v6, %v4242_v11 }
 0x3ad   : > { %v1859_v27 = vadd.f32 %v1857_v34, %v1799_v50  ;;  %v1352_v0 = vpop.permute.xlu0 %1351  ;;  %v1292_v43 = vpop.permute.xlu1 %1291  ;;  %v2218_v60 = vand.u32 2147483647, %v2216_v4  ;;  %v2279_v32 = vsub.f32 1.0, %v2277_v24 }
 0x3ae   : > { %v1355_v23 = vmul.f32 %v1352_v0, %v1329_v47  ;;  %v1295_v17 = vmul.f32 %v1292_v43, %v1261_v41  ;;  %v2441_v47 = vand.u32 2147483647, %v2439_v5  ;;  %v1975_v38 = vand.u32 2147483647, %v1973_v16 }
 0x3af   : > { %v1860_v54 = vpack.c.bf16 %v1859_v27, %v1858_v29  ;;  %v2220_v34 = vsub.f32 1.0, %v2218_v60  ;;  %v1459_v29 = vsub.f32 %v4408_v6, %v4248_v12  ;;  %v2422_v0 = vsub.f32 %v4392_v59, %v4256_v48 }
 0x3b0   : > { %v1357_v42 = vmul.f32 %v1355_v23, %v1345_v55  ;;  %v1297_v37 = vmul.f32 %v1295_v17, %v1283_v3  ;;  %v2031_v3 = vsub.f32 %v4392_v59, %v4210_v26  ;;  %v2497_v55 = vsub.f32 %v4401_v18, %v4264_v62 }
 0x3b1   : > { %3244 = vmatmul.mubr.msk.bf16.vlgmr.msra.gmra.mrb[8].mxu1 %vm1861_vm6, %v1860_v54  ;;  %v4500_v26 = vmax.f32 %v2220_v34, 0.0  ;;  %v4506_v43 = vmax.f32 %v1447_v10, 0.0  ;;  %v1507_v23 = vand.u32 2147483647, %v1505_v51  ;;  %v2480_v62 = vsub.f32 %v4392_v59, %v4260_v21 }
 0x3b2   : > { %v1359_v2 = vadd.f32 %v1357_v42, %v1297_v37  ;;  %3248 = vmatpush3.bf16.msra.mxu1 %v3884_v49  ;;  %3255 = vmatprep.mubr.msk.bf16.mxu1 %vm3584_vm0, %v4913_v52  ;;  %v4456_v49 = vpop.permute.xlu1 %1998  ;;  %v2033_v53 = vand.u32 2147483647, %v2031_v3  ;;  %v1974_v12 = vsub.f32 %v4392_v59, %v4347_v46  ;;  %v4516_v54 = vmax.f32 %v2279_v32, 0.0 }
 0x3b3   : > { %3249 = vmatprep.subr.bf16.mxu1 %v4913_v52  ;;  %v2443_v1 = vsub.f32 1.0, %v2441_v47  ;;  %v1401_v56 = vand.u32 2147483647, %v1399_v61  ;;  %v2274_v48 = vsub.f32 %v4401_v18, %v4266_v33  ;;  %v1977_v42 = vsub.f32 1.0, %v1975_v38 }
 0x3b4   : > { %v1360_v39 = vpack.c.bf16 %v1359_v2, %v1358_v30  ;;  %v4520_v37 = vand.u32 2147483647, %v2497_v55  ;;  %v1461_v30 = vand.u32 2147483647, %v1459_v29  ;;  %v2032_v2 = vsub.f32 %v4392_v59, %v4351_v15 }
 0x3b5   : > { %v2202_v21 = vand.u32 2147483647, %v2200_v58  ;;  %v2035_v31 = vsub.f32 1.0, %v2033_v53  ;;  %v1509_v4 = vsub.f32 1.0, %v1507_v23  ;;  %v4528_v33 = vmax.f32 %v2443_v1, 0.0  ;;  %v4918_v58 = vld [vmem:[#allocation11_spill] sm:$0xff] }
 0x3b6   : > { %3250 = vmatpush3.bf16.msra.mxu1 %v3894_v63  ;;  %v1989_v63 = vsub.f32 %v4401_v18, %v4204_v45  ;;  %v1403_v36 = vsub.f32 1.0, %v1401_v56  ;;  %v2438_v60 = vsub.f32 %v4401_v18, %v4916_v57  ;;  %v1463_v24 = vsub.f32 1.0, %v1461_v30  ;;  %v4919_v23 = vld [vmem:[#allocation10_spill] sm:$0xff] }
 0x3b7   : > { %3251 = vmatprep.subr.bf16.mxu1 %v4913_v52  ;;  %v4462_v8 = vpop.permute.xlu1 %1409  ;;  %v2034_v5 = vand.u32 2147483647, %v2032_v2  ;;  %v2204_v16 = vsub.f32 1.0, %v2202_v21  ;;  %v4537_v51 = vmax.f32 %v1509_v4, 0.0  ;;  %v2037_v61 = vmax.f32 %v2035_v31, 0.0 }
 0x3b8   : > { %v1991_v25 = vand.u32 2147483647, %v1989_v63  ;;  %v4914_v63 = vld [vmem:[#allocation12_spill] sm:$0xff]  ;;  %v4539_v38 = vmax.f32 %v1403_v36, 0.0  ;;  %v4541_v29 = vand.u32 2147483647, %v2438_v60 }
 0x3b9   : > { %v1990_v46 = vsub.f32 %v4401_v18, %v4914_v63  ;;  %v4545_v53 = vmax.f32 %v1463_v24, 0.0  ;;  %v2036_v56 = vsub.f32 1.0, %v2034_v5  ;;  %v4551_v2 = vmax.f32 %v2204_v16, 0.0 }
 0x3ba   : > { %3252 = vmatpush3.bf16.msra.mxu1 %v3924_v19  ;;  %v2047_v19 = vsub.f32 %v4401_v18, %v4208_v40  ;;  %v4472_v40 = vpop.permute.xlu0 %2056  ;;  %v1993_v44 = vsub.f32 1.0, %v1991_v25  ;;  %v2482_v25 = vand.u32 2147483647, %v2480_v62  ;;  %v2496_v62 = vsub.f32 %v4401_v18, %v4919_v23 }
 0x3bb   : > { %3253 = vmatprep.subr.bf16.mxu1 %v4913_v52  ;;  %v1992_v34 = vand.u32 2147483647, %v1990_v46  ;;  %v2063_v46 = vmul.f32 %v4472_v40, %v2037_v61  ;;  %v2038_v60 = vmax.f32 %v2036_v56, 0.0  ;;  %v4922_v40 = vld [vmem:[#allocation27_spill] sm:$0xff] }
 0x3bc   : > { %v2049_v28 = vand.u32 2147483647, %v2047_v19  ;;  %v4474_v9 = vpop.permute.xlu1 %1468  ;;  %v4484_v41 = vmax.f32 %v1993_v44, 0.0  ;;  %v4915_v19 = vld [vmem:[#allocation13_spill] sm:$0xff]  ;;  %v2484_v32 = vsub.f32 1.0, %v2482_v25 }
 0x3be   : > { %3254 = vmatpush3.bf16.msra.mxu1 %v3927_v22  ;;  %v1383_v22 = vsub.f32 %v4387_v13, %v4222_v20  ;;  %v2051_v20 = vsub.f32 1.0, %v2049_v28  ;;  %v1976_v28 = vand.u32 2147483647, %v1974_v12  ;;  %v4920_v12 = vld [vmem:[#allocation14_spill] sm:$0xff] }
 0x3bf   : > { %3277 = vmatprep.subr.bf16.mxu1 %v4913_v52  ;;  %v1384_v1 = vsub.f32 %v4387_v13, %v4920_v12 }
 0x3c0   : > { %v1385_v45 = vand.u32 2147483647, %v1383_v22  ;;  %v4490_v7 = vmax.f32 %v2051_v20, 0.0  ;;  %v2048_v22 = vsub.f32 %v4401_v18, %v4915_v19  ;;  %v1978_v47 = vsub.f32 1.0, %v1976_v28  ;;  %v4921_v28 = vld [vmem:[#allocation15_spill] sm:$0xff] }
 0x3c1   : > { %3256 = vmatmul.mubr.msk.bf16.vlgmr.msra.gmra.mrb[8].mxu1 %vm1906_vm7, %v1360_v39  ;;  %v2424_v39 = vand.u32 2147483647, %v2422_v0  ;;  %v1504_v0 = vsub.f32 %v4387_v13, %v4918_v58  ;;  %v1444_v36 = vsub.f32 %v4387_v13, %v4921_v28  ;;  %v1386_v57 = vand.u32 2147483647, %v1384_v1  ;;  %v4926_v1 = vld [vmem:[#allocation33_spill] sm:$0xff] }
 0x3c2   : > { %3279 = vmatprep.mubr.msk.bf16.mxu1 %vm3584_vm0, %v4913_v52  ;;  %v1387_v35 = vsub.f32 1.0, %v1385_v45  ;;  %v2276_v45 = vand.u32 2147483647, %v2274_v48  ;;  %v2050_v3 = vand.u32 2147483647, %v2048_v22  ;;  %v1980_v63 = vmax.f32 %v1978_v47, 0.0 }
 0x3c3   : > { %v2426_v10 = vsub.f32 1.0, %v2424_v39  ;;  %v4559_v22 = vmax.f32 %v2484_v32, 0.0  ;;  %v1506_v25 = vand.u32 2147483647, %v1504_v0  ;;  %v4924_v32 = vld [vmem:[#allocation32_spill] sm:$0xff]  ;;  %v2065_v61 = vmul.f32 %v2063_v46, %v4490_v7  ;;  %v4929_v46 = vld [vmem:[#allocation26_spill] sm:$0xff] }
 0x3c4   : > { %v4498_v27 = vmax.f32 %v1387_v35, 0.0  ;;  %v1979_v35 = vmax.f32 %v1977_v42, 0.0  ;;  %v2278_v55 = vsub.f32 1.0, %v2276_v45  ;;  %v1994_v42 = vsub.f32 1.0, %v1992_v34 }
 0x3c5   : > { %v2052_v30 = vsub.f32 1.0, %v2050_v3  ;;  %v4553_v21 = vmax.f32 %v2426_v10, 0.0  ;;  %v4566_v45 = vand.u32 2147483647, %v2496_v62  ;;  %v1521_v47 = vsub.f32 %v4408_v6, %v4924_v32  ;;  %v4925_v62 = vld [vmem:[#allocation16_spill] sm:$0xff] }
 0x3c6   : > { %v2005_v19 = vmul.f32 %v4456_v49, %v1979_v35  ;;  %v4561_v31 = vmax.f32 %v2278_v55, 0.0  ;;  %v1996_v5 = vmax.f32 %v1994_v42, 0.0  ;;  %v1520_v49 = vsub.f32 %v4408_v6, %v4922_v40  ;;  %v4923_v35 = vld [vmem:[#allocation21_spill] sm:$0xff] }
 0x3c7   : > { %v2054_v16 = vmax.f32 %v2052_v30, 0.0  ;;  %v1564_v10 = vsub.f32 %v4387_v13, %v4923_v35  ;;  %v1508_v0 = vsub.f32 1.0, %v1506_v25  ;;  %v1446_v23 = vand.u32 2147483647, %v1444_v36  ;;  %v4927_v42 = vld [vmem:[#allocation17_spill] sm:$0xff] }
 0x3c8   : > { %v2007_v55 = vmul.f32 %v2005_v19, %v4484_v41  ;;  %v2201_v12 = vsub.f32 %v4392_v59, %v4925_v62  ;;  %v1580_v56 = vsub.f32 %v4408_v6, %v4926_v1  ;;  %v2259_v30 = vsub.f32 %v4392_v59, %v4927_v42  ;;  %v4928_v40 = vld [vmem:[#allocation25_spill] sm:$0xff] }
 0x3c9   : > { %v1400_v7 = vsub.f32 %v4408_v6, %v4928_v40  ;;  %v1460_v41 = vsub.f32 %v4408_v6, %v4929_v46  ;;  %v1522_v19 = vand.u32 2147483647, %v1520_v49  ;;  %v1566_v25 = vand.u32 2147483647, %v1564_v10  ;;  %v4932_v10 = vld [vmem:[#allocation29_spill] sm:$0xff] }
 0x3ca   : > { %v2067_v32 = vadd.f32 %v2065_v61, %v2007_v55  ;;  %v2261_v49 = vand.u32 2147483647, %v2259_v30  ;;  %v1642_v42 = vsub.f32 %v4408_v6, %v4932_v10  ;;  %v4933_v61 = vld [vmem:[#allocation20_spill] sm:$0xff] }
 0x3cb   : > { %v1462_v46 = vand.u32 2147483647, %v1460_v41 }
 0x3d8   : > { %v4480_v14 = vpop.permute.xlu0 %2225  ;;  %v4482_v50 = vpop.permute.xlu1 %2283 }
 0x3dc   : > { %v4508_v11 = vpop.permute.xlu0 %2519 }
 0x3dd   : > { %v4514_v17 = vpop.permute.xlu1 %2447 }
 0x3e0   : > { %v4532_v15 = vpop.permute.xlu0 %2344 }
 0x3e1   : > { %4917 = vst [vmem:[#allocation12_spill] sm:$0xff] %v4532_v15 }
 0x3e2   : > { %v4534_v44 = vpop.permute.xlu1 %2505 }
 0x3e4   : > { %v4555_v39 = vpop.permute.xlu0 %1414 }
 0x3e7   : > { %v2003_v48 = vpop.permute.xlu1 %2002 }
 0x3e8   : > { %v2006_v24 = vmul.f32 %v2003_v48, %v1980_v63  ;;  %v1388_v48 = vsub.f32 1.0, %v1386_v57 }
 0x3ea   : > { %v2008_v63 = vmul.f32 %v2006_v24, %v1996_v5  ;;  %v1448_v24 = vsub.f32 1.0, %v1446_v23  ;;  %v4592_v5 = vand.u32 2147483647, %v2201_v12  ;;  %v1390_v23 = vmax.f32 %v1388_v48, 0.0 }
 0x3eb   : > { %v2263_v48 = vsub.f32 1.0, %v2261_v49 }
 0x3ec   : > { %v4572_v34 = vpop.permute.xlu0 %2287  ;;  %v2061_v3 = vpop.permute.xlu1 %2060  ;;  %v1450_v30 = vmax.f32 %v1448_v24, 0.0  ;;  %v2205_v10 = vsub.f32 1.0, %v4592_v5  ;;  %v4938_v5 = vld [vmem:[#allocation37_spill] sm:$0xff] }
 0x3ed   : > { %v2064_v58 = vmul.f32 %v2061_v3, %v2038_v60  ;;  %v4930_v60 = vld [vmem:[#allocation24_spill] sm:$0xff]  ;;  %v1523_v3 = vand.u32 2147483647, %v1521_v47  ;;  %v1510_v47 = vmax.f32 %v1508_v0, 0.0 }
 0x3ee   : > { %v1626_v35 = vsub.f32 %v4387_v13, %v4930_v60 }
 0x3ef   : > { %v2066_v28 = vmul.f32 %v2064_v58, %v2054_v16  ;;  %v1582_v16 = vand.u32 2147483647, %v1580_v56  ;;  %v4931_v58 = vld [vmem:[#allocation35_spill] sm:$0xff]  ;;  %v1524_v56 = vsub.f32 1.0, %v1522_v19  ;;  %v1525_v60 = vsub.f32 1.0, %v1523_v3 }
 0x3f0   : > { %v2298_v36 = vpop.permute.xlu1 %2297  ;;  %v2258_v1 = vsub.f32 %v4392_v59, %v4931_v58  ;;  %v4937_v19 = vld [vmem:[#allocation19_spill] sm:$0xff] }
 0x3f1   : > { %v2068_v57 = vadd.f32 %v2066_v28, %v2008_v63  ;;  %v4590_v62 = vpop.permute.xlu0 %2451  ;;  %3278 = vmatpush3.bf16.msra.mxu1 %v2298_v36  ;;  %v1402_v63 = vand.u32 2147483647, %v1400_v7  ;;  %v1568_v28 = vsub.f32 1.0, %v1566_v25  ;;  %v1628_v36 = vand.u32 2147483647, %v1626_v35  ;;  %v4936_v7 = vld [vmem:[#allocation18_spill] sm:$0xff] }
 0x3f2   : > { %3283 = vmatprep.subr.bf16.mxu1 %v4913_v52  ;;  %v2260_v0 = vand.u32 2147483647, %v2258_v1  ;;  %v2481_v41 = vsub.f32 %v4392_v59, %v4936_v7  ;;  %v2217_v25 = vsub.f32 %v4401_v18, %v4937_v19  ;;  %v1644_v35 = vand.u32 2147483647, %v1642_v42  ;;  %v4939_v18 = vld [vmem:[#allocation6_spill] sm:$0xff] }
 0x3f3   : > { %v2069_v40 = vpack.c.bf16 %v2068_v57, %v2067_v32  ;;  %v1584_v32 = vsub.f32 1.0, %v1582_v16  ;;  %v4935_v57 = vld [vmem:[#allocation5_spill] sm:$0xff]  ;;  %v1404_v3 = vsub.f32 1.0, %v1402_v63  ;;  %v1570_v24 = vmax.f32 %v1568_v28, 0.0 }
 0x3f4   : > { %v1531_v12 = vpop.permute.xlu1 %1530  ;;  %v2423_v16 = vsub.f32 %v4392_v59, %v4938_v5  ;;  %v1630_v4 = vsub.f32 1.0, %v1628_v36  ;;  %v1527_v20 = vmax.f32 %v1525_v60, 0.0  ;;  %v2262_v7 = vsub.f32 1.0, %v2260_v0 }
 0x3f5   : > { %v4601_v58 = vpop.permute.xlu0 %2566  ;;  %3262 = vmatmul.mubr.msk.bf16.vlgmr.msra.gmra.mrb[20].mxu0 %vm1861_vm6, %v2069_v40  ;;  %v1538_v1 = vmul.f32 %v1531_v12, %v1510_v47  ;;  %v1464_v40 = vsub.f32 1.0, %v1462_v46  ;;  %v2265_v19 = vmax.f32 %v2263_v48, 0.0  ;;  %v2219_v63 = vand.u32 2147483647, %v2217_v25 }
 0x3f6   : > { %4934 = vst [vmem:[#allocation13_spill] sm:$0xff] %v4601_v58  ;;  %3266 = vmatpush3.bf16.msra.mxu0 %v4935_v57  ;;  %3273 = vmatprep.mubr.msk.bf16.mxu0 %vm3584_vm0, %v4913_v52  ;;  %v1526_v57 = vmax.f32 %v1524_v56, 0.0  ;;  %v1586_v58 = vmax.f32 %v1584_v32, 0.0  ;;  %v1646_v28 = vsub.f32 1.0, %v1644_v35  ;;  %v1475_v59 = vmul.f32 %v4474_v9, %v4506_v43  ;;  %v4940_v9 = vld [vmem:[#allocation7_spill] sm:$0xff] }
 0x3f7   : > { %3267 = vmatprep.subr.bf16.mxu0 %v4913_v52  ;;  %v2425_v47 = vand.u32 2147483647, %v2423_v16  ;;  %v2483_v36 = vand.u32 2147483647, %v2481_v41  ;;  %v1632_v60 = vmax.f32 %v1630_v4, 0.0  ;;  %v1406_v32 = vmax.f32 %v1404_v3, 0.0 }
 0x3f8   : > { %v1540_v12 = vmul.f32 %v1538_v1, %v1526_v57  ;;  %v1466_v0 = vmax.f32 %v1464_v40, 0.0  ;;  %v2264_v48 = vmax.f32 %v2262_v7, 0.0  ;;  %v2221_v4 = vsub.f32 1.0, %v2219_v63  ;;  %v4941_v1 = vld [vmem:[#allocation34_spill] sm:$0xff]  ;;  %v4942_v57 = vld [vmem:[#allocation8_spill] sm:$0xff]  ;;  %v4944_v63 = vld [vmem:[#allocation23_spill] sm:$0xff] }
 0x3f9   : > { %v1536_v49 = vpop.permute.xlu0 %1535  ;;  %v1590_v55 = vpop.permute.xlu1 %1589  ;;  %v2500_v16 = vsub.f32 1.0, %v4566_v45  ;;  %v2291_v40 = vmul.f32 %v4572_v34, %v2265_v19  ;;  %v1685_v34 = vsub.f32 %v4387_v13, %v4944_v63 }
 0x3fa   : > { %v1539_v15 = vmul.f32 %v1536_v49, %v4537_v51  ;;  %3268 = vmatpush3.bf16.msra.mxu0 %v4939_v18  ;;  %v1596_v42 = vmul.f32 %v1590_v55, %v1570_v24  ;;  %v1417_v51 = vmul.f32 %v4462_v8, %v4498_v27  ;;  %v1418_v55 = vmul.f32 %v4555_v39, %v1390_v23 }
 0x3fb   : > { %3269 = vmatprep.subr.bf16.mxu0 %v4913_v52  ;;  %v1648_v24 = vmax.f32 %v1646_v28, 0.0  ;;  %v2427_v8 = vsub.f32 1.0, %v2425_v47  ;;  %v2232_v27 = vmul.f32 %v4480_v14, %v4551_v2  ;;  %v2290_v39 = vmul.f32 %v4482_v50, %v2264_v48 }
 0x3fc   : > { %v4620_v46 = vmul.f32 %v1539_v15, %v1527_v20  ;;  %v1598_v56 = vmul.f32 %v1596_v42, %v1586_v58  ;;  %v1477_v15 = vmul.f32 %v1475_v59, %v4545_v53  ;;  %v1419_v23 = vmul.f32 %v1417_v51, %v4539_v38 }
 0x3fd   : > { %v1420_v41 = vmul.f32 %v1418_v55, %v1406_v32  ;;  %v2207_v53 = vmax.f32 %v2205_v10, 0.0  ;;  %v4943_v14 = vsub.f32 %v4387_v13, %v4933_v61  ;;  %v2485_v2 = vsub.f32 1.0, %v2483_v36 }
 0x3fe   : > { %v4625_v25 = vadd.f32 %v1598_v56, %v1540_v12  ;;  %3270 = vmatpush3.bf16.msra.mxu0 %v4940_v9  ;;  %v1657_v43 = vpop.permute.xlu0 %1656  ;;  %v1473_v35 = vpop.permute.xlu1 %1472  ;;  %v1479_v38 = vadd.f32 %v1477_v15, %v1419_v23  ;;  %v2223_v18 = vmax.f32 %v2221_v4, 0.0  ;;  %v2234_v45 = vmul.f32 %v2232_v27, %v4500_v26 }
 0x3ff   : > { %v1660_v20 = vmul.f32 %v1657_v43, %v1632_v60  ;;  %v1476_v58 = vmul.f32 %v1473_v35, %v1450_v30  ;;  %3271 = vmatprep.subr.bf16.mxu0 %v4913_v52  ;;  %v1641_v30 = vsub.f32 %v4408_v6, %v4941_v1  ;;  %v1627_v50 = vand.u32 2147483647, %v4943_v14  ;;  %v4945_v60 = vld [vmem:[#allocation36_spill] sm:$0xff]  ;;  %v4948_v43 = vld [vmem:[#allocation22_spill] sm:$0xff] }
 0x400   : > { %v2292_v10 = vmul.f32 %v2290_v39, %v4561_v31  ;;  %v2429_v19 = vmax.f32 %v2427_v8, 0.0  ;;  %v2512_v61 = vmul.f32 %v4534_v44, %v4559_v22  ;;  %v2502_v59 = vmax.f32 %v2500_v16, 0.0  ;;  %v4949_v8 = vld [vmem:[#allocation28_spill] sm:$0xff] }
 0x401   : > { %v4634_v3 = vmul.f32 %v1660_v20, %v1648_v24  ;;  %v1478_v5 = vmul.f32 %v1476_v58, %v1466_v0  ;;  %v1643_v47 = vand.u32 2147483647, %v1641_v30  ;;  %v2293_v12 = vmul.f32 %v2291_v40, %v4516_v54 }
 0x402   : > { %3272 = vmatpush3.bf16.msra.mxu0 %v4942_v57  ;;  %v2487_v36 = vmax.f32 %v2485_v2, 0.0  ;;  %v1701_v26 = vsub.f32 %v4408_v6, %v4945_v60  ;;  %v2454_v31 = vmul.f32 %v4514_v17, %v4553_v21  ;;  %v2455_v51 = vmul.f32 %v4590_v62, %v2429_v19 }
 0x403   : > { %v1480_v49 = vadd.f32 %v1478_v5, %v1420_v41  ;;  %v2230_v7 = vpop.permute.xlu1 %2229  ;;  %3295 = vmatprep.subr.bf16.mxu0 %v4913_v52  ;;  %v4946_v55 = vsub.f32 1.0, %v4520_v37  ;;  %v1629_v22 = vsub.f32 1.0, %v1627_v50  ;;  %v2294_v32 = vadd.f32 %v2292_v10, %v2234_v45  ;;  %v4950_v41 = vld [vmem:[#allocation12_spill] sm:$0xff]  ;;  %v4953_v45 = vld [vmem:[#allocation13_spill] sm:$0xff] }
 0x404   : > { %v2233_v42 = vmul.f32 %v2230_v7, %v2207_v53  ;;  %v4947_v48 = vsub.f32 1.0, %v4541_v29  ;;  %v1687_v17 = vand.u32 2147483647, %v1685_v34  ;;  %v2514_v21 = vmul.f32 %v2512_v61, %v2502_v59  ;;  %v2569_v7 = vpop.permute.xlu0 %2568 }
 0x405   : > { %v1481_v28 = vpack.c.bf16 %v1480_v49, %v1479_v38  ;;  %v2503_v44 = vmax.f32 %v4946_v55, 0.0  ;;  %v1565_v37 = vsub.f32 %v4387_v13, %v4948_v43  ;;  %v1645_v35 = vsub.f32 1.0, %v1643_v47  ;;  %v4952_v38 = vld [vmem:[#allocation30_spill] sm:$0xff] }
 0x406   : > { %v2235_v56 = vmul.f32 %v2233_v42, %v2223_v18  ;;  %v2444_v9 = vmax.f32 %v4947_v48, 0.0  ;;  %v1703_v15 = vand.u32 2147483647, %v1701_v26  ;;  %v1631_v4 = vmax.f32 %v1629_v22, 0.0 }
 0x407   : > { %3274 = vmatmul.mubr.msk.bf16.vlgmr.msra.gmra.mrb[20].mxu0 %vm1906_vm7, %v1481_v28  ;;  %v1581_v29 = vsub.f32 %v4408_v6, %v4949_v8  ;;  %v1689_v27 = vsub.f32 1.0, %v1687_v17  ;;  %v1567_v16 = vand.u32 2147483647, %v1565_v37  ;;  %v1647_v53 = vmax.f32 %v1645_v35, 0.0 }
 0x408   : > { %v2295_v0 = vadd.f32 %v2293_v12, %v2235_v56  ;;  %3296 = vmatpush3.bf16.msra.mxu0 %v4508_v11  ;;  %v2510_v54 = vpop.permute.xlu1 %2509  ;;  %3297 = vmatprep.mubr.msk.bf16.mxu0 %vm3584_vm0, %v4913_v52  ;;  %v2456_v20 = vmul.f32 %v2454_v31, %v2444_v9  ;;  %v2457_v11 = vmul.f32 %v2455_v51, %v4528_v33  ;;  %v4951_v33 = vld [vmem:[#allocation31_spill] sm:$0xff]  ;;  %v1705_v40 = vsub.f32 1.0, %v1703_v15  ;;  %v2571_v59 = vpop.permute.xlu0 %2570 }
 0x409   : > { %v2513_v62 = vmul.f32 %v2510_v54, %v2487_v36  ;;  %3301 = vmatprep.subr.bf16.mxu0 %v4913_v52  ;;  %v1686_v30 = vsub.f32 %v4387_v13, %v4951_v33  ;;  %v1583_v14 = vand.u32 2147483647, %v1581_v29  ;;  %v1691_v2 = vmax.f32 %v1689_v27, 0.0  ;;  %v2657_v29 = vld [vmem:[%s4827_s14 + $0x10] sm:$0xff]  ;;  %v2658_v27 = vld [vmem:[%s4827_s14 + $0x18] sm:$0xff] }
 0x40a   : > { %v2296_v24 = vpack.c.bf16 %v2295_v0, %v2294_v32  ;;  %v2516_v39 = vadd.f32 %v2514_v21, %v2456_v20  ;;  %v1702_v49 = vsub.f32 %v4408_v6, %v4952_v38  ;;  %v1569_v18 = vsub.f32 1.0, %v1567_v16 }
 0x40b   : > { %v2515_v58 = vmul.f32 %v2513_v62, %v2503_v44  ;;  %v1688_v42 = vand.u32 2147483647, %v1686_v30  ;;  %v1707_v13 = vmax.f32 %v1705_v40, 0.0  ;;  %v1585_v34 = vsub.f32 1.0, %v1583_v14 }
 0x40c   : > { %3280 = vmatmul.mubr.msk.bf16.vlgmr.msra.gmra.mrb[12].mxu1 %vm1861_vm6, %v2296_v24  ;;  %v1704_v19 = vand.u32 2147483647, %v1702_v49  ;;  %v1571_v28 = vmax.f32 %v1569_v18, 0.0  ;;  %v2573_v22 = vpop.permute.xlu0 %2572 }
 0x40d   : > { %v2517_v23 = vadd.f32 %v2515_v58, %v2457_v11  ;;  %3284 = vmatpush3.bf16.msra.mxu1 %v4950_v41  ;;  %v1652_v5 = vpop.permute.xlu1 %1651  ;;  %3291 = vmatprep.mubr.msk.bf16.mxu1 %vm3584_vm0, %v4913_v52  ;;  %v1690_v6 = vsub.f32 1.0, %v1688_v42  ;;  %v1587_v56 = vmax.f32 %v1585_v34, 0.0  ;;  %v2655_v11 = vld [vmem:[%s4827_s14] sm:$0xff]  ;;  %v2656_v58 = vld [vmem:[%s4827_s14 + $0x8] sm:$0xff] }
 0x40e   : > { %v1659_v1 = vmul.f32 %v1652_v5, %v1631_v4  ;;  %3285 = vmatprep.subr.bf16.mxu1 %v4913_v52  ;;  %v1706_v60 = vsub.f32 1.0, %v1704_v19  ;;  %v2659_v4 = vpack.c.bf16 %v2656_v58, %v2655_v11 }
 0x40f   : > { %v2518_v57 = vpack.c.bf16 %v2517_v23, %v2516_v39  ;;  %v1692_v31 = vmax.f32 %v1690_v6, 0.0  ;;  %v2660_v23 = vpack.c.bf16 %v2658_v27, %v2657_v29 }
 0x410   : > { %v1661_v50 = vmul.f32 %v1659_v1, %v1647_v53  ;;  %v1708_v44 = vmax.f32 %v1706_v60, 0.0 }
 0x411   : > { %3298 = vmatmul.mubr.msk.bf16.vlgmr.msra.gmra.mrb[24].mxu0 %vm1861_vm6, %v2518_v57 }
 0x412   : > { %3302 = vmatpush3.bf16.msra.mxu0 %v4953_v45  ;;  %v1711_v10 = vpop.permute.xlu1 %1710  ;;  %3309 = vmatprep.mubr.msk.bf16.mxu0 %vm3584_vm0, %v4913_v52 }
 0x413   : > { %v1717_v63 = vmul.f32 %v1711_v10, %v1691_v2  ;;  %3303 = vmatprep.subr.bf16.mxu0 %v4913_v52 }
 0x415   : > { %v1719_v61 = vmul.f32 %v1717_v63, %v1707_v13 }
 0x416   : > { %3304 = vmatpush3.bf16.msra.mxu0 %v2569_v7 }
 0x417   : > { %v1721_v47 = vadd.f32 %v1719_v61, %v1661_v50  ;;  %v1594_v12 = vpop.permute.xlu1 %1593  ;;  %3305 = vmatprep.subr.bf16.mxu0 %v4913_v52 }
 0x418   : > { %v1597_v36 = vmul.f32 %v1594_v12, %v1571_v28  ;;  %v3137_v28 = vld [vmem:[%s4828_s15] ss:$0 sm:$0xff] }
 0x41a   : > { %v1599_v26 = vmul.f32 %v1597_v36, %v1587_v56  ;;  %3306 = vmatpush3.bf16.msra.mxu0 %v2571_v59  ;;  %v3541_v56 = vld [vmem:[%s3828_s7] sm:$0xff] }
 0x41b   : > { %3307 = vmatprep.subr.bf16.mxu0 %v4913_v52 }
 0x41c   : > { %v1601_v51 = vadd.f32 %v1599_v26, %v4620_v46  ;;  %v1715_v55 = vpop.permute.xlu1 %1714 }
 0x41d   : > { %v1718_v32 = vmul.f32 %v1715_v55, %v1692_v31  ;;  %v3542_v31 = vld [vmem:[%s3828_s7 + $0x8] sm:$0xff] }
 0x41e   : > { %v1602_v0 = vpack.c.bf16 %v1601_v51, %v4625_v25  ;;  %3308 = vmatpush3.bf16.msra.mxu0 %v2573_v22 }
 0x41f   : > { %v1720_v54 = vmul.f32 %v1718_v32, %v1708_v44 }
 0x420   : > { %v2347_v48 = vpop.permute.xlu1 %2346 }
 0x421   : > { %v1722_v9 = vadd.f32 %v1720_v54, %v4634_v3  ;;  %3286 = vmatpush3.bf16.msra.mxu1 %v2347_v48 }
 0x422   : > { %3287 = vmatprep.subr.bf16.mxu1 %v4913_v52 }
 0x423   : > { %v1723_v17 = vpack.c.bf16 %v1722_v9, %v1721_v47 }
 0x424   : > { %v2349_v21 = vpop.permute.xlu1 %2348 }
 0x425   : > { %3288 = vmatpush3.bf16.msra.mxu1 %v2349_v21  ;;  %3310 = vmatmul.mubr.msk.bf16.vlgmr.msra.gmra.mrb[24].mxu0 %vm1906_vm7, %v1723_v17 }
 0x426   : > { %3289 = vmatprep.subr.bf16.mxu1 %v4913_v52 }
 0x428   : > { %v2351_v46 = vpop.permute.xlu1 %2350 }
 0x429   : > { %3290 = vmatpush3.bf16.msra.mxu1 %v2351_v46 }
 0x42a   : > { %3313 = vmatprep.subr.bf16.mxu1 %v4913_v52 }
 0x42c   : > { %3292 = vmatmul.mubr.msk.bf16.vlgmr.msra.gmra.mrb[12].mxu1 %vm1906_vm7, %v1602_v0 }
 0x42d   : > { %3317 = vmatprep.mubr.msk.bf16.mxu1 %vm3584_vm0, %v4913_v52  ;;  %3314 = vmatpush3.bf16.msra.mxu1 %v2659_v4 }
 0x42e   : > { %3315 = vmatprep.subr.bf16.mxu1 %v4913_v52 }
 0x431   : > { %3316 = vmatpush3.bf16.msra.mxu1 %v2660_v23 }
 0x432   : > { %3321 = vmatprep.subr.bf16.mxu1 %v4913_v52 }
 0x494   : > { %v1944_v25 = vpop.f32.mrb[8].mxu1 }
 0x495   : > { %v3257_v3 = vpop.f32.mrb[9].mxu1 }
 0x496   : > { %v1947_v62 = vpop.f32.mrb[10].mxu1  ;;  %v2760_v3 = vld [vmem:[%s4831_s18] sm:$0xff] }
 0x497   : > { %v3258_v43 = vpop.f32.mrb[11].mxu1 }
 0x4da   : > { %v2171_v37 = vpop.f32.mrb[20].mxu0 }
 0x4db   : > { %v3275_v35 = vpop.f32.mrb[21].mxu0 }
 0x4dc   : > { %v2174_v24 = vpop.f32.mrb[22].mxu0  ;;  %v2763_v35 = vld [vmem:[%s4831_s18 + $0x18] sm:$0xff] }
 0x4dd   : > { %v3485_v15 = vpack.i.bf16 %v2174_v24, %v2171_v37  ;;  %v3276_v20 = vpop.f32.mrb[23].mxu0  ;;  %v2762_v37 = vld [vmem:[%s4831_s18 + $0x10] sm:$0xff] }
 0x4de   : > { %v2765_v24 = vpack.c.bf16 %v2763_v35, %v2762_v37 }
 0x4df   : > { %3486 = vrot.lane.b32.xlu1 %v3485_v15, %s3612_s26  ;;  %s867_s26 = scalar_lea.vmem %s4837_s24, %s3817_s1 }
 0x4f8   : > { %v2615_v8 = vpop.f32.mrb[24].mxu0 }
 0x4f9   : > { %v3311_v39 = vpop.f32.mrb[25].mxu0 }
 0x4fa   : > { %v2618_v41 = vpop.f32.mrb[26].mxu0  ;;  %v3139_v39 = vld [vmem:[%s4829_s16] ss:$0 sm:$0xff] }
 0x4fb   : > { %v3495_v5 = vpack.i.bf16 %v2618_v41, %v2615_v8  ;;  %v3312_v16 = vpop.f32.mrb[27].mxu0 }
 0x4fc   : > { %v3140_v16 = vld [vmem:[%s4830_s17] ss:$0 sm:$0xff] }
 0x4fd   : > { %3496 = vrot.lane.b32.xlu1 %v3495_v5, %s3613_s28 }
 0x4ff   : > { %v2393_v53 = vpop.f32.mrb[12].mxu1 }
 0x500   : > { %v3293_v1 = vpop.f32.mrb[13].mxu1 }
 0x501   : > { %v2396_v33 = vpop.f32.mrb[14].mxu1  ;;  %v2820_v1 = vld [vmem:[%s4833_s20] sm:$0xff] }
 0x502   : > { %v3490_v30 = vpack.i.bf16 %v2396_v33, %v2393_v53  ;;  %v3294_v40 = vpop.f32.mrb[15].mxu1  ;;  %v2821_v33 = vld [vmem:[%s4833_s20 + $0x8] sm:$0xff] }
 0x504   : > { %3491 = vrot.lane.b32.xlu0 %v3490_v30, %s3614_s10 }
 0x551   : > { %v3487_v57 = vpop.permute.xlu1 %3486 }
 0x552   : > { %v3489_v14 = vunpack.i.h.bf16 %v3487_v57  ;;  %v3488_v50 = vunpack.i.l.bf16 %v3487_v57  ;;  %v2828_v57 = vpack.c.bf16 %v2821_v33, %v2820_v1 }
 0x554   : > { %v2647_v18 = vsel %vm2646_vm8, %v1944_v25, %v3488_v50  ;;  %v2648_v45 = vsel %vm2646_vm8, %v1947_v62, %v3489_v14  ;;  %v2761_v62 = vld [vmem:[%s4831_s18 + $0x8] sm:$0xff]  ;;  %v2822_v50 = vld [vmem:[%s4833_s20 + $0x10] sm:$0xff] }
 0x555   : > { %v2764_v43 = vpack.c.bf16 %v2761_v62, %v2760_v3 }
 0x56f   : > { %v3497_v2 = vpop.permute.xlu1 %3496 }
 0x570   : > { %v3499_v10 = vunpack.i.h.bf16 %v3497_v2  ;;  %v3498_v42 = vunpack.i.l.bf16 %v3497_v2  ;;  %v2823_v2 = vld [vmem:[%s4833_s20 + $0x18] sm:$0xff] }
 0x576   : > { %v3492_v38 = vpop.permute.xlu0 %3491 }
 0x577   : > { %v3494_v49 = vunpack.i.h.bf16 %v3492_v38  ;;  %v3493_v7 = vunpack.i.l.bf16 %v3492_v38  ;;  %v2829_v38 = vpack.c.bf16 %v2823_v2, %v2822_v50 }
 0x579   : > { %v2650_v13 = vsel %vm1861_vm6, %v2648_v45, %v3494_v49  ;;  %v2649_v63 = vsel %vm1861_vm6, %v2647_v18, %v3493_v7  ;;  %v2824_v49 = vld [vmem:[%s4833_s20 + $0x20] sm:$0xff]  ;;  %v2825_v7 = vld [vmem:[%s4833_s20 + $0x28] sm:$0xff]  ;;  %v2826_v45 = vld [vmem:[%s4833_s20 + $0x30] sm:$0xff] }
 0x57a   : > { %v2653_v34 = vsel %vm2651_vm9, %v2650_v13, %v3499_v10  ;;  %v2652_v19 = vsel %vm2651_vm9, %v2649_v63, %v3498_v42  ;;  %v2830_v18 = vpack.c.bf16 %v2825_v7, %v2824_v49  ;;  %v2827_v10 = vld [vmem:[%s4833_s20 + $0x38] sm:$0xff]  ;;  %v3141_v13 = vld [vmem:[%s4832_s19] ss:$0 sm:$0xff] }
 0x57b   : > { %v2654_v61 = vpack.c.bf16 %v2653_v34, %v2652_v19  ;;  %v2831_v42 = vpack.c.bf16 %v2827_v10, %v2826_v45 }
 0x57d   : > { %3318 = vmatmul.mubr.msk.bf16.vlgmr.msra.gmra.mrb[16].mxu1 %vm906_vm1, %v2654_v61 }
 0x57e   : > { %3325 = vmatprep.mubr.msk.bf16.mxu1 %vm3584_vm0, %v4913_v52  ;;  %3322 = vmatpush3.bf16.msra.mxu1 %v2764_v43 }
 0x57f   : > { %3323 = vmatprep.subr.bf16.mxu1 %v4913_v52 }
 0x582   : > { %3324 = vmatpush3.bf16.msra.mxu1 %v2765_v24 }
 0x583   : > { %3329 = vmatprep.subr.bf16.mxu1 %v4913_v52 }
 0x650   : > { %v2705_v6 = vpop.f32.mrb[16].mxu1 }
 0x651   : > { %v2706_v59 = vadd.f32 %v3137_v28, %v2705_v6  ;;  %v3319_v47 = vpop.f32.mrb[17].mxu1 }
 0x652   : > { %v2708_v12 = vpop.f32.mrb[18].mxu1 }
 0x653   : > { %v2712_v36 = vadd.f32 %v3541_v56, %v2706_v59  ;;  %v2709_v60 = vadd.f32 %v3137_v28, %v2708_v12  ;;  %v3320_v26 = vpop.f32.mrb[19].mxu1  ;;  %v3143_v12 = vld [vmem:[%s4834_s21] ss:$0 sm:$0xff] }
 0x655   : > { %v2713_v51 = vadd.f32 %v3542_v31, %v2709_v60  ;;  %v2716_v55 = vsel %vm906_vm1, %v2712_v36, 0.0 }
 0x656   : > { %2717 = vadd.xlane.f32.xlu0 %v2716_v55 }
 0x657   : > { %v2719_v44 = vsel %vm906_vm1, %v2713_v51, 0.0 }
 0x658   : > { %2720 = vadd.xlane.f32.xlu1 %v2719_v44 }
 0x6e3   : > { %v2718_v22 = vpop.xlane.xlu0 %2717 }
 0x6e4   : > { %v2723_v32 = vmul.f32 0.03125, %v2718_v22 }
 0x6e5   : > { %v2721_v0 = vpop.xlane.xlu1 %2720 }
 0x6e6   : > { %v2725_v54 = vsub.f32 %v2712_v36, %v2723_v32  ;;  %v2724_v48 = vmul.f32 0.03125, %v2721_v0 }
 0x6e8   : > { %v2726_v9 = vsub.f32 %v2713_v51, %v2724_v48  ;;  %v2727_v17 = vmul.f32 %v2725_v54, %v2725_v54 }
 0x6ea   : > { %v2729_v21 = vsel %vm906_vm1, %v2727_v17, 0.0  ;;  %v2728_v46 = vmul.f32 %v2726_v9, %v2726_v9 }
 0x6eb   : > { %2730 = vadd.xlane.f32.xlu0 %v2729_v21 }
 0x6ec   : > { %v2732_v25 = vsel %vm906_vm1, %v2728_v46, 0.0 }
 0x6ef   : > { %2733 = vadd.xlane.f32.xlu0 %v2732_v25 }
 0x778   : > { %v2731_v15 = vpop.xlane.xlu0 %2730 }
 0x779   : > { %v2735_v20 = vmul.f32 0.03125, %v2731_v15 }
 0x77b   : > { %v2737_v11 = vadd.f32 1e-05, %v2735_v20 }
 0x77c   : > { %v2734_v58 = vpop.xlane.xlu0 %2733 }
 0x77d   : > { %3533 = vrsqrt.f32 %v2737_v11  ;;  %v2736_v4 = vmul.f32 0.03125, %v2734_v58  ;;  %v3145_v58 = vld [vmem:[%s4835_s22] ss:$0 sm:$0xff] }
 0x77f   : > { %v2738_v8 = vadd.f32 1e-05, %v2736_v4 }
 0x781   : > { %3535 = vrsqrt.f32 %v2738_v8 }
 0x787   : > { %v3534_v29 = vpop.eup %3533 }
 0x788   : > { %v2741_v27 = vmul.f32 %v3534_v29, %v2725_v54  ;;  %v3146_v29 = vld [vmem:[%s4836_s23] ss:$0 sm:$0xff] }
 0x78a   : > { %v2749_v41 = vmul.f32 %v3139_v39, %v2741_v27 }
 0x78b   : > { %v3536_v23 = vpop.eup %3535 }
 0x78c   : > { %v2742_v5 = vmul.f32 %v3536_v23, %v2726_v9  ;;  %v2757_v30 = vadd.f32 %v3140_v16, %v2749_v41 }
 0x78e   : > { %v2750_v53 = vmul.f32 %v3139_v39, %v2742_v5 }
 0x790   : > { %v2758_v40 = vadd.f32 %v3140_v16, %v2750_v53 }
 0x792   : > { %v2759_v14 = vpack.c.bf16 %v2758_v40, %v2757_v30 }
 0x794   : > { %3326 = vmatmul.mubr.msk.bf16.vlgmr.msra.gmra.mrb[20].mxu1 %vm906_vm1, %v2759_v14 }
 0x795   : > { %3330 = vmatpush3.bf16.msra.mxu1 %v2828_v57  ;;  %3337 = vmatprep.mubr.msk.bf16.mxu1 %vm3584_vm0, %v4913_v52 }
 0x796   : > { %3331 = vmatprep.subr.bf16.mxu1 %v4913_v52 }
 0x799   : > { %3332 = vmatpush3.bf16.msra.mxu1 %v2829_v38 }
 0x79a   : > { %3333 = vmatprep.subr.bf16.mxu1 %v4913_v52 }
 0x79d   : > { %3334 = vmatpush3.bf16.msra.mxu1 %v2830_v18 }
 0x79e   : > { %3335 = vmatprep.subr.bf16.mxu1 %v4913_v52 }
 0x7a1   : > { %3336 = vmatpush3.bf16.msra.mxu1 %v2831_v42 }
 0x867   : > { %v2810_v63 = vpop.f32.mrb[20].mxu1 }
 0x868   : > { %v2811_v34 = vadd.f32 %v3141_v13, %v2810_v63  ;;  %v3327_v19 = vpop.f32.mrb[21].mxu1 }
 0x869   : > { %v2813_v61 = vpop.f32.mrb[22].mxu1 }
 0x86a   : > { %v2814_v28 = vadd.f32 %v3141_v13, %v2813_v61  ;;  %v3328_v52 = vpop.f32.mrb[23].mxu1  ;;  %v2817_v6 = vmax.f32 %v2811_v34, 0.0 }
 0x86c   : > { %v2818_v59 = vmax.f32 %v2814_v28, 0.0 }
 0x86e   : > { %v2819_v47 = vpack.c.bf16 %v2818_v59, %v2817_v6 }
 0x870   : > { %3338 = vmatmul.mubr.msk.bf16.vlgmr.msra.gmra.mrb[24].mxu1 %vm1906_vm7, %v2819_v47 }
 0x943   : > { %v2876_v56 = vpop.f32.mrb[24].mxu1 }
 0x944   : > { %v2877_v36 = vadd.f32 %v3143_v12, %v2876_v56  ;;  %v3339_v60 = vpop.f32.mrb[25].mxu1 }
 0x945   : > { %v2879_v26 = vpop.f32.mrb[26].mxu1 }
 0x946   : > { %v2883_v31 = vadd.f32 %v2877_v36, %v2757_v30  ;;  %v2880_v51 = vadd.f32 %v3143_v12, %v2879_v26  ;;  %v3340_v55 = vpop.f32.mrb[27].mxu1 }
 0x948   : > { %v2884_v44 = vadd.f32 %v2880_v51, %v2758_v40  ;;  %v2887_v22 = vsel %vm906_vm1, %v2883_v31, 0.0 }
 0x949   : > { %2888 = vadd.xlane.f32.xlu0 %v2887_v22 }
 0x94a   : > { %v2890_v32 = vsel %vm906_vm1, %v2884_v44, 0.0 }
 0x94b   : > { %2891 = vadd.xlane.f32.xlu1 %v2890_v32 }
 0x9d6   : > { %v2889_v0 = vpop.xlane.xlu0 %2888 }
 0x9d7   : > { %v2893_v54 = vmul.f32 0.03125, %v2889_v0 }
 0x9d8   : > { %v2892_v48 = vpop.xlane.xlu1 %2891 }
 0x9d9   : > { %v2895_v9 = vsub.f32 %v2883_v31, %v2893_v54  ;;  %v2894_v17 = vmul.f32 0.03125, %v2892_v48 }
 0x9db   : > { %v2896_v21 = vsub.f32 %v2884_v44, %v2894_v17  ;;  %v2897_v46 = vmul.f32 %v2895_v9, %v2895_v9 }
 0x9dd   : > { %v2899_v25 = vsel %vm906_vm1, %v2897_v46, 0.0  ;;  %v2898_v3 = vmul.f32 %v2896_v21, %v2896_v21 }
 0x9de   : > { %2900 = vadd.xlane.f32.xlu0 %v2899_v25 }
 0x9df   : > { %v2902_v62 = vsel %vm906_vm1, %v2898_v3, 0.0 }
 0x9e0   : > { %2903 = vadd.xlane.f32.xlu1 %v2902_v62 }
 0xa6b   : > { %v2901_v43 = vpop.xlane.xlu0 %2900 }
 0xa6c   : > { %v2905_v37 = vmul.f32 0.03125, %v2901_v43 }
 0xa6d   : > { %v2904_v35 = vpop.xlane.xlu1 %2903 }
 0xa6e   : > { %v2907_v24 = vadd.f32 1e-05, %v2905_v37  ;;  %v2906_v15 = vmul.f32 0.03125, %v2904_v35 }
 0xa70   : > { %3537 = vrsqrt.f32 %v2907_v24  ;;  %v2908_v20 = vadd.f32 1e-05, %v2906_v15 }
 0xa72   : > { %3539 = vrsqrt.f32 %v2908_v20 }
 0xa7a   : > { %v3538_v11 = vpop.eup %3537 }
 0xa7b   : > { %v2911_v4 = vmul.f32 %v3538_v11, %v2895_v9 }
 0xa7c   : > { %v3540_v8 = vpop.eup %3539 }
 0xa7d   : > { %v2919_v27 = vmul.f32 %v3145_v58, %v2911_v4  ;;  %v2912_v39 = vmul.f32 %v3540_v8, %v2896_v21 }
 0xa7f   : > { %v2927_v23 = vadd.f32 %v3146_v29, %v2919_v27  ;;  %v2920_v41 = vmul.f32 %v3145_v58, %v2912_v39 }
 0xa81   : > { %2929 = vst.msk [vmem:[%s867_s26] sm:$0xff] %vm906_vm1, %v2927_v23  ;;  %v2928_v5 = vadd.f32 %v3146_v29, %v2920_v41 }
 0xa83   : > { %2930 = vst.msk [vmem:[%s867_s26 + $0x8] sm:$0xff] %vm906_vm1, %v2928_v5 }
 0xa84 PF: > { %s34_s6 = sadd.s32 1, %s3581_s6   ;;  %s4954_s26 = sld [smem:[#allocation2_spill]] }
 0xa85   : > { %p31_p7 = scmp.ge.s32.totalorder %s34_s6, 12   ;;  %s4955_s7 = sld [smem:[#allocation3_spill]] }
 0xa86   : > { %s4956_s28 = sld [smem:[#allocation4_spill]]  ;;  %s4957_s5 = smov %s3573_s27 }
 0xa87   :  { %33 = sbr.rel (!%p31_p7) target bundleno = 11 (0xb), region = 155 }
 0xa8b   : > { %s4958_s27 = smov %s4955_s7 }

</bundles_post_ra>
